<compile_context>
chip_gen: v7x
topology: tpu7x:2x2x1
jax: 0.10.0
libtpu: 0.0.40
codegen_flags: <defaults>
</compile_context>

<pallas_src>
import jax
import jax.numpy as jnp
from jax.experimental import pallas as pl
from jax.experimental.pallas import tpu as pltpu

N_INPUT = 784            # logical input width (28*28)
K_PAD = 896              # 7 * 128: lane/MXU-aligned contraction dim for layer 1
H1 = 1024
H2 = 512
N_CHUNKS = 4             # H1 chunking for MXU/VPU interleave
H1_CHUNK = H1 // N_CHUNKS


def _round_up(x, m):
    return ((x + m - 1) // m) * m


def _pick_tile(batch, block_b, sub):
    """Pick a batch tile (multiple of `sub`) that avoids padding x when possible."""
    block_b = max(sub, (block_b // sub) * sub)
    if batch <= block_b:
        return max(_round_up(batch, sub), sub)
    # Prefer the largest tile <= block_b that divides the batch exactly
    # (no wrapper-side pad / copy of the activations).
    for tb in range(block_b, sub - 1, -sub):
        if batch % tb == 0:
            return tb
    return block_b   # fall back: only the tail tile is padded


def _discriminator_kernel(x_ref, w1_ref, b1_ref, w2_ref, b2_ref,
                          w3_ref, b3_ref, o_ref):
    tb = x_ref.shape[0]
    x = x_ref[...].astype(jnp.bfloat16)                  # (tb, K_PAD)

    # Layers 1+2 fused, chunked over H1 so each chunk's MXU matmuls are
    # independent of the previous chunk's VPU bias/ReLU/cast epilogue
    # (statically unrolled -> full LLO scheduler visibility).
    acc2 = jnp.zeros((tb, H2), jnp.float32)
    for c in range(N_CHUNKS):
        lo, hi = c * H1_CHUNK, (c + 1) * H1_CHUNK
        # (tb,K_PAD) @ (K_PAD,256) on the MXU, bf16 inputs, f32 accumulate.
        h1_c = jnp.dot(x, w1_ref[:, lo:hi],
                       preferred_element_type=jnp.float32)
        h1_c = jnp.maximum(h1_c + b1_ref[:, lo:hi], 0.0)
        # (tb,256) @ (256,H2) on the MXU, accumulated in f32 across chunks.
        acc2 = acc2 + jnp.dot(h1_c.astype(jnp.bfloat16), w2_ref[lo:hi, :],
                              preferred_element_type=jnp.float32)
    h2 = jnp.maximum(acc2 + b2_ref[...], 0.0)            # (tb, H2) f32

    # Layer 3 (512 -> 1): kept off the MXU (N=1 would waste the systolic
    # array).  VPU broadcast-multiply + XLU lane reduction, all in f32.
    z = jnp.sum(h2 * w3_ref[...], axis=-1, keepdims=True) + b3_ref[0, 0]

    # Exact sigmoid (EUP exp + exact reciprocal) -> strictly inside (0, 1).
    p = pl.reciprocal(1.0 + jnp.exp(-z))                 # (tb, 1) f32

    # Lane-dense store: one XLU transpose of the skinny (tb,1) slab, then an
    # unmasked row store instead of a 1-lane-wide masked column store.
    o_ref[...] = jnp.transpose(p).reshape(1, 1, tb).astype(o_ref.dtype)


def discriminator_forward(x, params, *, block_b=512):
    """x: any shape whose trailing dims flatten to 784 (e.g. (N,1,28,28)).

    x may be f32 or bf16 (no wrapper-side dtype cast is added either way).
    """
    w1, b1, w2, b2, w3_row, b3 = params
    xf = x.reshape(-1, N_INPUT)
    batch = xf.shape[0]

    # Sublane granularity: 8 rows for 4-byte activations, 16 for 2-byte.
    sub = 16 if jnp.dtype(xf.dtype).itemsize == 2 else 8
    tb = _pick_tile(batch, block_b, sub)
    padded = _round_up(batch, tb)

    # Single fused pad: K alignment (784 -> 896, zero cols x zero w1-rows = 0)
    # plus the batch tail only when tb does not divide the batch.
    pad_rows = padded - batch
    pad_cols = K_PAD - N_INPUT
    if pad_rows or pad_cols:
        xf = jnp.pad(xf, ((0, pad_rows), (0, pad_cols)))

    n_tiles = padded // tb

    out = pl.pallas_call(
        _discriminator_kernel,
        out_shape=jax.ShapeDtypeStruct((n_tiles, 1, tb), jnp.float32),
        grid=(n_tiles,),
        in_specs=[
            # Activations: tiled over the batch, software-pipelined HBM<->VMEM.
            pl.BlockSpec((tb, K_PAD), lambda i: (i, 0)),
            # Weights / biases: full-shape blocks with constant index_maps ->
            # DMA'd once, resident in VMEM across all grid steps.
            pl.BlockSpec((K_PAD, H1), lambda i: (0, 0)),   # w1 (bf16, K-padded)
            pl.BlockSpec((1, H1), lambda i: (0, 0)),       # b1 (f32)
            pl.BlockSpec((H1, H2), lambda i: (0, 0)),      # w2 (bf16)
            pl.BlockSpec((1, H2), lambda i: (0, 0)),       # b2 (f32)
            pl.BlockSpec((1, H2), lambda i: (0, 0)),       # w3 row (f32)
            # Scalar bias b3 lives in SMEM.
            pl.BlockSpec(memory_space=pltpu.MemorySpace.SMEM),
        ],
        out_specs=pl.BlockSpec((1, 1, tb), lambda i: (i, 0, 0)),
        compiler_params=pltpu.CompilerParams(
            dimension_semantics=("parallel",),        # megacore / v7x dual-TC
            vmem_limit_bytes=48 * 1024 * 1024,        # headroom for tb up to ~1024
        ),
    )(xf, w1, b1, w2, b2, w3_row, b3)

    return out.reshape(padded, 1)[:batch]


def init_params(key):
    """PyTorch-Linear-style init (U[-1/sqrt(fan_in), +]); w1 K-padded to 896."""
    ks = jax.random.split(key, 6)

    def linear(kw, kb, fan_in, fan_out):
        bound = 1.0 / (fan_in ** 0.5)
        w = jax.random.uniform(kw, (fan_in, fan_out), jnp.float32, -bound, bound)
        b = jax.random.uniform(kb, (1, fan_out), jnp.float32, -bound, bound)
        return w, b

    w1, b1 = linear(ks[0], ks[1], N_INPUT, H1)
    w2, b2 = linear(ks[2], ks[3], H1, H2)
    w3, b3 = linear(ks[4], ks[5], H2, 1)

    # Pad layer-1 weights once to the aligned K (zero rows contribute nothing);
    # bf16 weights for the two MXU layers; layer-3 weight stays f32 as a row.
    w1p = jnp.zeros((K_PAD, H1), jnp.float32).at[:N_INPUT].set(w1)
    return (w1p.astype(jnp.bfloat16), b1,
            w2.astype(jnp.bfloat16), b2,
            w3.reshape(1, H2), b3.reshape(1, 1))


if __name__ == "__main__":
    key = jax.random.PRNGKey(0)
    k_params, k_x = jax.random.split(key)

    params = init_params(k_params)
    # Small MNIST-like batch: (16, 1, 28, 28) -> flattens to (16, 784).
    x = jax.random.normal(k_x, (16, 1, 28, 28), jnp.float32)

    # block_b=8 forces a 2-step grid here to exercise the pipelined batch
    # tiling and the lane-dense output path (production default is 512).
    out = discriminator_forward(x, params, block_b=8)
    jax.block_until_ready(out)

    # Reference check in plain JAX (f32 math on the same weight values).
    w1, b1, w2, b2, w3_row, b3 = params
    xf = x.reshape(-1, N_INPUT)
    h1 = jnp.maximum(xf @ w1[:N_INPUT].astype(jnp.float32) + b1, 0.0)
    h2 = jnp.maximum(h1 @ w2.astype(jnp.float32) + b2, 0.0)
    z = h2 @ w3_row.T + b3
    ref = 1.0 / (1.0 + jnp.exp(-z))

    assert out.shape == (16, 1)
    max_err = float(jnp.max(jnp.abs(out - ref)))
    # bf16 matmuls vs f32 reference -> loosened tolerance.
    assert jnp.allclose(out, ref, atol=2e-2, rtol=2e-2), max_err

    print("KERNEL_OK")
</pallas_src>

<mosaic_0001>
module attributes {stable_mosaic.version = 11 : i64} {
  func.func @_discriminator_kernel(%arg0: i32, %arg1: memref<8x896xf32, #tpu.memory_space<vmem>>, %arg2: memref<896x1024xbf16, #tpu.memory_space<vmem>>, %arg3: memref<1x1024xf32, #tpu.memory_space<vmem>>, %arg4: memref<1024x512xbf16, #tpu.memory_space<vmem>>, %arg5: memref<1x512xf32, #tpu.memory_space<vmem>>, %arg6: memref<1x512xf32, #tpu.memory_space<vmem>>, %arg7: memref<1x1xf32, #tpu.memory_space<smem>>, %arg8: memref<1x1x8xf32, #tpu.memory_space<vmem>>) attributes {dimension_semantics = [#tpu.dimension_semantics<parallel>], iteration_bounds = array<i64: 2>, scalar_prefetch = 0 : i64, scratch_operands = 0 : i64, tpu.core_type = #tpu.core_type<tc>, window_params = [{transform_indices = @transform_0, window_bounds = array<i64: 8, 896>}, {pipeline_mode = #tpu.pipeline_mode<synchronous>, transform_indices = @transform_1, window_bounds = array<i64: 896, 1024>}, {pipeline_mode = #tpu.pipeline_mode<synchronous>, transform_indices = @transform_2, window_bounds = array<i64: 1, 1024>}, {pipeline_mode = #tpu.pipeline_mode<synchronous>, transform_indices = @transform_3, window_bounds = array<i64: 1024, 512>}, {pipeline_mode = #tpu.pipeline_mode<synchronous>, transform_indices = @transform_4, window_bounds = array<i64: 1, 512>}, {pipeline_mode = #tpu.pipeline_mode<synchronous>, transform_indices = @transform_5, window_bounds = array<i64: 1, 512>}, {transform_indices = @transform_6, window_bounds = array<i64: 1, 1>}, {transform_indices = @transform_7, window_bounds = array<i64: 1, 1, 8>}]} {
    %c0 = arith.constant 0 : index
    %c0_0 = arith.constant 0 : index
    %0 = vector.load %arg1[%c0, %c0_0] : memref<8x896xf32, #tpu.memory_space<vmem>>, vector<8x896xf32>
    %1 = arith.truncf %0 : vector<8x896xf32> to vector<8x896xbf16>
    %cst = arith.constant 0.000000e+00 : f32
    %2 = vector.broadcast %cst : f32 to vector<8x512xf32>
    %c0_1 = arith.constant 0 : index
    %c0_2 = arith.constant 0 : index
    %3 = vector.load %arg2[%c0_1, %c0_2] : memref<896x1024xbf16, #tpu.memory_space<vmem>>, vector<896x256xbf16>
    %cst_3 = arith.constant dense<0.000000e+00> : vector<8x256xf32>
    %4 = tpu.matmul %1, %3, %cst_3 {dimension_numbers = #tpu.dot_dimension_numbers<[1], [0], [0], [1], [0, 0, 1, 1], [], []>} : vector<8x896xbf16>, vector<896x256xbf16>, vector<8x256xf32> -> vector<8x256xf32>
    %c0_4 = arith.constant 0 : index
    %c0_5 = arith.constant 0 : index
    %5 = vector.load %arg3[%c0_4, %c0_5] : memref<1x1024xf32, #tpu.memory_space<vmem>>, vector<1x256xf32>
    %6 = vector.broadcast %5 : vector<1x256xf32> to vector<8x256xf32>
    %7 = arith.addf %4, %6 : vector<8x256xf32>
    %cst_6 = arith.constant 0.000000e+00 : f32
    %8 = vector.broadcast %cst_6 : f32 to vector<8x256xf32>
    %9 = arith.maximumf %7, %8 : vector<8x256xf32>
    %10 = arith.truncf %9 : vector<8x256xf32> to vector<8x256xbf16>
    %c0_7 = arith.constant 0 : index
    %c0_8 = arith.constant 0 : index
    %11 = vector.load %arg4[%c0_7, %c0_8] : memref<1024x512xbf16, #tpu.memory_space<vmem>>, vector<256x512xbf16>
    %cst_9 = arith.constant dense<0.000000e+00> : vector<8x512xf32>
    %12 = tpu.matmul %10, %11, %cst_9 {dimension_numbers = #tpu.dot_dimension_numbers<[1], [0], [0], [1], [0, 0, 1, 1], [], []>} : vector<8x256xbf16>, vector<256x512xbf16>, vector<8x512xf32> -> vector<8x512xf32>
    %13 = arith.addf %2, %12 : vector<8x512xf32>
    %c0_10 = arith.constant 0 : index
    %c256 = arith.constant 256 : index
    %14 = vector.load %arg2[%c0_10, %c256] : memref<896x1024xbf16, #tpu.memory_space<vmem>>, vector<896x256xbf16>
    %cst_11 = arith.constant dense<0.000000e+00> : vector<8x256xf32>
    %15 = tpu.matmul %1, %14, %cst_11 {dimension_numbers = #tpu.dot_dimension_numbers<[1], [0], [0], [1], [0, 0, 1, 1], [], []>} : vector<8x896xbf16>, vector<896x256xbf16>, vector<8x256xf32> -> vector<8x256xf32>
    %c0_12 = arith.constant 0 : index
    %c256_13 = arith.constant 256 : index
    %16 = vector.load %arg3[%c0_12, %c256_13] : memref<1x1024xf32, #tpu.memory_space<vmem>>, vector<1x256xf32>
    %17 = vector.broadcast %16 : vector<1x256xf32> to vector<8x256xf32>
    %18 = arith.addf %15, %17 : vector<8x256xf32>
    %cst_14 = arith.constant 0.000000e+00 : f32
    %19 = vector.broadcast %cst_14 : f32 to vector<8x256xf32>
    %20 = arith.maximumf %18, %19 : vector<8x256xf32>
    %21 = arith.truncf %20 : vector<8x256xf32> to vector<8x256xbf16>
    %c256_15 = arith.constant 256 : index
    %c0_16 = arith.constant 0 : index
    %22 = vector.load %arg4[%c256_15, %c0_16] : memref<1024x512xbf16, #tpu.memory_space<vmem>>, vector<256x512xbf16>
    %cst_17 = arith.constant dense<0.000000e+00> : vector<8x512xf32>
    %23 = tpu.matmul %21, %22, %cst_17 {dimension_numbers = #tpu.dot_dimension_numbers<[1], [0], [0], [1], [0, 0, 1, 1], [], []>} : vector<8x256xbf16>, vector<256x512xbf16>, vector<8x512xf32> -> vector<8x512xf32>
    %24 = arith.addf %13, %23 : vector<8x512xf32>
    %c0_18 = arith.constant 0 : index
    %c512 = arith.constant 512 : index
    %25 = vector.load %arg2[%c0_18, %c512] : memref<896x1024xbf16, #tpu.memory_space<vmem>>, vector<896x256xbf16>
    %cst_19 = arith.constant dense<0.000000e+00> : vector<8x256xf32>
    %26 = tpu.matmul %1, %25, %cst_19 {dimension_numbers = #tpu.dot_dimension_numbers<[1], [0], [0], [1], [0, 0, 1, 1], [], []>} : vector<8x896xbf16>, vector<896x256xbf16>, vector<8x256xf32> -> vector<8x256xf32>
    %c0_20 = arith.constant 0 : index
    %c512_21 = arith.constant 512 : index
    %27 = vector.load %arg3[%c0_20, %c512_21] : memref<1x1024xf32, #tpu.memory_space<vmem>>, vector<1x256xf32>
    %28 = vector.broadcast %27 : vector<1x256xf32> to vector<8x256xf32>
    %29 = arith.addf %26, %28 : vector<8x256xf32>
    %cst_22 = arith.constant 0.000000e+00 : f32
    %30 = vector.broadcast %cst_22 : f32 to vector<8x256xf32>
    %31 = arith.maximumf %29, %30 : vector<8x256xf32>
    %32 = arith.truncf %31 : vector<8x256xf32> to vector<8x256xbf16>
    %c512_23 = arith.constant 512 : index
    %c0_24 = arith.constant 0 : index
    %33 = vector.load %arg4[%c512_23, %c0_24] : memref<1024x512xbf16, #tpu.memory_space<vmem>>, vector<256x512xbf16>
    %cst_25 = arith.constant dense<0.000000e+00> : vector<8x512xf32>
    %34 = tpu.matmul %32, %33, %cst_25 {dimension_numbers = #tpu.dot_dimension_numbers<[1], [0], [0], [1], [0, 0, 1, 1], [], []>} : vector<8x256xbf16>, vector<256x512xbf16>, vector<8x512xf32> -> vector<8x512xf32>
    %35 = arith.addf %24, %34 : vector<8x512xf32>
    %c0_26 = arith.constant 0 : index
    %c768 = arith.constant 768 : index
    %36 = vector.load %arg2[%c0_26, %c768] : memref<896x1024xbf16, #tpu.memory_space<vmem>>, vector<896x256xbf16>
    %cst_27 = arith.constant dense<0.000000e+00> : vector<8x256xf32>
    %37 = tpu.matmul %1, %36, %cst_27 {dimension_numbers = #tpu.dot_dimension_numbers<[1], [0], [0], [1], [0, 0, 1, 1], [], []>} : vector<8x896xbf16>, vector<896x256xbf16>, vector<8x256xf32> -> vector<8x256xf32>
    %c0_28 = arith.constant 0 : index
    %c768_29 = arith.constant 768 : index
    %38 = vector.load %arg3[%c0_28, %c768_29] : memref<1x1024xf32, #tpu.memory_space<vmem>>, vector<1x256xf32>
    %39 = vector.broadcast %38 : vector<1x256xf32> to vector<8x256xf32>
    %40 = arith.addf %37, %39 : vector<8x256xf32>
    %cst_30 = arith.constant 0.000000e+00 : f32
    %41 = vector.broadcast %cst_30 : f32 to vector<8x256xf32>
    %42 = arith.maximumf %40, %41 : vector<8x256xf32>
    %43 = arith.truncf %42 : vector<8x256xf32> to vector<8x256xbf16>
    %c768_31 = arith.constant 768 : index
    %c0_32 = arith.constant 0 : index
    %44 = vector.load %arg4[%c768_31, %c0_32] : memref<1024x512xbf16, #tpu.memory_space<vmem>>, vector<256x512xbf16>
    %cst_33 = arith.constant dense<0.000000e+00> : vector<8x512xf32>
    %45 = tpu.matmul %43, %44, %cst_33 {dimension_numbers = #tpu.dot_dimension_numbers<[1], [0], [0], [1], [0, 0, 1, 1], [], []>} : vector<8x256xbf16>, vector<256x512xbf16>, vector<8x512xf32> -> vector<8x512xf32>
    %46 = arith.addf %35, %45 : vector<8x512xf32>
    %c0_34 = arith.constant 0 : index
    %c0_35 = arith.constant 0 : index
    %47 = vector.load %arg5[%c0_34, %c0_35] : memref<1x512xf32, #tpu.memory_space<vmem>>, vector<1x512xf32>
    %48 = vector.broadcast %47 : vector<1x512xf32> to vector<8x512xf32>
    %49 = arith.addf %46, %48 : vector<8x512xf32>
    %cst_36 = arith.constant 0.000000e+00 : f32
    %50 = vector.broadcast %cst_36 : f32 to vector<8x512xf32>
    %51 = arith.maximumf %49, %50 : vector<8x512xf32>
    %c0_37 = arith.constant 0 : index
    %c0_38 = arith.constant 0 : index
    %52 = vector.load %arg6[%c0_37, %c0_38] : memref<1x512xf32, #tpu.memory_space<vmem>>, vector<1x512xf32>
    %53 = vector.broadcast %52 : vector<1x512xf32> to vector<8x512xf32>
    %54 = arith.mulf %51, %53 : vector<8x512xf32>
    %cst_39 = arith.constant dense<0.000000e+00> : vector<8xf32>
    %55 = vector.multi_reduction <add>, %54, %cst_39 [1] : vector<8x512xf32> to vector<8xf32>
    %56 = vector.shape_cast %55 : vector<8xf32> to vector<8x1xf32>
    %c0_40 = arith.constant 0 : index
    %c0_41 = arith.constant 0 : index
    %57 = memref.load %arg7[%c0_40, %c0_41] : memref<1x1xf32, #tpu.memory_space<smem>>
    %58 = vector.broadcast %57 : f32 to vector<8x1xf32>
    %59 = arith.addf %56, %58 : vector<8x1xf32>
    %cst_42 = arith.constant 0.000000e+00 : f32
    %60 = vector.broadcast %cst_42 : f32 to vector<8x1xf32>
    %61 = arith.subf %60, %59 : vector<8x1xf32>
    %62 = math.exp %61 : vector<8x1xf32>
    %cst_43 = arith.constant 1.000000e+00 : f32
    %63 = vector.broadcast %cst_43 : f32 to vector<8x1xf32>
    %64 = arith.addf %63, %62 : vector<8x1xf32>
    %65 = tpu.reciprocal %64 : vector<8x1xf32> -> vector<8x1xf32>
    %66 = tpu.transpose %65, [1, 0] : vector<8x1xf32> -> vector<1x8xf32>
    %67 = vector.shape_cast %66 : vector<1x8xf32> to vector<1x1x8xf32>
    %c0_44 = arith.constant 0 : index
    %c0_45 = arith.constant 0 : index
    %c0_46 = arith.constant 0 : index
    %68 = vector.load %arg8[%c0_44, %c0_45, %c0_46] : memref<1x1x8xf32, #tpu.memory_space<vmem>>, vector<1x1x8xf32>
    tpu.vector_store %arg8[%c0_44, %c0_45, %c0_46], %67 {strides = array<i32>} : memref<1x1x8xf32, #tpu.memory_space<vmem>>, vector<1x1x8xf32>,
    return
  }
  func.func @transform_0(%arg0: i32) -> (i32, i32) {
    %c0_i32 = arith.constant 0 : i32
    %c0_i32_0 = arith.constant 0 : i32
    return %arg0, %c0_i32 : i32, i32
  }
  func.func @transform_1(%arg0: i32) -> (i32, i32) {
    %c0_i32 = arith.constant 0 : i32
    %c0_i32_0 = arith.constant 0 : i32
    %c0_i32_1 = arith.constant 0 : i32
    return %c0_i32, %c0_i32_0 : i32, i32
  }
  func.func @transform_2(%arg0: i32) -> (i32, i32) {
    %c0_i32 = arith.constant 0 : i32
    %c0_i32_0 = arith.constant 0 : i32
    %c0_i32_1 = arith.constant 0 : i32
    return %c0_i32, %c0_i32_0 : i32, i32
  }
  func.func @transform_3(%arg0: i32) -> (i32, i32) {
    %c0_i32 = arith.constant 0 : i32
    %c0_i32_0 = arith.constant 0 : i32
    %c0_i32_1 = arith.constant 0 : i32
    return %c0_i32, %c0_i32_0 : i32, i32
  }
  func.func @transform_4(%arg0: i32) -> (i32, i32) {
    %c0_i32 = arith.constant 0 : i32
    %c0_i32_0 = arith.constant 0 : i32
    %c0_i32_1 = arith.constant 0 : i32
    return %c0_i32, %c0_i32_0 : i32, i32
  }
  func.func @transform_5(%arg0: i32) -> (i32, i32) {
    %c0_i32 = arith.constant 0 : i32
    %c0_i32_0 = arith.constant 0 : i32
    %c0_i32_1 = arith.constant 0 : i32
    return %c0_i32, %c0_i32_0 : i32, i32
  }
  func.func @transform_6(%arg0: i32) -> (i32, i32) {
    %c0_i32 = arith.constant 0 : i32
    %c0_i32_0 = arith.constant 0 : i32
    %c0_i32_1 = arith.constant 0 : i32
    return %c0_i32, %c0_i32_0 : i32, i32
  }
  func.func @transform_7(%arg0: i32) -> (i32, i32, i32) {
    %c0_i32 = arith.constant 0 : i32
    %c0_i32_0 = arith.constant 0 : i32
    %c0_i32_1 = arith.constant 0 : i32
    return %arg0, %c0_i32, %c0_i32_0 : i32, i32, i32
  }
}

</mosaic_0001>

<bundles_post_ra>
// kernel: tpu_custom_call.1
= control target key start
LH: loop header
LB: loop body
LE: loop exit
PB: predicated region body
PF: predicated region fallthrough
CT: control target
= control target key end

     0   :  { %s7885_s0 = inlined_call_operand.hbm [shape: f32[16,896], index: 0, kind: input, shape index: {}]   ;;  %s7886_s1 = inlined_call_operand.hbm [shape: bf16[896,1024], index: 1, kind: input, shape index: {}]   ;;  %s7887_s2 = inlined_call_operand.hbm [shape: f32[1,1024], index: 2, kind: input, shape index: {}]   ;;  %s7888_s3 = inlined_call_operand.hbm [shape: bf16[1024,512], index: 3, kind: input, shape index: {}]   ;;  %s7889_s4 = inlined_call_operand.hbm [shape: f32[1,512], index: 4, kind: input, shape index: {}]   ;;  %s7890_s5 = inlined_call_operand.hbm [shape: f32[1,512], index: 5, kind: input, shape index: {}]   ;;  %s7891_s6 = inlined_call_operand.<no memory space> [shape: f32[1,1], index: 6, kind: input, shape index: {}]   ;;  %s7892_s7 = inlined_call_operand.hbm [shape: f32[2,1,8], index: 7, kind: output, shape index: {}]  }
   0x1   :  { %12 = sst [smem:[#allocation2]] %s7891_s6 }
   0x2   :  { %13 = vsyncpa [#allocation4], 0 }
   0x3   :  { %15 = vsyncpa [#allocation4 + $0x1], 0 }
   0x4   :  { %16 = vsyncpa [#allocation7], 0 }
   0x5   :  { %17 = vsyncpa [#allocation10], 0 }
   0x6   :  { %18 = vsyncpa [#allocation13], 0 }
   0x7   :  { %19 = vsyncpa [#allocation5], 0 }
   0x8   :  { %21 = vsyncpa [#allocation5 + $0x1], 0  ;;  %s7464_s26 = smov 0   ;;  %s7466_s27 = smov 0  }
   0x9   :  { %s7468_s28 = smov 0   ;;  %s7470_s29 = smov 0  }
   0xa LB: > { %s7409_s6 = smov [#allocation6]   ;;  %s7485_s8 = sadd.s32 4294967295, %s7407_s29   ;;  %s7407_s29 = sphi %s7470_s29, %s7917_s29   ;;  %s7403_s28 = sphi %s7468_s28, %s7916_s28   ;;  %s7399_s27 = sphi %s7466_s27, %s7915_s27   ;;  %s7395_s26 = sphi %s7464_s26, %s7914_s26  }
   0xb   : > { %s222_s30 = sshll.u32 %s7409_s6, 4  ;;  %p5888_p0 = scmp.ge.s32.totalorder %s7407_s29, 1  ;;  %s7490_s30 = int_to_ptr.vmem [resolvable:$true] %s222_s30 }
   0xc   : > { %p7893_p1 = scmp.eq.s32.totalorder %s7485_s8, 0  ;;  %p210_p2 = scmp.lt.s32.totalorder %s7407_s29, 3 }
   0xd   : > { %s7410_s10 = smov [#allocation9]   ;;  %s7411_s13 = smov [#allocation8]  }
   0xe   : > { %p7492_p3 = pnand %p5888_p0, %p210_p2  ;;  %s246_s11 = sshll.u32 %s7410_s10, 4  ;;  %s7505_s11 = int_to_ptr.vmem [resolvable:$true] %s246_s11 }
   0xf   : > { %s7507_s14 = sshll.u32 %s7411_s13, 4  ;;  %s7159_s17 = scalar_lea.hbm %s7886_s1, 57344  ;;  %s237_s14 = int_to_ptr.vmem [resolvable:$true] %s7507_s14 }
  0x10   : > { %s7896_s9 = scalar_select %p7492_p3, 1, 0 }
  0x11   : > { %p6692_p5 = pneg %p7492_p3  ;;  %p7160_p7 = scmp.ne.s32.totalorder %s7886_s1, %s7159_s17 }
  0x12   : > { %p7166_p11 = scmp.lt.u32.totalorder %s7159_s17, %s7886_s1 }
  0x13   : > { %p7501_p6 = pnand %p6692_p5, %p7893_p1 }
  0x15   : > { %p7517_p8 = pneg %p7501_p6 }
  0x17   : > { %p7162_p9 = pnand %p7517_p8, %p7160_p7 }
  0x19   : > { %p7163_p10 = pneg %p7162_p9 }
  0x1b   : > { %p7168_p12 = pnand %p7166_p11, %p7163_p10 }
  0x1d   : > { %7171 = shalt.err (!%p7168_p12)
}
  0x1e   : > { %s7172_s23 = scalar_lea.vmem %s7490_s30, 57344  ;;  %p7180_p5 = scmp.lt.s32.totalorder %s7490_s30, %s7490_s30 }
  0x1f   : > { %p7173_p13 = scmp.ne.s32.totalorder %s7490_s30, %s7172_s23  ;;  %p7181_p4 = scmp.lt.s32.totalorder %s7172_s23, %s7172_s23 }
  0x21   : > { %p7175_p0 = pnand %p7173_p13, %p7517_p8  ;;  %p7182_p7 = por %p7181_p4, %p7180_p5 }
  0x23   : > { %p7176_p2 = pneg %p7175_p0 }
  0x25   : > { %p7183_p9 = pnand %p7182_p7, %p7176_p2 }
  0x27   : > { %7186 = shalt.err (!%p7183_p9)
}
  0x28   : > { %s7412_s24 = smov 512   ;;  %s7413_s25 = smov 32  }
  0x29   : > { %6695 = dma.hbm_to_vmem [thread:$0]  (!%p7501_p6), %s7886_s1, 57344, %s7490_s30, [#allocation7], %s7412_s24, %s7412_s24, %s7413_s25  }
  0x2a   : > { %s7187_s16 = scalar_lea.hbm %s7888_s3, 32768 }
  0x2b   : > { %p7188_p4 = scmp.ne.s32.totalorder %s7888_s3, %s7187_s16  ;;  %p7194_p12 = scmp.lt.u32.totalorder %s7187_s16, %s7888_s3 }
  0x2d   : > { %p7190_p10 = pnand %p7188_p4, %p7517_p8 }
  0x2f   : > { %p7191_p11 = pneg %p7190_p10 }
  0x31   : > { %p7196_p13 = pnand %p7194_p12, %p7191_p11 }
  0x33   : > { %7199 = shalt.err (!%p7196_p13)
}
  0x34   : > { %s7200_s30 = scalar_lea.vmem %s7505_s11, 32768  ;;  %p7208_p7 = scmp.lt.s32.totalorder %s7505_s11, %s7505_s11 }
  0x35   : > { %p7201_p0 = scmp.ne.s32.totalorder %s7505_s11, %s7200_s30  ;;  %p7209_p9 = scmp.lt.s32.totalorder %s7200_s30, %s7200_s30 }
  0x37   : > { %p7203_p2 = pnand %p7201_p0, %p7517_p8  ;;  %p7210_p4 = por %p7209_p9, %p7208_p7 }
  0x39   : > { %p7204_p5 = pneg %p7203_p2 }
  0x3b   : > { %p7211_p10 = pnand %p7210_p4, %p7204_p5 }
  0x3d   : > { %7214 = shalt.err (!%p7211_p10)
}
  0x3e   : > { %s7414_s22 = smov 256   ;;  %s7415_s23 = smov 16  }
  0x3f   : > { %6701 = dma.hbm_to_vmem [thread:$0]  (!%p7501_p6), %s7888_s3, 32768, %s7505_s11, [#allocation10], %s7414_s22, %s7414_s22, %s7415_s23  }
  0x40   : > { %s7215_s13 = scalar_lea.hbm %s7887_s2, 128 }
  0x41   : > { %p7216_p11 = scmp.ne.s32.totalorder %s7887_s2, %s7215_s13  ;;  %p7222_p0 = scmp.lt.u32.totalorder %s7215_s13, %s7887_s2 }
  0x43   : > { %p7218_p12 = pnand %p7216_p11, %p7517_p8 }
  0x45   : > { %p7219_p13 = pneg %p7218_p12 }
  0x47   : > { %p7224_p2 = pnand %p7222_p0, %p7219_p13 }
  0x49   : > { %7227 = shalt.err (!%p7224_p2)
}
  0x4a   : > { %s7228_s19 = scalar_lea.vmem %s237_s14, 128  ;;  %p7236_p4 = scmp.lt.s32.totalorder %s237_s14, %s237_s14 }
  0x4b   : > { %p7229_p5 = scmp.ne.s32.totalorder %s237_s14, %s7228_s19  ;;  %p7237_p10 = scmp.lt.s32.totalorder %s7228_s19, %s7228_s19 }
  0x4d   : > { %p7231_p7 = pnand %p7229_p5, %p7517_p8  ;;  %p7238_p1 = por %p7237_p10, %p7236_p4 }
  0x4f   : > { %p7232_p9 = pneg %p7231_p7 }
  0x51   : > { %p7239_p3 = pnand %p7238_p1, %p7232_p9 }
  0x53   : > { %7242 = shalt.err (!%p7239_p3)
}
  0x54   : > { %6698 = dma.hbm_to_vmem [thread:$0]  (!%p7501_p6), %s7887_s2, 128, %s237_s14, [#allocation7]  }
  0x55   : > { %s7416_s30 = smov [#allocation11]   ;;  %s7417_s23 = smov [#allocation12]  }
  0x56   : > { %s260_s22 = sshll.u32 %s7416_s30, 4  ;;  %s271_s24 = sshll.u32 %s7417_s23, 4  ;;  %s261_s22 = int_to_ptr.vmem [resolvable:$true] %s260_s22  ;;  %s272_s24 = int_to_ptr.vmem [resolvable:$true] %s271_s24 }
  0x57   : > { %s7243_s10 = scalar_lea.hbm %s7889_s4, 64 }
  0x58   : > { %p7244_p1 = scmp.ne.s32.totalorder %s7889_s4, %s7243_s10  ;;  %p7250_p12 = scmp.lt.u32.totalorder %s7243_s10, %s7889_s4 }
  0x5a   : > { %p7246_p3 = pnand %p7244_p1, %p7517_p8 }
  0x5c   : > { %p7247_p11 = pneg %p7246_p3 }
  0x5e   : > { %p7252_p13 = pnand %p7250_p12, %p7247_p11 }
  0x60   : > { %7255 = shalt.err (!%p7252_p13)
}
  0x61   : > { %s7256_s14 = scalar_lea.vmem %s261_s22, 64  ;;  %p7264_p7 = scmp.lt.s32.totalorder %s261_s22, %s261_s22 }
  0x62   : > { %p7257_p0 = scmp.ne.s32.totalorder %s261_s22, %s7256_s14  ;;  %p7265_p9 = scmp.lt.s32.totalorder %s7256_s14, %s7256_s14 }
  0x64   : > { %p7259_p2 = pnand %p7257_p0, %p7517_p8  ;;  %p7266_p4 = por %p7265_p9, %p7264_p7 }
  0x66   : > { %p7260_p5 = pneg %p7259_p2 }
  0x68   : > { %p7267_p10 = pnand %p7266_p4, %p7260_p5 }
  0x6a   : > { %7270 = shalt.err (!%p7267_p10)
}
  0x6b   : > { %6704 = dma.hbm_to_vmem [thread:$0]  (!%p7501_p6), %s7889_s4, 64, %s261_s22, [#allocation10]  }
  0x6c   : > { %s7271_s30 = scalar_lea.hbm %s7890_s5, 64 }
  0x6d   : > { %p7272_p1 = scmp.ne.s32.totalorder %s7890_s5, %s7271_s30  ;;  %p7278_p12 = scmp.lt.u32.totalorder %s7271_s30, %s7890_s5 }
  0x6f   : > { %p7274_p3 = pnand %p7272_p1, %p7517_p8 }
  0x71   : > { %p7275_p11 = pneg %p7274_p3 }
  0x73   : > { %p7280_p13 = pnand %p7278_p12, %p7275_p11 }
  0x75   : > { %7283 = shalt.err (!%p7280_p13)
}
  0x76   : > { %s7284_s13 = scalar_lea.vmem %s272_s24, 64  ;;  %p7292_p7 = scmp.lt.s32.totalorder %s272_s24, %s272_s24 }
  0x77   : > { %p7285_p0 = scmp.ne.s32.totalorder %s272_s24, %s7284_s13  ;;  %p7293_p9 = scmp.lt.s32.totalorder %s7284_s13, %s7284_s13 }
  0x79   : > { %p7287_p2 = pnand %p7285_p0, %p7517_p8  ;;  %p7294_p4 = por %p7293_p9, %p7292_p7 }
  0x7b   : > { %p7288_p5 = pneg %p7287_p2 }
  0x7d   : > { %p7295_p10 = pnand %p7294_p4, %p7288_p5 }
  0x7f   : > { %7298 = shalt.err (!%p7295_p10)
}
  0x80   : > { %6707 = dma.hbm_to_vmem [thread:$0]  (!%p7501_p6), %s7890_s5, 64, %s272_s24, [#allocation13]  }
  0x81   : > { %s5887_s20 = sadd.s32 4294967294, %s7407_s29   ;;  %s7618_s12 = sadd.s32 1, %s7407_s29  }
  0x82   : > { %s34_s16 = sadd.s32 1, %s7403_s28  ;;  %s31_s17 = ssub.s32 %s7407_s29, %s7618_s12 }
  0x83   : > { %p41_p8 = scmp.ne.s32.totalorder %s7403_s28, %s7399_s27  ;;  %p32_p1 = scmp.eq.s32.totalorder %s31_s17, 0 }
  0x84   : > { %p42_p3 = scmp.eq.s32.totalorder %s7407_s29, 0  ;;  %p47_p11 = scmp.ne.s32.totalorder %s7399_s27, %s7395_s26 }
  0x85   : > { %p197_p12 = scmp.eq.s32.totalorder %s7485_s8, 1  ;;  %p7899_p0 = scmp.eq.s32.totalorder %s7485_s8, 0 }
  0x86   : > { %s7630_s14 = scalar_select %p32_p1, %s7403_s28, %s34_s16  }
  0x87   : > { %p43_p13 = por %p42_p3, %p41_p8  ;;  %p7634_p2 = por %p7899_p0, %p47_p11 }
  0x88   : > { %p7638_p6 = por %p197_p12, %p41_p8  ;;  %p203_p5 = scmp.eq.s32.totalorder %s5887_s20, 1 }
  0x89   : > { %p6721_p7 = scmp.lt.s32.totalorder %s7407_s29, 2  ;;  %s285_s19 = sand.u32 1, %s7403_s28  }
  0x8a   : > { %s7901_s24 = scalar_select %p7638_p6, 1, 0 }
  0x8b   : > { %p7644_p9 = por %p203_p5, %p47_p11  ;;  %s6665_s21 = smul.u32 56, %s285_s19 }
  0x8c   : > { %p7648_p4 = pnand %p6721_p7, %p43_p13  ;;  %s6666_s23 = smul.u32 896, %s7407_s29 }
  0x8d   : > { %s7902_s11 = scalar_select %p7644_p9, 1, 0 }
  0x8e   : > { %s7656_s10 = scalar_lea.hbm %s7885_s0, %s6666_s23  ;;  %s289_s13 = scalar_lea.vmem [#allocation3], %s6665_s21 }
  0x8f   : > { %s297_s22 = sshll.u32 %s289_s13, 4  ;;  %s286_s15 = scalar_lea.sflag [#allocation4], %s285_s19  ;;  %s7658_s22 = int_to_ptr.vmem [resolvable:$true] %s297_s22 }
  0x90   : > { %s7299_s20 = scalar_lea.hbm %s7656_s10, 896  ;;  %p7301_p8 = pneg %p7648_p4 }
  0x91   : > { %p7300_p10 = scmp.ne.s32.totalorder %s7656_s10, %s7299_s20  ;;  %s7304_s23 = scalar_lea.hbm %s7885_s0, 1792 }
  0x92   : > { %p7305_p11 = scmp.lt.u32.totalorder %s7656_s10, %s7885_s0  ;;  %p7306_p12 = scmp.lt.u32.totalorder %s7304_s23, %s7299_s20 }
  0x93   : > { %p7302_p1 = pnand %p7301_p8, %p7300_p10  ;;  %p7308_p0 = scmp.lt.u32.totalorder %s7299_s20, %s7656_s10 }
  0x94   : > { %p7307_p13 = por %p7306_p12, %p7305_p11 }
  0x95   : > { %p7303_p3 = pneg %p7302_p1 }
  0x96   : > { %p7309_p5 = por %p7308_p0, %p7307_p13 }
  0x98   : > { %p7310_p7 = pnand %p7309_p5, %p7303_p3 }
  0x9a   : > { %7313 = shalt.err (!%p7310_p7)
}
  0x9b   : > { %s7314_s19 = scalar_lea.vmem %s7658_s22, 896  ;;  %s7418_s21 = smov [#allocation3]  }
  0x9c   : > { %p7315_p10 = scmp.ne.s32.totalorder %s7658_s22, %s7314_s19  ;;  %s7319_s13 = sshll.u32 %s7418_s21, 4  ;;  %s7320_s13 = int_to_ptr.vmem [resolvable:$false] %s7319_s13 }
  0x9d   : > { %s7321_s16 = scalar_lea.vmem %s7320_s13, 1792  ;;  %p7322_p6 = scmp.lt.s32.totalorder %s7658_s22, %s7320_s13 }
  0x9e   : > { %p7317_p1 = pnand %p7315_p10, %p7301_p8  ;;  %p7323_p11 = scmp.lt.s32.totalorder %s7321_s16, %s7314_s19 }
  0xa0   : > { %p7318_p9 = pneg %p7317_p1  ;;  %p7324_p12 = por %p7323_p11, %p7322_p6 }
  0xa2   : > { %p7325_p13 = pnand %p7324_p12, %p7318_p9 }
  0xa4   : > { %7328 = shalt.err (!%p7325_p13)
}
  0xa5   : > { %6711 = dma.hbm_to_vmem [thread:$0]  (!%p7648_p4), %s7656_s10, 896, %s7658_s22, %s286_s15  }
  0xa6   : > { %p7904_p3 = scmp.ne.s32.totalorder %s7896_s9, 0 }
  0xa7   : > { %s7688_s20 = sand.u32 (!%p7904_p3), 1, %s7399_s27  }
  0xa8   : > { %306 = sbr.rel (%p7904_p3) target bundleno = 2252 (0x8cc), region = 48  ;;  %s309_s23 = scalar_lea.sflag (!%p7904_p3), [#allocation4], %s7688_s20 }
  0xa9   : > { %s6667_s17 = smul.u32 (!%p7904_p3), 56, %s7688_s20 }
  0xab   : > { %s7692_s25 = scalar_lea.vmem (!%p7904_p3), [#allocation3], %s6667_s17 }
  0xaf   : > { %7374 = dma.done.wait (%p7634_p2), %s309_s23, 896  }
  0xb0   : > { %7376 = vsyncadd (%p7634_p2), %s309_s23, 4294966400  ;;  %p7905_p6 = scmp.eq.s32.totalorder %s7485_s8, 0 }
  0xb2   : > { %7378 = dma.done.wait (%p7905_p6), [#allocation7], 57472   ;;  %p7906_p9 = pmov %p7905_p6 }
  0xb3   : > { %p7907_p4 = pmov %p7905_p6 }
  0xb4   : > { %7380 = vsyncadd (%p7906_p9), [#allocation7], 4294909824 }
  0xb5   : > { %7382 = dma.done.wait (%p7907_p4), [#allocation10], 32832   ;;  %p7908_p8 = pmov %p7907_p4 }
  0xb6   : > { %p7909_p0 = pmov %p7907_p4 }
  0xb7   : > { %7384 = vsyncadd (%p7908_p8), [#allocation10], 4294934464 }
  0xb8   : > { %7386 = dma.done.wait (%p7909_p0), [#allocation13], 64   ;;  %p7910_p5 = pmov %p7909_p0 }
  0xb9   : > { %v377_v0 = vld [vmem:[#allocation6] sm:$0xff]  ;;  %v1293_v2 = vld [vmem:[#allocation6 + $0x8] sm:$0xff]  ;;  %v364_v53 = vld [vmem:[%s7692_s25 + $0x8] sm:$0xff]  ;;  %s5718_s9 = sld [smem:[#allocation2]]  ;;  %s6606_s18 = sshll.u32 %s7485_s8, 4  ;;  %vm5758_vm0 = vcmask 57344  }
  0xba   : > { %7388 = vsyncadd (%p7910_p5), [#allocation13], 4294967232  ;;  %v378_v1 = vld [vmem:[#allocation6 + $0x20] sm:$0xff]  ;;  %v1294_v4 = vld [vmem:[#allocation6 + $0x28] sm:$0xff]  ;;  %v7711_v57 = vpack.c.bf16 %v364_v53, %v364_v53  ;;  %s361_s30 = scalar_lea.vmem [#allocation14], %s7688_s20  ;;  %s7841_s6 = scalar_lea.hbm %s7892_s7, %s6606_s18 }
  0xbb   : > { %v5903_v3 = vcombine.high %v377_v0, %v378_v1  ;;  %v5902_v5 = vcombine.low %v377_v0, %v378_v1  ;;  %v379_v6 = vld [vmem:[#allocation6 + $0x40] sm:$0xff]  ;;  %v6015_v8 = vcombine.high %v1293_v2, %v1294_v4  ;;  %v6014_v9 = vcombine.low %v1293_v2, %v1294_v4  ;;  %v1295_v11 = vld [vmem:[#allocation6 + $0x48] sm:$0xff]  ;;  %s5773_s10 = sshll.u32 %s361_s30, 4  ;;  %s5761_s19 = scalar_lea.sflag [#allocation5], %s7688_s20  ;;  %s7843_s10 = int_to_ptr.vmem [resolvable:$true] %s5773_s10 }
  0xbc   : > { %v380_v7 = vld [vmem:[#allocation6 + $0x60] sm:$0xff]  ;;  %v1296_v12 = vld [vmem:[#allocation6 + $0x68] sm:$0xff]  ;;  %1093 = vmatprep.mubr.bf16.mxu0 %v7711_v57  ;;  %2009 = vmatprep.mubr.bf16.mxu1 %v7711_v57  ;;  %s7329_s21 = scalar_lea.vmem %s7843_s10, 16  ;;  %p7911_p7 = scmp.ne.s32.totalorder %s7901_s24, 0 }
  0xbd   : > { %v5905_v10 = vcombine.high %v379_v6, %v380_v7  ;;  %v381_v13 = vld [vmem:[#allocation6 + $0x80] sm:$0xff]  ;;  %1061 = vmatprep.subr.bf16.mxu0 %v5903_v3  ;;  %v6017_v14 = vcombine.high %v1295_v11, %v1296_v12  ;;  %v1297_v16 = vld [vmem:[#allocation6 + $0x88] sm:$0xff]  ;;  %1977 = vmatprep.subr.bf16.mxu1 %v6015_v8  ;;  %v5904_v18 = vcombine.low %v379_v6, %v380_v7  ;;  %p7330_p2 = scmp.ne.s32.totalorder %s7843_s10, %s7329_s21  ;;  %s7420_s8 = smov [#allocation14]  }
  0xbe   : > { %v382_v15 = vld [vmem:[#allocation6 + $0xa0] sm:$0xff]  ;;  %v1298_v17 = vld [vmem:[#allocation6 + $0xa8] sm:$0xff]  ;;  %1062 = vmatpush1.bf16.msra.mxu0 %v5902_v5  ;;  %1978 = vmatpush1.bf16.msra.mxu1 %v6014_v9  ;;  %v6016_v19 = vcombine.low %v1295_v11, %v1296_v12  ;;  %s7333_s13 = sshll.u32 %s7420_s8, 4  ;;  %s7334_s13 = int_to_ptr.vmem [resolvable:$false] %s7333_s13 }
  0xbf   : > { %1063 = vmatprep.subr.bf16.mxu0 %v5905_v10  ;;  %v5907_v20 = vcombine.high %v381_v13, %v382_v15  ;;  %1979 = vmatprep.subr.bf16.mxu1 %v6017_v14  ;;  %v6019_v21 = vcombine.high %v1297_v16, %v1298_v17  ;;  %v383_v22 = vld [vmem:[#allocation6 + $0xc0] sm:$0xff]  ;;  %v1299_v24 = vld [vmem:[#allocation6 + $0xc8] sm:$0xff]  ;;  %v5906_v26 = vcombine.low %v381_v13, %v382_v15  ;;  %p7331_p10 = pnand %p7330_p2, %p7911_p7  ;;  %s7335_s16 = scalar_lea.vmem %s7334_s13, 32 }
  0xc0   : > { %v384_v23 = vld [vmem:[#allocation6 + $0xe0] sm:$0xff]  ;;  %v1300_v25 = vld [vmem:[#allocation6 + $0xe8] sm:$0xff]  ;;  %v6018_v27 = vcombine.low %v1297_v16, %v1298_v17  ;;  %p7336_p11 = scmp.lt.s32.totalorder %s7843_s10, %s7334_s13  ;;  %p7337_p12 = scmp.lt.s32.totalorder %s7335_s16, %s7329_s21 }
  0xc1   : > { %v5909_v28 = vcombine.high %v383_v22, %v384_v23  ;;  %v6021_v29 = vcombine.high %v1299_v24, %v1300_v25  ;;  %v385_v30 = vld [vmem:[#allocation6 + $0x100] sm:$0xff]  ;;  %v1301_v32 = vld [vmem:[#allocation6 + $0x108] sm:$0xff]  ;;  %v5908_v34 = vcombine.low %v383_v22, %v384_v23  ;;  %v6020_v35 = vcombine.low %v1299_v24, %v1300_v25  ;;  %p7332_p1 = pneg %p7331_p10 }
  0xc2   : > { %1064 = vmatpush1.bf16.msra.mxu0 %v5904_v18  ;;  %1980 = vmatpush1.bf16.msra.mxu1 %v6016_v19  ;;  %v386_v31 = vld [vmem:[#allocation6 + $0x120] sm:$0xff]  ;;  %v1302_v33 = vld [vmem:[#allocation6 + $0x128] sm:$0xff]  ;;  %p7338_p13 = por %p7337_p12, %p7336_p11 }
  0xc3   : > { %1065 = vmatprep.subr.bf16.mxu0 %v5907_v20  ;;  %1981 = vmatprep.subr.bf16.mxu1 %v6019_v21  ;;  %v5911_v36 = vcombine.high %v385_v30, %v386_v31  ;;  %v6023_v37 = vcombine.high %v1301_v32, %v1302_v33  ;;  %v387_v38 = vld [vmem:[#allocation6 + $0x140] sm:$0xff]  ;;  %v1303_v40 = vld [vmem:[#allocation6 + $0x148] sm:$0xff]  ;;  %v5910_v42 = vcombine.low %v385_v30, %v386_v31 }
  0xc4   : > { %v388_v39 = vld [vmem:[#allocation6 + $0x160] sm:$0xff]  ;;  %v1304_v41 = vld [vmem:[#allocation6 + $0x168] sm:$0xff]  ;;  %v6022_v43 = vcombine.low %v1301_v32, %v1302_v33  ;;  %p7339_p3 = pnand %p7338_p13, %p7332_p1 }
  0xc5   : > { %v5913_v44 = vcombine.high %v387_v38, %v388_v39  ;;  %v6025_v45 = vcombine.high %v1303_v40, %v1304_v41  ;;  %v389_v46 = vld [vmem:[#allocation6 + $0x180] sm:$0xff]  ;;  %v1305_v48 = vld [vmem:[#allocation6 + $0x188] sm:$0xff]  ;;  %v5912_v50 = vcombine.low %v387_v38, %v388_v39  ;;  %v6024_v51 = vcombine.low %v1303_v40, %v1304_v41 }
  0xc6   : > { %1066 = vmatpush1.bf16.msra.mxu0 %v5906_v26  ;;  %1982 = vmatpush1.bf16.msra.mxu1 %v6018_v27  ;;  %v390_v47 = vld [vmem:[#allocation6 + $0x1a0] sm:$0xff]  ;;  %v1306_v49 = vld [vmem:[#allocation6 + $0x1a8] sm:$0xff] }
  0xc7   : > { %1067 = vmatprep.subr.bf16.mxu0 %v5909_v28  ;;  %1983 = vmatprep.subr.bf16.mxu1 %v6021_v29  ;;  %v5915_v52 = vcombine.high %v389_v46, %v390_v47  ;;  %v6027_v54 = vcombine.high %v1305_v48, %v1306_v49  ;;  %v391_v55 = vld [vmem:[#allocation6 + $0x1c0] sm:$0xff]  ;;  %v1307_v58 = vld [vmem:[#allocation6 + $0x1c8] sm:$0xff]  ;;  %v5914_v60 = vcombine.low %v389_v46, %v390_v47 }
  0xc8   : > { %v392_v56 = vld [vmem:[#allocation6 + $0x1e0] sm:$0xff]  ;;  %v1308_v59 = vld [vmem:[#allocation6 + $0x1e8] sm:$0xff]  ;;  %v6026_v61 = vcombine.low %v1305_v48, %v1306_v49 }
  0xc9   : > { %v5917_v62 = vcombine.high %v391_v55, %v392_v56  ;;  %v6029_v63 = vcombine.high %v1307_v58, %v1308_v59  ;;  %v393_v0 = vld [vmem:[#allocation6 + $0x200] sm:$0xff]  ;;  %v1309_v2 = vld [vmem:[#allocation6 + $0x208] sm:$0xff]  ;;  %v5916_v4 = vcombine.low %v391_v55, %v392_v56  ;;  %v6028_v5 = vcombine.low %v1307_v58, %v1308_v59 }
  0xca   : > { %1068 = vmatpush1.bf16.msra.mxu0 %v5908_v34  ;;  %1984 = vmatpush1.bf16.msra.mxu1 %v6020_v35  ;;  %v394_v1 = vld [vmem:[#allocation6 + $0x220] sm:$0xff]  ;;  %v1310_v3 = vld [vmem:[#allocation6 + $0x228] sm:$0xff] }
  0xcb   : > { %1069 = vmatprep.subr.bf16.mxu0 %v5911_v36  ;;  %1985 = vmatprep.subr.bf16.mxu1 %v6023_v37  ;;  %v5919_v6 = vcombine.high %v393_v0, %v394_v1  ;;  %v6031_v7 = vcombine.high %v1309_v2, %v1310_v3  ;;  %v395_v8 = vld [vmem:[#allocation6 + $0x240] sm:$0xff]  ;;  %v1311_v10 = vld [vmem:[#allocation6 + $0x248] sm:$0xff]  ;;  %v5918_v12 = vcombine.low %v393_v0, %v394_v1 }
  0xcc   : > { %v396_v9 = vld [vmem:[#allocation6 + $0x260] sm:$0xff]  ;;  %v1312_v11 = vld [vmem:[#allocation6 + $0x268] sm:$0xff]  ;;  %v6030_v13 = vcombine.low %v1309_v2, %v1310_v3 }
  0xcd   : > { %v5921_v14 = vcombine.high %v395_v8, %v396_v9  ;;  %v6033_v15 = vcombine.high %v1311_v10, %v1312_v11  ;;  %v397_v16 = vld [vmem:[#allocation6 + $0x280] sm:$0xff]  ;;  %v1313_v18 = vld [vmem:[#allocation6 + $0x288] sm:$0xff]  ;;  %v5920_v20 = vcombine.low %v395_v8, %v396_v9  ;;  %v6032_v21 = vcombine.low %v1311_v10, %v1312_v11 }
  0xce   : > { %1070 = vmatpush1.bf16.msra.mxu0 %v5910_v42  ;;  %1986 = vmatpush1.bf16.msra.mxu1 %v6022_v43  ;;  %v398_v17 = vld [vmem:[#allocation6 + $0x2a0] sm:$0xff]  ;;  %v1314_v19 = vld [vmem:[#allocation6 + $0x2a8] sm:$0xff] }
  0xcf   : > { %1071 = vmatprep.subr.bf16.mxu0 %v5913_v44  ;;  %1987 = vmatprep.subr.bf16.mxu1 %v6025_v45  ;;  %v5923_v22 = vcombine.high %v397_v16, %v398_v17  ;;  %v6035_v23 = vcombine.high %v1313_v18, %v1314_v19  ;;  %v399_v24 = vld [vmem:[#allocation6 + $0x2c0] sm:$0xff]  ;;  %v1315_v26 = vld [vmem:[#allocation6 + $0x2c8] sm:$0xff]  ;;  %v5922_v28 = vcombine.low %v397_v16, %v398_v17 }
  0xd0   : > { %v400_v25 = vld [vmem:[#allocation6 + $0x2e0] sm:$0xff]  ;;  %v1316_v27 = vld [vmem:[#allocation6 + $0x2e8] sm:$0xff]  ;;  %v6034_v29 = vcombine.low %v1313_v18, %v1314_v19 }
  0xd1   : > { %v5925_v30 = vcombine.high %v399_v24, %v400_v25  ;;  %v6037_v31 = vcombine.high %v1315_v26, %v1316_v27  ;;  %v401_v32 = vld [vmem:[#allocation6 + $0x300] sm:$0xff]  ;;  %v1317_v34 = vld [vmem:[#allocation6 + $0x308] sm:$0xff]  ;;  %v5924_v36 = vcombine.low %v399_v24, %v400_v25  ;;  %v6036_v37 = vcombine.low %v1315_v26, %v1316_v27 }
  0xd2   : > { %1072 = vmatpush1.bf16.msra.mxu0 %v5912_v50  ;;  %1988 = vmatpush1.bf16.msra.mxu1 %v6024_v51  ;;  %v402_v33 = vld [vmem:[#allocation6 + $0x320] sm:$0xff]  ;;  %v1318_v35 = vld [vmem:[#allocation6 + $0x328] sm:$0xff] }
  0xd3   : > { %1073 = vmatprep.subr.bf16.mxu0 %v5915_v52  ;;  %1989 = vmatprep.subr.bf16.mxu1 %v6027_v54  ;;  %v5927_v38 = vcombine.high %v401_v32, %v402_v33  ;;  %v6039_v39 = vcombine.high %v1317_v34, %v1318_v35  ;;  %v403_v40 = vld [vmem:[#allocation6 + $0x340] sm:$0xff]  ;;  %v1319_v42 = vld [vmem:[#allocation6 + $0x348] sm:$0xff]  ;;  %v5926_v44 = vcombine.low %v401_v32, %v402_v33 }
  0xd4   : > { %v404_v41 = vld [vmem:[#allocation6 + $0x360] sm:$0xff]  ;;  %v1320_v43 = vld [vmem:[#allocation6 + $0x368] sm:$0xff]  ;;  %v6038_v45 = vcombine.low %v1317_v34, %v1318_v35 }
  0xd5   : > { %v5929_v46 = vcombine.high %v403_v40, %v404_v41  ;;  %v6041_v47 = vcombine.high %v1319_v42, %v1320_v43  ;;  %v405_v48 = vld [vmem:[#allocation6 + $0x380] sm:$0xff]  ;;  %v1321_v50 = vld [vmem:[#allocation6 + $0x388] sm:$0xff]  ;;  %v5928_v52 = vcombine.low %v403_v40, %v404_v41  ;;  %v6040_v53 = vcombine.low %v1319_v42, %v1320_v43 }
  0xd6   : > { %1074 = vmatpush1.bf16.msra.mxu0 %v5914_v60  ;;  %1990 = vmatpush1.bf16.msra.mxu1 %v6026_v61  ;;  %v406_v49 = vld [vmem:[#allocation6 + $0x3a0] sm:$0xff]  ;;  %v1322_v51 = vld [vmem:[#allocation6 + $0x3a8] sm:$0xff] }
  0xd7   : > { %1075 = vmatprep.subr.bf16.mxu0 %v5917_v62  ;;  %1991 = vmatprep.subr.bf16.mxu1 %v6029_v63  ;;  %v5931_v54 = vcombine.high %v405_v48, %v406_v49  ;;  %v6043_v55 = vcombine.high %v1321_v50, %v1322_v51  ;;  %v407_v56 = vld [vmem:[#allocation6 + $0x3c0] sm:$0xff]  ;;  %v1323_v59 = vld [vmem:[#allocation6 + $0x3c8] sm:$0xff]  ;;  %v5930_v61 = vcombine.low %v405_v48, %v406_v49 }
  0xd8   : > { %v408_v58 = vld [vmem:[#allocation6 + $0x3e0] sm:$0xff]  ;;  %v1324_v60 = vld [vmem:[#allocation6 + $0x3e8] sm:$0xff]  ;;  %v6042_v62 = vcombine.low %v1321_v50, %v1322_v51 }
  0xd9   : > { %v5933_v63 = vcombine.high %v407_v56, %v408_v58  ;;  %v6045_v0 = vcombine.high %v1323_v59, %v1324_v60  ;;  %v409_v1 = vld [vmem:[#allocation6 + $0x400] sm:$0xff]  ;;  %v1325_v3 = vld [vmem:[#allocation6 + $0x408] sm:$0xff] }
  0xda   : > { %1076 = vmatpush1.bf16.msra.mxu0 %v5916_v4  ;;  %1992 = vmatpush1.bf16.msra.mxu1 %v6028_v5  ;;  %v410_v2 = vld [vmem:[#allocation6 + $0x420] sm:$0xff]  ;;  %v1326_v4 = vld [vmem:[#allocation6 + $0x428] sm:$0xff]  ;;  %v5932_v5 = vcombine.low %v407_v56, %v408_v58 }
  0xdb   : > { %1077 = vmatprep.subr.bf16.mxu0 %v5919_v6  ;;  %1993 = vmatprep.subr.bf16.mxu1 %v6031_v7  ;;  %v363_v6 = vld [vmem:[%s7692_s25] sm:$0xff]  ;;  %v6044_v7 = vcombine.low %v1323_v59, %v1324_v60  ;;  %v5935_v8 = vcombine.high %v409_v1, %v410_v2  ;;  %v6047_v9 = vcombine.high %v1325_v3, %v1326_v4  ;;  %v411_v10 = vld [vmem:[#allocation6 + $0x440] sm:$0xff] }
  0xdc   : > { %v412_v11 = vld [vmem:[#allocation6 + $0x460] sm:$0xff]  ;;  %v5934_v16 = vcombine.low %v409_v1, %v410_v2  ;;  %v6046_v17 = vcombine.low %v1325_v3, %v1326_v4  ;;  %v1330_v24 = vld [vmem:[#allocation6 + $0x4a8] sm:$0xff] }
  0xdd   : > { %v5937_v18 = vcombine.high %v411_v10, %v412_v11  ;;  %v5936_v25 = vcombine.low %v411_v10, %v412_v11  ;;  %v1332_v32 = vld [vmem:[#allocation6 + $0x4e8] sm:$0xff] }
  0xde   : > { %1078 = vmatpush1.bf16.msra.mxu0 %v5918_v12  ;;  %1994 = vmatpush1.bf16.msra.mxu1 %v6030_v13  ;;  %v7716_v12 = vpack.c.bf16 %v363_v6, %v363_v6  ;;  %v1327_v13 = vld [vmem:[#allocation6 + $0x448] sm:$0xff]  ;;  %v426_v6 = vld [vmem:[#allocation6 + $0x620] sm:$0xff] }
  0xdf   : > { %1079 = vmatprep.subr.bf16.mxu0 %v5921_v14  ;;  %1995 = vmatprep.subr.bf16.mxu1 %v6033_v15  ;;  %v1328_v14 = vld [vmem:[#allocation6 + $0x468] sm:$0xff] }
  0xe0   : > { %v366_v15 = vld [vmem:[%s7692_s25 + $0x18] sm:$0xff]  ;;  %v6049_v19 = vcombine.high %v1327_v13, %v1328_v14  ;;  %v6048_v26 = vcombine.low %v1327_v13, %v1328_v14 }
  0xe1   : > { %v1334_v40 = vld [vmem:[#allocation6 + $0x528] sm:$0xff]  ;;  %v427_v14 = vld [vmem:[#allocation6 + $0x640] sm:$0xff] }
  0xe2   : > { %1080 = vmatpush1.bf16.msra.mxu0 %v5920_v20  ;;  %1996 = vmatpush1.bf16.msra.mxu1 %v6032_v21  ;;  %v413_v20 = vld [vmem:[#allocation6 + $0x480] sm:$0xff]  ;;  %v1336_v48 = vld [vmem:[#allocation6 + $0x568] sm:$0xff] }
  0xe3   : > { %1081 = vmatprep.subr.bf16.mxu0 %v5923_v22  ;;  %1997 = vmatprep.subr.bf16.mxu1 %v6035_v23  ;;  %v414_v21 = vld [vmem:[#allocation6 + $0x4a0] sm:$0xff]  ;;  %v1329_v22 = vld [vmem:[#allocation6 + $0x488] sm:$0xff]  ;;  %v7719_v23 = vpack.c.bf16 %v366_v15, %v366_v15 }
  0xe4   : > { %v5939_v27 = vcombine.high %v413_v20, %v414_v21  ;;  %v5938_v33 = vcombine.low %v413_v20, %v414_v21  ;;  %v6050_v34 = vcombine.low %v1329_v22, %v1330_v24  ;;  %v1338_v56 = vld [vmem:[#allocation6 + $0x5a8] sm:$0xff]  ;;  %v428_v15 = vld [vmem:[#allocation6 + $0x660] sm:$0xff] }
  0xe5   : > { %v1340_v1 = vld [vmem:[#allocation6 + $0x5e8] sm:$0xff]  ;;  %v429_v20 = vld [vmem:[#allocation6 + $0x680] sm:$0xff] }
  0xe6   : > { %1082 = vmatpush1.bf16.msra.mxu0 %v5922_v28  ;;  %1998 = vmatpush1.bf16.msra.mxu1 %v6034_v29  ;;  %v415_v28 = vld [vmem:[#allocation6 + $0x4c0] sm:$0xff] }
  0xe7   : > { %1083 = vmatprep.subr.bf16.mxu0 %v5925_v30  ;;  %1999 = vmatprep.subr.bf16.mxu1 %v6037_v31  ;;  %v416_v29 = vld [vmem:[#allocation6 + $0x4e0] sm:$0xff]  ;;  %v1331_v30 = vld [vmem:[#allocation6 + $0x4c8] sm:$0xff]  ;;  %v6051_v31 = vcombine.high %v1329_v22, %v1330_v24  ;;  %v5953_v24 = vcombine.high %v427_v14, %v428_v15 }
  0xe8   : > { %v5941_v35 = vcombine.high %v415_v28, %v416_v29  ;;  %v5940_v41 = vcombine.low %v415_v28, %v416_v29  ;;  %v6052_v42 = vcombine.low %v1331_v30, %v1332_v32  ;;  %v430_v21 = vld [vmem:[#allocation6 + $0x6a0] sm:$0xff]  ;;  %v5952_v28 = vcombine.low %v427_v14, %v428_v15 }
  0xe9   : > { %v365_v14 = vld [vmem:[%s7692_s25 + $0x10] sm:$0xff] }
  0xea   : > { %1084 = vmatpush1.bf16.msra.mxu0 %v5924_v36  ;;  %2000 = vmatpush1.bf16.msra.mxu1 %v6036_v37  ;;  %v417_v36 = vld [vmem:[#allocation6 + $0x500] sm:$0xff] }
  0xeb   : > { %1085 = vmatprep.subr.bf16.mxu0 %v5927_v38  ;;  %2001 = vmatprep.subr.bf16.mxu1 %v6039_v39  ;;  %v418_v37 = vld [vmem:[#allocation6 + $0x520] sm:$0xff]  ;;  %v1333_v38 = vld [vmem:[#allocation6 + $0x508] sm:$0xff]  ;;  %v6053_v39 = vcombine.high %v1331_v30, %v1332_v32  ;;  %v5955_v30 = vcombine.high %v429_v20, %v430_v21 }
  0xec   : > { %v5943_v43 = vcombine.high %v417_v36, %v418_v37  ;;  %v5942_v49 = vcombine.low %v417_v36, %v418_v37  ;;  %v6054_v50 = vcombine.low %v1333_v38, %v1334_v40  ;;  %v432_v32 = vld [vmem:[#allocation6 + $0x6e0] sm:$0xff]  ;;  %v5954_v36 = vcombine.low %v429_v20, %v430_v21  ;;  %v1359_v20 = vld [vmem:[#allocation6 + $0x848] sm:$0xff] }
  0xed   : > { %v1360_v21 = vld [vmem:[#allocation6 + $0x868] sm:$0xff] }
  0xee   : > { %1086 = vmatpush1.bf16.msra.mxu0 %v5926_v44  ;;  %2002 = vmatpush1.bf16.msra.mxu1 %v6038_v45  ;;  %v419_v44 = vld [vmem:[#allocation6 + $0x540] sm:$0xff] }
  0xef   : > { %1087 = vmatprep.subr.bf16.mxu0 %v5929_v46  ;;  %2003 = vmatprep.subr.bf16.mxu1 %v6041_v47  ;;  %v420_v45 = vld [vmem:[#allocation6 + $0x560] sm:$0xff]  ;;  %v1335_v46 = vld [vmem:[#allocation6 + $0x548] sm:$0xff]  ;;  %v6055_v47 = vcombine.high %v1333_v38, %v1334_v40 }
  0xf0   : > { %v5945_v51 = vcombine.high %v419_v44, %v420_v45  ;;  %v5944_v58 = vcombine.low %v419_v44, %v420_v45  ;;  %v6056_v59 = vcombine.low %v1335_v46, %v1336_v48  ;;  %v434_v40 = vld [vmem:[#allocation6 + $0x720] sm:$0xff] }
  0xf2   : > { %1088 = vmatpush1.bf16.msra.mxu0 %v5928_v52  ;;  %2004 = vmatpush1.bf16.msra.mxu1 %v6040_v53  ;;  %v421_v52 = vld [vmem:[#allocation6 + $0x580] sm:$0xff] }
  0xf3   : > { %1089 = vmatprep.subr.bf16.mxu0 %v5931_v54  ;;  %2005 = vmatprep.subr.bf16.mxu1 %v6043_v55  ;;  %v422_v53 = vld [vmem:[#allocation6 + $0x5a0] sm:$0xff]  ;;  %v1337_v54 = vld [vmem:[#allocation6 + $0x588] sm:$0xff]  ;;  %v6057_v55 = vcombine.high %v1335_v46, %v1336_v48 }
  0xf4   : > { %v5947_v60 = vcombine.high %v421_v52, %v422_v53  ;;  %v5946_v2 = vcombine.low %v421_v52, %v422_v53  ;;  %v6058_v3 = vcombine.low %v1337_v54, %v1338_v56  ;;  %v436_v48 = vld [vmem:[#allocation6 + $0x760] sm:$0xff] }
  0xf6   : > { %1090 = vmatpush1.bf16.msra.mxu0 %v5930_v61  ;;  %2006 = vmatpush1.bf16.msra.mxu1 %v6042_v62  ;;  %v423_v61 = vld [vmem:[#allocation6 + $0x5c0] sm:$0xff] }
  0xf7   : > { %1091 = vmatprep.subr.bf16.mxu0 %v5933_v63  ;;  %2007 = vmatprep.subr.bf16.mxu1 %v6045_v0  ;;  %v424_v62 = vld [vmem:[#allocation6 + $0x5e0] sm:$0xff]  ;;  %v1339_v63 = vld [vmem:[#allocation6 + $0x5c8] sm:$0xff]  ;;  %v6059_v0 = vcombine.high %v1337_v54, %v1338_v56 }
  0xf8   : > { %v5949_v4 = vcombine.high %v423_v61, %v424_v62  ;;  %v5948_v10 = vcombine.low %v423_v61, %v424_v62  ;;  %v6060_v11 = vcombine.low %v1339_v63, %v1340_v1  ;;  %v438_v56 = vld [vmem:[#allocation6 + $0x7a0] sm:$0xff] }
  0xfa   : > { %1092 = vmatpush1.bf16.msra.mxu0 %v5932_v5  ;;  %2008 = vmatpush1.bf16.msra.mxu1 %v6044_v7  ;;  %v425_v5 = vld [vmem:[#allocation6 + $0x600] sm:$0xff]  ;;  %v1341_v7 = vld [vmem:[#allocation6 + $0x608] sm:$0xff] }
  0xfb   : > { %1102 = vmatprep.subr.bf16.mxu0 %v5935_v8  ;;  %2018 = vmatprep.subr.bf16.mxu1 %v6047_v9  ;;  %v6061_v8 = vcombine.high %v1339_v63, %v1340_v1  ;;  %v1342_v9 = vld [vmem:[#allocation6 + $0x628] sm:$0xff]  ;;  %v5951_v13 = vcombine.high %v425_v5, %v426_v6  ;;  %v440_v1 = vld [vmem:[#allocation6 + $0x7e0] sm:$0xff] }
  0xfc   : > { %v6062_v22 = vcombine.low %v1341_v7, %v1342_v9 }
  0xfd   : > { %1094 = vmatmul.mubr.bf16.vlgmr.msra.gmra.mrb[0].mxu0 %v7716_v12  ;;  %2010 = vmatmul.mubr.bf16.vlgmr.msra.gmra.mrb[0].mxu1 %v7716_v12 }
  0xfe   : > { %1103 = vmatpush1.bf16.msra.mxu0 %v5934_v16  ;;  %2019 = vmatpush1.bf16.msra.mxu1 %v6046_v17  ;;  %v1343_v16 = vld [vmem:[#allocation6 + $0x648] sm:$0xff]  ;;  %v6063_v17 = vcombine.high %v1341_v7, %v1342_v9  ;;  %v442_v9 = vld [vmem:[#allocation6 + $0x820] sm:$0xff] }
  0xff   : > { %1104 = vmatprep.subr.bf16.mxu0 %v5937_v18  ;;  %2020 = vmatprep.subr.bf16.mxu1 %v6049_v19  ;;  %v1344_v18 = vld [vmem:[#allocation6 + $0x668] sm:$0xff]  ;;  %v5950_v19 = vcombine.low %v425_v5, %v426_v6  ;;  %v441_v6 = vld [vmem:[#allocation6 + $0x800] sm:$0xff] }
 0x100   : > { %1134 = vmatprep.mubr.bf16.mxu0 %v7719_v23  ;;  %2050 = vmatprep.mubr.bf16.mxu1 %v7719_v23  ;;  %v6064_v29 = vcombine.low %v1343_v16, %v1344_v18 }
 0x102   : > { %1105 = vmatpush1.bf16.msra.mxu0 %v5936_v25  ;;  %2021 = vmatpush1.bf16.msra.mxu1 %v6048_v26  ;;  %v1345_v25 = vld [vmem:[#allocation6 + $0x688] sm:$0xff] }
 0x103   : > { %1106 = vmatprep.subr.bf16.mxu0 %v5939_v27  ;;  %2022 = vmatprep.subr.bf16.mxu1 %v6051_v31  ;;  %v1346_v26 = vld [vmem:[#allocation6 + $0x6a8] sm:$0xff]  ;;  %v6065_v27 = vcombine.high %v1343_v16, %v1344_v18  ;;  %v431_v31 = vld [vmem:[#allocation6 + $0x6c0] sm:$0xff]  ;;  %v5967_v18 = vcombine.high %v441_v6, %v442_v9 }
 0x104   : > { %v6066_v37 = vcombine.low %v1345_v25, %v1346_v26  ;;  %v5957_v38 = vcombine.high %v431_v31, %v432_v32  ;;  %v5956_v44 = vcombine.low %v431_v31, %v432_v32  ;;  %v443_v16 = vld [vmem:[#allocation6 + $0x840] sm:$0xff]  ;;  %v1361_v31 = vld [vmem:[#allocation6 + $0x888] sm:$0xff]  ;;  %v6081_v32 = vcombine.high %v1359_v20, %v1360_v21 }
 0x106   : > { %1107 = vmatpush1.bf16.msra.mxu0 %v5938_v33  ;;  %2023 = vmatpush1.bf16.msra.mxu1 %v6050_v34  ;;  %v6067_v33 = vcombine.high %v1345_v25, %v1346_v26  ;;  %v1347_v34 = vld [vmem:[#allocation6 + $0x6c8] sm:$0xff]  ;;  %v7727_v25 = vpack.c.bf16 %v365_v14, %v365_v14  ;;  %v5966_v26 = vcombine.low %v441_v6, %v442_v9  ;;  %v457_v14 = vld [vmem:[#allocation6 + $0xa00] sm:$0xff] }
 0x107   : > { %1108 = vmatprep.subr.bf16.mxu0 %v5941_v35  ;;  %2024 = vmatprep.subr.bf16.mxu1 %v6053_v39  ;;  %v1348_v35 = vld [vmem:[#allocation6 + $0x6e8] sm:$0xff]  ;;  %v433_v39 = vld [vmem:[#allocation6 + $0x700] sm:$0xff] }
 0x108   : > { %v6068_v45 = vcombine.low %v1347_v34, %v1348_v35  ;;  %v5959_v46 = vcombine.high %v433_v39, %v434_v40  ;;  %v5958_v52 = vcombine.low %v433_v39, %v434_v40  ;;  %v448_v39 = vld [vmem:[#allocation6 + $0x8e0] sm:$0xff]  ;;  %v1363_v40 = vld [vmem:[#allocation6 + $0x8c8] sm:$0xff] }
 0x109   : > { %v1371_v9 = vld [vmem:[#allocation6 + $0x9c8] sm:$0xff] }
 0x10a   : > { %1109 = vmatpush1.bf16.msra.mxu0 %v5940_v41  ;;  %2025 = vmatpush1.bf16.msra.mxu1 %v6052_v42  ;;  %v1349_v41 = vld [vmem:[#allocation6 + $0x708] sm:$0xff]  ;;  %v6069_v42 = vcombine.high %v1347_v34, %v1348_v35 }
 0x10b   : > { %1110 = vmatprep.subr.bf16.mxu0 %v5943_v43  ;;  %2026 = vmatprep.subr.bf16.mxu1 %v6055_v47  ;;  %v1350_v43 = vld [vmem:[#allocation6 + $0x728] sm:$0xff]  ;;  %v435_v47 = vld [vmem:[#allocation6 + $0x740] sm:$0xff] }
 0x10c   : > { %v6070_v53 = vcombine.low %v1349_v41, %v1350_v43  ;;  %v5961_v54 = vcombine.high %v435_v47, %v436_v48  ;;  %v5960_v61 = vcombine.low %v435_v47, %v436_v48  ;;  %v450_v47 = vld [vmem:[#allocation6 + $0x920] sm:$0xff]  ;;  %v1365_v48 = vld [vmem:[#allocation6 + $0x908] sm:$0xff] }
 0x10e   : > { %1111 = vmatpush1.bf16.msra.mxu0 %v5942_v49  ;;  %2027 = vmatpush1.bf16.msra.mxu1 %v6054_v50  ;;  %v1351_v49 = vld [vmem:[#allocation6 + $0x748] sm:$0xff]  ;;  %v6071_v50 = vcombine.high %v1349_v41, %v1350_v43 }
 0x10f   : > { %1112 = vmatprep.subr.bf16.mxu0 %v5945_v51  ;;  %2028 = vmatprep.subr.bf16.mxu1 %v6057_v55  ;;  %v1352_v51 = vld [vmem:[#allocation6 + $0x768] sm:$0xff]  ;;  %v437_v55 = vld [vmem:[#allocation6 + $0x780] sm:$0xff] }
 0x110   : > { %v6072_v62 = vcombine.low %v1351_v49, %v1352_v51  ;;  %v5963_v63 = vcombine.high %v437_v55, %v438_v56  ;;  %v5962_v5 = vcombine.low %v437_v55, %v438_v56  ;;  %v452_v55 = vld [vmem:[#allocation6 + $0x960] sm:$0xff]  ;;  %v1367_v56 = vld [vmem:[#allocation6 + $0x948] sm:$0xff] }
 0x112   : > { %1113 = vmatpush1.bf16.msra.mxu0 %v5944_v58  ;;  %2029 = vmatpush1.bf16.msra.mxu1 %v6056_v59  ;;  %v1353_v58 = vld [vmem:[#allocation6 + $0x788] sm:$0xff]  ;;  %v6073_v59 = vcombine.high %v1351_v49, %v1352_v51 }
 0x113   : > { %1114 = vmatprep.subr.bf16.mxu0 %v5947_v60  ;;  %2030 = vmatprep.subr.bf16.mxu1 %v6059_v0  ;;  %v1354_v60 = vld [vmem:[#allocation6 + $0x7a8] sm:$0xff]  ;;  %v439_v0 = vld [vmem:[#allocation6 + $0x7c0] sm:$0xff] }
 0x114   : > { %v6074_v7 = vcombine.low %v1353_v58, %v1354_v60  ;;  %v5964_v15 = vcombine.low %v439_v0, %v440_v1 }
 0x116   : > { %1115 = vmatpush1.bf16.msra.mxu0 %v5946_v2  ;;  %2031 = vmatpush1.bf16.msra.mxu1 %v6058_v3  ;;  %v1355_v2 = vld [vmem:[#allocation6 + $0x7c8] sm:$0xff]  ;;  %v6075_v3 = vcombine.high %v1353_v58, %v1354_v60 }
 0x117   : > { %1116 = vmatprep.subr.bf16.mxu0 %v5949_v4  ;;  %2032 = vmatprep.subr.bf16.mxu1 %v6061_v8  ;;  %v1356_v4 = vld [vmem:[#allocation6 + $0x7e8] sm:$0xff]  ;;  %v5965_v8 = vcombine.high %v439_v0, %v440_v1  ;;  %v454_v0 = vld [vmem:[#allocation6 + $0x9a0] sm:$0xff] }
 0x118   : > { %v1369_v1 = vld [vmem:[#allocation6 + $0x988] sm:$0xff] }
 0x11a   : > { %1117 = vmatpush1.bf16.msra.mxu0 %v5948_v10  ;;  %2033 = vmatpush1.bf16.msra.mxu1 %v6060_v11  ;;  %v1357_v10 = vld [vmem:[#allocation6 + $0x808] sm:$0xff] }
 0x11b   : > { %1118 = vmatprep.subr.bf16.mxu0 %v5951_v13  ;;  %2034 = vmatprep.subr.bf16.mxu1 %v6063_v17  ;;  %v1358_v11 = vld [vmem:[#allocation6 + $0x828] sm:$0xff]  ;;  %v6077_v13 = vcombine.high %v1355_v2, %v1356_v4  ;;  %v6076_v17 = vcombine.low %v1355_v2, %v1356_v4 }
 0x11e   : > { %1119 = vmatpush1.bf16.msra.mxu0 %v5950_v19  ;;  %2035 = vmatpush1.bf16.msra.mxu1 %v6062_v22  ;;  %v444_v19 = vld [vmem:[#allocation6 + $0x860] sm:$0xff]  ;;  %v6079_v22 = vcombine.high %v1357_v10, %v1358_v11 }
 0x11f   : > { %1120 = vmatprep.subr.bf16.mxu0 %v5953_v24  ;;  %2036 = vmatprep.subr.bf16.mxu1 %v6065_v27  ;;  %v368_v24 = vld [vmem:[%s7692_s25 + $0x28] sm:$0xff]  ;;  %v6078_v27 = vcombine.low %v1357_v10, %v1358_v11  ;;  %v5968_v35 = vcombine.low %v443_v16, %v444_v19  ;;  %v1372_v11 = vld [vmem:[#allocation6 + $0x9e8] sm:$0xff] }
 0x120   : > { %v7729_v34 = vpack.c.bf16 %v368_v24, %v368_v24  ;;  %v460_v24 = vld [vmem:[#allocation6 + $0xa60] sm:$0xff] }
 0x122   : > { %1121 = vmatpush1.bf16.msra.mxu0 %v5952_v28  ;;  %2037 = vmatpush1.bf16.msra.mxu1 %v6064_v29  ;;  %v5969_v28 = vcombine.high %v443_v16, %v444_v19  ;;  %v445_v29 = vld [vmem:[#allocation6 + $0x880] sm:$0xff]  ;;  %v1374_v19 = vld [vmem:[#allocation6 + $0xa28] sm:$0xff] }
 0x123   : > { %1122 = vmatprep.subr.bf16.mxu0 %v5955_v30  ;;  %2038 = vmatprep.subr.bf16.mxu1 %v6067_v33  ;;  %v446_v30 = vld [vmem:[#allocation6 + $0x8a0] sm:$0xff]  ;;  %v1362_v33 = vld [vmem:[#allocation6 + $0x8a8] sm:$0xff] }
 0x124   : > { %v6083_v41 = vcombine.high %v1361_v31, %v1362_v33  ;;  %v5970_v43 = vcombine.low %v445_v29, %v446_v30 }
 0x126   : > { %1123 = vmatpush1.bf16.msra.mxu0 %v5954_v36  ;;  %2039 = vmatpush1.bf16.msra.mxu1 %v6066_v37  ;;  %v6080_v36 = vcombine.low %v1359_v20, %v1360_v21  ;;  %v5971_v37 = vcombine.high %v445_v29, %v446_v30  ;;  %v6093_v20 = vcombine.high %v1371_v9, %v1372_v11  ;;  %v1376_v29 = vld [vmem:[#allocation6 + $0xa68] sm:$0xff] }
 0x127   : > { %1124 = vmatprep.subr.bf16.mxu0 %v5957_v38  ;;  %2040 = vmatprep.subr.bf16.mxu1 %v6069_v42  ;;  %v447_v38 = vld [vmem:[#allocation6 + $0x8c0] sm:$0xff]  ;;  %v1364_v42 = vld [vmem:[#allocation6 + $0x8e8] sm:$0xff] }
 0x128   : > { %v6085_v49 = vcombine.high %v1363_v40, %v1364_v42  ;;  %v5972_v51 = vcombine.low %v447_v38, %v448_v39 }
 0x12a   : > { %1125 = vmatpush1.bf16.msra.mxu0 %v5956_v44  ;;  %2041 = vmatpush1.bf16.msra.mxu1 %v6068_v45  ;;  %v6082_v44 = vcombine.low %v1361_v31, %v1362_v33  ;;  %v5973_v45 = vcombine.high %v447_v38, %v448_v39  ;;  %v462_v33 = vld [vmem:[#allocation6 + $0xaa0] sm:$0xff]  ;;  %v1378_v38 = vld [vmem:[#allocation6 + $0xaa8] sm:$0xff] }
 0x12b   : > { %1126 = vmatprep.subr.bf16.mxu0 %v5959_v46  ;;  %2042 = vmatprep.subr.bf16.mxu1 %v6071_v50  ;;  %v449_v46 = vld [vmem:[#allocation6 + $0x900] sm:$0xff]  ;;  %v1366_v50 = vld [vmem:[#allocation6 + $0x928] sm:$0xff] }
 0x12c   : > { %v6087_v58 = vcombine.high %v1365_v48, %v1366_v50  ;;  %v5974_v60 = vcombine.low %v449_v46, %v450_v47 }
 0x12e   : > { %1127 = vmatpush1.bf16.msra.mxu0 %v5958_v52  ;;  %2043 = vmatpush1.bf16.msra.mxu1 %v6070_v53  ;;  %v6084_v52 = vcombine.low %v1363_v40, %v1364_v42  ;;  %v5975_v53 = vcombine.high %v449_v46, %v450_v47  ;;  %v464_v42 = vld [vmem:[#allocation6 + $0xae0] sm:$0xff]  ;;  %v1380_v46 = vld [vmem:[#allocation6 + $0xae8] sm:$0xff] }
 0x12f   : > { %1128 = vmatprep.subr.bf16.mxu0 %v5961_v54  ;;  %2044 = vmatprep.subr.bf16.mxu1 %v6073_v59  ;;  %v451_v54 = vld [vmem:[#allocation6 + $0x940] sm:$0xff]  ;;  %v1368_v59 = vld [vmem:[#allocation6 + $0x968] sm:$0xff] }
 0x130   : > { %v6089_v2 = vcombine.high %v1367_v56, %v1368_v59  ;;  %v5976_v4 = vcombine.low %v451_v54, %v452_v55 }
 0x132   : > { %1129 = vmatpush1.bf16.msra.mxu0 %v5960_v61  ;;  %2045 = vmatpush1.bf16.msra.mxu1 %v6072_v62  ;;  %v6086_v61 = vcombine.low %v1365_v48, %v1366_v50  ;;  %v5977_v62 = vcombine.high %v451_v54, %v452_v55  ;;  %v466_v50 = vld [vmem:[#allocation6 + $0xb20] sm:$0xff]  ;;  %v1382_v54 = vld [vmem:[#allocation6 + $0xb28] sm:$0xff] }
 0x133   : > { %1130 = vmatprep.subr.bf16.mxu0 %v5963_v63  ;;  %2046 = vmatprep.subr.bf16.mxu1 %v6075_v3  ;;  %v453_v63 = vld [vmem:[#allocation6 + $0x980] sm:$0xff]  ;;  %v1370_v3 = vld [vmem:[#allocation6 + $0x9a8] sm:$0xff] }
 0x134   : > { %v5979_v6 = vcombine.high %v453_v63, %v454_v0  ;;  %v6091_v10 = vcombine.high %v1369_v1, %v1370_v3  ;;  %v6090_v16 = vcombine.low %v1369_v1, %v1370_v3  ;;  %v470_v3 = vld [vmem:[#allocation6 + $0xba0] sm:$0xff] }
 0x136   : > { %1131 = vmatpush1.bf16.msra.mxu0 %v5962_v5  ;;  %2047 = vmatpush1.bf16.msra.mxu1 %v6074_v7  ;;  %v6088_v5 = vcombine.low %v1367_v56, %v1368_v59  ;;  %v455_v7 = vld [vmem:[#allocation6 + $0x9c0] sm:$0xff] }
 0x137   : > { %1132 = vmatprep.subr.bf16.mxu0 %v5965_v8  ;;  %2048 = vmatprep.subr.bf16.mxu1 %v6077_v13  ;;  %v456_v8 = vld [vmem:[#allocation6 + $0x9e0] sm:$0xff]  ;;  %v5978_v13 = vcombine.low %v453_v63, %v454_v0  ;;  %v1384_v63 = vld [vmem:[#allocation6 + $0xb68] sm:$0xff] }
 0x138   : > { %v5980_v21 = vcombine.low %v455_v7, %v456_v8  ;;  %v468_v59 = vld [vmem:[#allocation6 + $0xb60] sm:$0xff] }
 0x13a   : > { %1133 = vmatpush1.bf16.msra.mxu0 %v5964_v15  ;;  %2049 = vmatpush1.bf16.msra.mxu1 %v6076_v17  ;;  %v458_v15 = vld [vmem:[#allocation6 + $0xa20] sm:$0xff]  ;;  %v5981_v17 = vcombine.high %v455_v7, %v456_v8  ;;  %v1386_v7 = vld [vmem:[#allocation6 + $0xba8] sm:$0xff] }
 0x13b   : > { %1143 = vmatprep.subr.bf16.mxu0 %v5967_v18  ;;  %2059 = vmatprep.subr.bf16.mxu1 %v6079_v22  ;;  %v1373_v18 = vld [vmem:[#allocation6 + $0xa08] sm:$0xff]  ;;  %v459_v22 = vld [vmem:[#allocation6 + $0xa40] sm:$0xff]  ;;  %v5982_v31 = vcombine.low %v457_v14, %v458_v15 }
 0x13c   : > { %v6095_v30 = vcombine.high %v1373_v18, %v1374_v19  ;;  %v5984_v40 = vcombine.low %v459_v22, %v460_v24 }
 0x13d   : > { %1135 = vmatmul.mubr.bf16.vlgmr.msra.gmra.mrb[0].mxu0 %v7727_v25  ;;  %2051 = vmatmul.mubr.bf16.vlgmr.msra.gmra.mrb[0].mxu1 %v7727_v25 }
 0x13e   : > { %1144 = vmatpush1.bf16.msra.mxu0 %v5966_v26  ;;  %2060 = vmatpush1.bf16.msra.mxu1 %v6078_v27  ;;  %v6092_v26 = vcombine.low %v1371_v9, %v1372_v11  ;;  %v5983_v27 = vcombine.high %v457_v14, %v458_v15  ;;  %v471_v14 = vld [vmem:[#allocation6 + $0xbc0] sm:$0xff] }
 0x13f   : > { %1145 = vmatprep.subr.bf16.mxu0 %v5969_v28  ;;  %2061 = vmatprep.subr.bf16.mxu1 %v6081_v32  ;;  %v1375_v28 = vld [vmem:[#allocation6 + $0xa48] sm:$0xff]  ;;  %v461_v32 = vld [vmem:[#allocation6 + $0xa80] sm:$0xff] }
 0x140   : > { %1175 = vmatprep.mubr.bf16.mxu0 %v7729_v34  ;;  %2091 = vmatprep.mubr.bf16.mxu1 %v7729_v34  ;;  %v6097_v39 = vcombine.high %v1375_v28, %v1376_v29  ;;  %v5986_v48 = vcombine.low %v461_v32, %v462_v33  ;;  %v472_v15 = vld [vmem:[#allocation6 + $0xbe0] sm:$0xff] }
 0x142   : > { %1146 = vmatpush1.bf16.msra.mxu0 %v5968_v35  ;;  %2062 = vmatpush1.bf16.msra.mxu1 %v6080_v36  ;;  %v6094_v35 = vcombine.low %v1373_v18, %v1374_v19  ;;  %v5985_v36 = vcombine.high %v459_v22, %v460_v24  ;;  %v473_v22 = vld [vmem:[#allocation6 + $0xc00] sm:$0xff] }
 0x143   : > { %1147 = vmatprep.subr.bf16.mxu0 %v5971_v37  ;;  %2063 = vmatprep.subr.bf16.mxu1 %v6083_v41  ;;  %v1377_v37 = vld [vmem:[#allocation6 + $0xa88] sm:$0xff]  ;;  %v463_v41 = vld [vmem:[#allocation6 + $0xac0] sm:$0xff] }
 0x144   : > { %v6099_v47 = vcombine.high %v1377_v37, %v1378_v38  ;;  %v5988_v56 = vcombine.low %v463_v41, %v464_v42  ;;  %v474_v24 = vld [vmem:[#allocation6 + $0xc20] sm:$0xff] }
 0x146   : > { %1148 = vmatpush1.bf16.msra.mxu0 %v5970_v43  ;;  %2064 = vmatpush1.bf16.msra.mxu1 %v6082_v44  ;;  %v6096_v43 = vcombine.low %v1375_v28, %v1376_v29  ;;  %v5987_v44 = vcombine.high %v461_v32, %v462_v33  ;;  %v5996_v28 = vcombine.low %v471_v14, %v472_v15  ;;  %v367_v29 = vld [vmem:[%s7692_s25 + $0x20] sm:$0xff]  ;;  %v475_v33 = vld [vmem:[#allocation6 + $0xc40] sm:$0xff] }
 0x147   : > { %1149 = vmatprep.subr.bf16.mxu0 %v5973_v45  ;;  %2065 = vmatprep.subr.bf16.mxu1 %v6085_v49  ;;  %v1379_v45 = vld [vmem:[#allocation6 + $0xac8] sm:$0xff]  ;;  %v465_v49 = vld [vmem:[#allocation6 + $0xb00] sm:$0xff] }
 0x148   : > { %v6101_v55 = vcombine.high %v1379_v45, %v1380_v46  ;;  %v5990_v1 = vcombine.low %v465_v49, %v466_v50 }
 0x14a   : > { %1150 = vmatpush1.bf16.msra.mxu0 %v5972_v51  ;;  %2066 = vmatpush1.bf16.msra.mxu1 %v6084_v52  ;;  %v6098_v51 = vcombine.low %v1377_v37, %v1378_v38  ;;  %v5989_v52 = vcombine.high %v463_v41, %v464_v42  ;;  %v1391_v37 = vld [vmem:[#allocation6 + $0xc48] sm:$0xff] }
 0x14b   : > { %1151 = vmatprep.subr.bf16.mxu0 %v5975_v53  ;;  %2067 = vmatprep.subr.bf16.mxu1 %v6087_v58  ;;  %v1381_v53 = vld [vmem:[#allocation6 + $0xb08] sm:$0xff]  ;;  %v467_v58 = vld [vmem:[#allocation6 + $0xb40] sm:$0xff] }
 0x14c   : > { %v6103_v0 = vcombine.high %v1381_v53, %v1382_v54  ;;  %v5992_v9 = vcombine.low %v467_v58, %v468_v59  ;;  %v1392_v38 = vld [vmem:[#allocation6 + $0xc68] sm:$0xff] }
 0x14d   : > { %v6113_v42 = vcombine.high %v1391_v37, %v1392_v38 }
 0x14e   : > { %1152 = vmatpush1.bf16.msra.mxu0 %v5974_v60  ;;  %2068 = vmatpush1.bf16.msra.mxu1 %v6086_v61  ;;  %v6100_v60 = vcombine.low %v1379_v45, %v1380_v46  ;;  %v5991_v61 = vcombine.high %v465_v49, %v466_v50  ;;  %v1393_v45 = vld [vmem:[#allocation6 + $0xc88] sm:$0xff] }
 0x14f   : > { %1153 = vmatprep.subr.bf16.mxu0 %v5977_v62  ;;  %2069 = vmatprep.subr.bf16.mxu1 %v6089_v2  ;;  %v1383_v62 = vld [vmem:[#allocation6 + $0xb48] sm:$0xff]  ;;  %v469_v2 = vld [vmem:[#allocation6 + $0xb80] sm:$0xff] }
 0x150   : > { %v6105_v8 = vcombine.high %v1383_v62, %v1384_v63  ;;  %v5995_v11 = vcombine.high %v469_v2, %v470_v3  ;;  %v5994_v18 = vcombine.low %v469_v2, %v470_v3  ;;  %v1394_v46 = vld [vmem:[#allocation6 + $0xca8] sm:$0xff] }
 0x151   : > { %v6115_v50 = vcombine.high %v1393_v45, %v1394_v46 }
 0x152   : > { %1154 = vmatpush1.bf16.msra.mxu0 %v5976_v4  ;;  %2070 = vmatpush1.bf16.msra.mxu1 %v6088_v5  ;;  %v6102_v4 = vcombine.low %v1381_v53, %v1382_v54  ;;  %v5993_v5 = vcombine.high %v467_v58, %v468_v59  ;;  %v7419_v53 = vmov 0   ;;  %v1395_v54 = vld [vmem:[#allocation6 + $0xcc8] sm:$0xff]  ;;  %v6114_v58 = vcombine.low %v1393_v45, %v1394_v46  ;;  %v6780_v45 = vld [vmem:[#allocation9 + $0x228] ss:$16 sps:$4 sm:$0xff]  }
 0x153   : > { %1155 = vmatprep.subr.bf16.mxu0 %v5979_v6  ;;  %2071 = vmatprep.subr.bf16.mxu1 %v6091_v10  ;;  %v1385_v6 = vld [vmem:[#allocation6 + $0xb88] sm:$0xff]  ;;  %v6104_v10 = vcombine.low %v1383_v62, %v1384_v63  ;;  %v482_v62 = vld [vmem:[#allocation6 + $0xd20] sm:$0xff] }
 0x154   : > { %v6106_v19 = vcombine.low %v1385_v6, %v1386_v7  ;;  %v1397_v63 = vld [vmem:[#allocation6 + $0xd08] sm:$0xff] }
 0x155   : > { %v6785_v46 = vld [vmem:[#allocation9 + $0x244] ss:$16 sps:$4 sm:$0xff]  }
 0x156   : > { %1156 = vmatpush1.bf16.msra.mxu0 %v5978_v13  ;;  %2072 = vmatpush1.bf16.msra.mxu1 %v6090_v16  ;;  %v6107_v13 = vcombine.high %v1385_v6, %v1386_v7  ;;  %v1387_v16 = vld [vmem:[#allocation6 + $0xbc8] sm:$0xff]  ;;  %v484_v6 = vld [vmem:[#allocation6 + $0xd60] sm:$0xff] }
 0x157   : > { %1157 = vmatprep.subr.bf16.mxu0 %v5981_v17  ;;  %2073 = vmatprep.subr.bf16.mxu1 %v6093_v20  ;;  %v1388_v17 = vld [vmem:[#allocation6 + $0xbe8] sm:$0xff]  ;;  %v5997_v20 = vcombine.high %v471_v14, %v472_v15  ;;  %v485_v14 = vld [vmem:[#allocation6 + $0xd80] sm:$0xff] }
 0x158   : > { %v1399_v7 = vld [vmem:[#allocation6 + $0xd48] sm:$0xff]  ;;  %v486_v15 = vld [vmem:[#allocation6 + $0xda0] sm:$0xff] }
 0x15a   : > { %1158 = vmatpush1.bf16.msra.mxu0 %v5980_v21  ;;  %2074 = vmatpush1.bf16.msra.mxu1 %v6092_v26  ;;  %v6109_v21 = vcombine.high %v1387_v16, %v1388_v17  ;;  %v1389_v26 = vld [vmem:[#allocation6 + $0xc08] sm:$0xff] }
 0x15b   : > { %1159 = vmatprep.subr.bf16.mxu0 %v5983_v27  ;;  %2075 = vmatprep.subr.bf16.mxu1 %v6095_v30  ;;  %v1390_v27 = vld [vmem:[#allocation6 + $0xc28] sm:$0xff]  ;;  %v6108_v30 = vcombine.low %v1387_v16, %v1388_v17 }
 0x15c   : > { %v6111_v32 = vcombine.high %v1389_v26, %v1390_v27  ;;  %v1401_v16 = vld [vmem:[#allocation6 + $0xd88] sm:$0xff] }
 0x15d   : > { %v1402_v17 = vld [vmem:[#allocation6 + $0xda8] sm:$0xff] }
 0x15e   : > { %1160 = vmatpush1.bf16.msra.mxu0 %v5982_v31  ;;  %2076 = vmatpush1.bf16.msra.mxu1 %v6094_v35  ;;  %v5999_v31 = vcombine.high %v473_v22, %v474_v24  ;;  %v476_v35 = vld [vmem:[#allocation6 + $0xc60] sm:$0xff] }
 0x15f   : > { %1161 = vmatprep.subr.bf16.mxu0 %v5985_v36  ;;  %2077 = vmatprep.subr.bf16.mxu1 %v6097_v39  ;;  %v7736_v36 = vpack.c.bf16 %v367_v29, %v367_v29  ;;  %v5998_v39 = vcombine.low %v473_v22, %v474_v24  ;;  %v6001_v41 = vcombine.high %v475_v33, %v476_v35  ;;  %v487_v22 = vld [vmem:[#allocation6 + $0xdc0] sm:$0xff] }
 0x160   : > { %v488_v24 = vld [vmem:[#allocation6 + $0xde0] sm:$0xff]  ;;  %v6122_v29 = vcombine.low %v1401_v16, %v1402_v17 }
 0x162   : > { %1162 = vmatpush1.bf16.msra.mxu0 %v5984_v40  ;;  %2078 = vmatpush1.bf16.msra.mxu1 %v6096_v43  ;;  %v6110_v40 = vcombine.low %v1389_v26, %v1390_v27  ;;  %v477_v43 = vld [vmem:[#allocation6 + $0xc80] sm:$0xff]  ;;  %v1403_v26 = vld [vmem:[#allocation6 + $0xdc8] sm:$0xff] }
 0x163   : > { %1163 = vmatprep.subr.bf16.mxu0 %v5987_v44  ;;  %2079 = vmatprep.subr.bf16.mxu1 %v6099_v47  ;;  %v478_v44 = vld [vmem:[#allocation6 + $0xca0] sm:$0xff]  ;;  %v6000_v47 = vcombine.low %v475_v33, %v476_v35  ;;  %v1404_v27 = vld [vmem:[#allocation6 + $0xde8] sm:$0xff] }
 0x164   : > { %v6003_v49 = vcombine.high %v477_v43, %v478_v44  ;;  %v369_v33 = vld [vmem:[%s7692_s25 + $0x30] sm:$0xff]  ;;  %v6124_v35 = vcombine.low %v1403_v26, %v1404_v27 }
 0x166   : > { %1164 = vmatpush1.bf16.msra.mxu0 %v5986_v48  ;;  %2080 = vmatpush1.bf16.msra.mxu1 %v6098_v51  ;;  %v6112_v48 = vcombine.low %v1391_v37, %v1392_v38  ;;  %v479_v51 = vld [vmem:[#allocation6 + $0xcc0] sm:$0xff]  ;;  %v6773_v37 = vld [vmem:[#allocation9 + $0x204] ss:$16 sps:$4 sm:$0xff]  }
 0x167   : > { %1165 = vmatprep.subr.bf16.mxu0 %v5989_v52  ;;  %2081 = vmatprep.subr.bf16.mxu1 %v6101_v55  ;;  %v480_v52 = vld [vmem:[#allocation6 + $0xce0] sm:$0xff]  ;;  %v1396_v55 = vld [vmem:[#allocation6 + $0xce8] sm:$0xff] }
 0x168   : > { %v6005_v59 = vcombine.high %v479_v51, %v480_v52  ;;  %v6116_v2 = vcombine.low %v1395_v54, %v1396_v55  ;;  %v6776_v38 = vld [vmem:[#allocation9 + $0x20c] ss:$16 sps:$4 sm:$0xff]  }
 0x16a   : > { %1166 = vmatpush1.bf16.msra.mxu0 %v5988_v56  ;;  %2082 = vmatpush1.bf16.msra.mxu1 %v6100_v60  ;;  %v6002_v56 = vcombine.low %v477_v43, %v478_v44  ;;  %v6117_v60 = vcombine.high %v1395_v54, %v1396_v55  ;;  %v6782_v43 = vld [vmem:[#allocation9 + $0x22c] ss:$16 sps:$4 sm:$0xff]   ;;  %v6777_v44 = vld [vmem:[#allocation9 + $0x220] ss:$16 sps:$4 sm:$0xff]   ;;  %v6792_v54 = vld [vmem:[#allocation9 + $0x268] ss:$16 sps:$4 sm:$0xff]  }
 0x16b   : > { %1167 = vmatprep.subr.bf16.mxu0 %v5991_v61  ;;  %2083 = vmatprep.subr.bf16.mxu1 %v6103_v0  ;;  %v481_v61 = vld [vmem:[#allocation6 + $0xd00] sm:$0xff]  ;;  %v1398_v0 = vld [vmem:[#allocation6 + $0xd28] sm:$0xff] }
 0x16c   : > { %v6007_v3 = vcombine.high %v481_v61, %v482_v62  ;;  %v6797_v55 = vld [vmem:[#allocation9 + $0x284] ss:$16 sps:$4 sm:$0xff]  }
 0x16e   : > { %1168 = vmatpush1.bf16.msra.mxu0 %v5990_v1  ;;  %2084 = vmatpush1.bf16.msra.mxu1 %v6102_v4  ;;  %v6004_v1 = vcombine.low %v479_v51, %v480_v52  ;;  %v6119_v4 = vcombine.high %v1397_v63, %v1398_v0  ;;  %v6794_v51 = vld [vmem:[#allocation9 + $0x26c] ss:$16 sps:$4 sm:$0xff]   ;;  %v6789_v52 = vld [vmem:[#allocation9 + $0x260] ss:$16 sps:$4 sm:$0xff]  }
 0x16f   : > { %1169 = vmatprep.subr.bf16.mxu0 %v5993_v5  ;;  %2085 = vmatprep.subr.bf16.mxu1 %v6105_v8  ;;  %v483_v5 = vld [vmem:[#allocation6 + $0xd40] sm:$0xff]  ;;  %v1400_v8 = vld [vmem:[#allocation6 + $0xd68] sm:$0xff] }
 0x172   : > { %1170 = vmatpush1.bf16.msra.mxu0 %v5992_v9  ;;  %2086 = vmatpush1.bf16.msra.mxu1 %v6104_v10  ;;  %v6006_v9 = vcombine.low %v481_v61, %v482_v62  ;;  %v6118_v10 = vcombine.low %v1397_v63, %v1398_v0  ;;  %v6806_v61 = vld [vmem:[#allocation9 + $0x2ac] ss:$16 sps:$4 sm:$0xff]   ;;  %v6801_v62 = vld [vmem:[#allocation9 + $0x2a0] ss:$16 sps:$4 sm:$0xff]   ;;  %v6804_v63 = vld [vmem:[#allocation9 + $0x2a8] ss:$16 sps:$4 sm:$0xff]  }
 0x173   : > { %1171 = vmatprep.subr.bf16.mxu0 %v5995_v11  ;;  %2087 = vmatprep.subr.bf16.mxu1 %v6107_v13  ;;  %v6009_v11 = vcombine.high %v483_v5, %v484_v6  ;;  %v6121_v13 = vcombine.high %v1399_v7, %v1400_v8  ;;  %v6809_v0 = vld [vmem:[#allocation9 + $0x2c4] ss:$16 sps:$4 sm:$0xff]  }
 0x176   : > { %1172 = vmatpush1.bf16.msra.mxu0 %v5994_v18  ;;  %2088 = vmatpush1.bf16.msra.mxu1 %v6106_v19  ;;  %v6008_v18 = vcombine.low %v483_v5, %v484_v6  ;;  %v6120_v19 = vcombine.low %v1399_v7, %v1400_v8  ;;  %v6818_v5 = vld [vmem:[#allocation9 + $0x2ec] ss:$16 sps:$4 sm:$0xff]   ;;  %v6813_v6 = vld [vmem:[#allocation9 + $0x2e0] ss:$16 sps:$4 sm:$0xff]   ;;  %v6816_v7 = vld [vmem:[#allocation9 + $0x2e8] ss:$16 sps:$4 sm:$0xff]  }
 0x177   : > { %1173 = vmatprep.subr.bf16.mxu0 %v5997_v20  ;;  %2089 = vmatprep.subr.bf16.mxu1 %v6109_v21  ;;  %v6011_v20 = vcombine.high %v485_v14, %v486_v15  ;;  %v6123_v21 = vcombine.high %v1401_v16, %v1402_v17  ;;  %v6821_v8 = vld [vmem:[#allocation9 + $0x304] ss:$16 sps:$4 sm:$0xff]   ;;  %v6828_v16 = vld [vmem:[#allocation9 + $0x328] ss:$16 sps:$4 sm:$0xff]  }
 0x178   : > { %v6833_v17 = vld [vmem:[#allocation9 + $0x344] ss:$16 sps:$4 sm:$0xff]  }
 0x17a   : > { %1174 = vmatpush1.bf16.msra.mxu0 %v5996_v28  ;;  %2090 = vmatpush1.bf16.msra.mxu1 %v6108_v30  ;;  %v6010_v28 = vcombine.low %v485_v14, %v486_v15  ;;  %v6013_v30 = vcombine.high %v487_v22, %v488_v24  ;;  %v6830_v14 = vld [vmem:[#allocation9 + $0x32c] ss:$16 sps:$4 sm:$0xff]   ;;  %v6825_v15 = vld [vmem:[#allocation9 + $0x320] ss:$16 sps:$4 sm:$0xff]  }
 0x17b   : > { %1184 = vmatprep.subr.bf16.mxu0 %v5999_v31  ;;  %2100 = vmatprep.subr.bf16.mxu1 %v6111_v32  ;;  %v6125_v31 = vcombine.high %v1403_v26, %v1404_v27  ;;  %v6012_v32 = vcombine.low %v487_v22, %v488_v24  ;;  %v6842_v22 = vld [vmem:[#allocation9 + $0x36c] ss:$16 sps:$4 sm:$0xff]   ;;  %v6837_v24 = vld [vmem:[#allocation9 + $0x360] ss:$16 sps:$4 sm:$0xff]   ;;  %v6840_v26 = vld [vmem:[#allocation9 + $0x368] ss:$16 sps:$4 sm:$0xff]  }
 0x17c   : > { %v6845_v27 = vld [vmem:[#allocation9 + $0x384] ss:$16 sps:$4 sm:$0xff]  }
 0x17d   : > { %1176 = vmatmul.mubr.bf16.vlgmr.msra.gmra.mrb[0].mxu0 %v7736_v36  ;;  %2092 = vmatmul.mubr.bf16.vlgmr.msra.gmra.mrb[0].mxu1 %v7736_v36 }
 0x17e   : > { %1185 = vmatpush1.bf16.msra.mxu0 %v5998_v39  ;;  %2101 = vmatpush1.bf16.msra.mxu1 %v6110_v40  ;;  %v7743_v39 = vpack.c.bf16 %v369_v33, %v369_v33  ;;  %v6771_v40 = vld [vmem:[#allocation9 + $0x200] ss:$16 sps:$4 sm:$0xff]  }
 0x17f   : > { %1186 = vmatprep.subr.bf16.mxu0 %v6001_v41  ;;  %2102 = vmatprep.subr.bf16.mxu1 %v6113_v42  ;;  %v6774_v41 = vld [vmem:[#allocation9 + $0x208] ss:$16 sps:$4 sm:$0xff]   ;;  %v6779_v42 = vld [vmem:[#allocation9 + $0x224] ss:$16 sps:$4 sm:$0xff]   ;;  %v6849_v33 = vld [vmem:[#allocation9 + $0x3a0] ss:$16 sps:$4 sm:$0xff]  }
 0x180   : > { %1216 = vmatprep.mubr.bf16.mxu0 %v7419_v53  ;;  %2132 = vmatprep.mubr.bf16.mxu1 %v7419_v53 }
 0x182   : > { %1187 = vmatpush1.bf16.msra.mxu0 %v6000_v47  ;;  %2103 = vmatpush1.bf16.msra.mxu1 %v6112_v48  ;;  %v6788_v47 = vld [vmem:[#allocation9 + $0x24c] ss:$16 sps:$4 sm:$0xff]   ;;  %v6783_v48 = vld [vmem:[#allocation9 + $0x240] ss:$16 sps:$4 sm:$0xff]  }
 0x183   : > { %1188 = vmatprep.subr.bf16.mxu0 %v6003_v49  ;;  %2104 = vmatprep.subr.bf16.mxu1 %v6115_v50  ;;  %v6786_v49 = vld [vmem:[#allocation9 + $0x248] ss:$16 sps:$4 sm:$0xff]   ;;  %v6791_v50 = vld [vmem:[#allocation9 + $0x264] ss:$16 sps:$4 sm:$0xff]  }
 0x186   : > { %1189 = vmatpush1.bf16.msra.mxu0 %v6002_v56  ;;  %2105 = vmatpush1.bf16.msra.mxu1 %v6114_v58  ;;  %v6800_v56 = vld [vmem:[#allocation9 + $0x28c] ss:$16 sps:$4 sm:$0xff]   ;;  %v6795_v58 = vld [vmem:[#allocation9 + $0x280] ss:$16 sps:$4 sm:$0xff]  }
 0x187   : > { %1190 = vmatprep.subr.bf16.mxu0 %v6005_v59  ;;  %2106 = vmatprep.subr.bf16.mxu1 %v6117_v60  ;;  %v6798_v59 = vld [vmem:[#allocation9 + $0x288] ss:$16 sps:$4 sm:$0xff]   ;;  %v6803_v60 = vld [vmem:[#allocation9 + $0x2a4] ss:$16 sps:$4 sm:$0xff]  }
 0x18a   : > { %1191 = vmatpush1.bf16.msra.mxu0 %v6004_v1  ;;  %2107 = vmatpush1.bf16.msra.mxu1 %v6116_v2  ;;  %v6812_v1 = vld [vmem:[#allocation9 + $0x2cc] ss:$16 sps:$4 sm:$0xff]   ;;  %v6807_v2 = vld [vmem:[#allocation9 + $0x2c0] ss:$16 sps:$4 sm:$0xff]  }
 0x18b   : > { %1192 = vmatprep.subr.bf16.mxu0 %v6007_v3  ;;  %2108 = vmatprep.subr.bf16.mxu1 %v6119_v4  ;;  %v6810_v3 = vld [vmem:[#allocation9 + $0x2c8] ss:$16 sps:$4 sm:$0xff]   ;;  %v6815_v4 = vld [vmem:[#allocation9 + $0x2e4] ss:$16 sps:$4 sm:$0xff]  }
 0x18e   : > { %1193 = vmatpush1.bf16.msra.mxu0 %v6006_v9  ;;  %2109 = vmatpush1.bf16.msra.mxu1 %v6118_v10  ;;  %v6824_v9 = vld [vmem:[#allocation9 + $0x30c] ss:$16 sps:$4 sm:$0xff]   ;;  %v6819_v10 = vld [vmem:[#allocation9 + $0x300] ss:$16 sps:$4 sm:$0xff]  }
 0x18f   : > { %1194 = vmatprep.subr.bf16.mxu0 %v6009_v11  ;;  %2110 = vmatprep.subr.bf16.mxu1 %v6121_v13  ;;  %v6822_v11 = vld [vmem:[#allocation9 + $0x308] ss:$16 sps:$4 sm:$0xff]   ;;  %v6827_v13 = vld [vmem:[#allocation9 + $0x324] ss:$16 sps:$4 sm:$0xff]  }
 0x192   : > { %1195 = vmatpush1.bf16.msra.mxu0 %v6008_v18  ;;  %2111 = vmatpush1.bf16.msra.mxu1 %v6120_v19  ;;  %v6836_v18 = vld [vmem:[#allocation9 + $0x34c] ss:$16 sps:$4 sm:$0xff]   ;;  %v6831_v19 = vld [vmem:[#allocation9 + $0x340] ss:$16 sps:$4 sm:$0xff]  }
 0x193   : > { %1196 = vmatprep.subr.bf16.mxu0 %v6011_v20  ;;  %2112 = vmatprep.subr.bf16.mxu1 %v6123_v21  ;;  %v6834_v20 = vld [vmem:[#allocation9 + $0x348] ss:$16 sps:$4 sm:$0xff]   ;;  %v6839_v21 = vld [vmem:[#allocation9 + $0x364] ss:$16 sps:$4 sm:$0xff]  }
 0x196   : > { %1197 = vmatpush1.bf16.msra.mxu0 %v6010_v28  ;;  %2113 = vmatpush1.bf16.msra.mxu1 %v6122_v29  ;;  %v6848_v28 = vld [vmem:[#allocation9 + $0x38c] ss:$16 sps:$4 sm:$0xff]   ;;  %v6843_v29 = vld [vmem:[#allocation9 + $0x380] ss:$16 sps:$4 sm:$0xff]  }
 0x197   : > { %1198 = vmatprep.subr.bf16.mxu0 %v6013_v30  ;;  %2114 = vmatprep.subr.bf16.mxu1 %v6125_v31  ;;  %v6846_v30 = vld [vmem:[#allocation9 + $0x388] ss:$16 sps:$4 sm:$0xff]   ;;  %v6851_v31 = vld [vmem:[#allocation9 + $0x3a4] ss:$16 sps:$4 sm:$0xff]  }
 0x19a   : > { %1199 = vmatpush1.bf16.msra.mxu0 %v6012_v32  ;;  %2115 = vmatpush1.bf16.msra.mxu1 %v6124_v35  ;;  %v6854_v32 = vld [vmem:[#allocation9 + $0x3ac] ss:$16 sps:$4 sm:$0xff]   ;;  %v6852_v35 = vld [vmem:[#allocation9 + $0x3a8] ss:$16 sps:$4 sm:$0xff]  }
 0x19b   : > { %2529 = vmatprep.subr.bf16.mxu0 %v6773_v37  ;;  %2570 = vmatprep.subr.bf16.mxu1 %v6776_v38  ;;  %v6857_v37 = vld [vmem:[#allocation9 + $0x3c4] ss:$16 sps:$4 sm:$0xff]   ;;  %v6860_v38 = vld [vmem:[#allocation9 + $0x3cc] ss:$16 sps:$4 sm:$0xff]  }
 0x19d   : > { %1217 = vmatmul.mubr.bf16.vlgmr.msra.gmra.mrb[0].mxu0 %v7743_v39  ;;  %2133 = vmatmul.mubr.bf16.vlgmr.msra.gmra.mrb[0].mxu1 %v7743_v39 }
 0x19e   : > { %2530 = vmatpush1.bf16.msra.mxu0 %v6771_v40  ;;  %2571 = vmatpush1.bf16.msra.mxu1 %v6774_v41  ;;  %v6855_v40 = vld [vmem:[#allocation9 + $0x3c0] ss:$16 sps:$4 sm:$0xff]   ;;  %v6858_v41 = vld [vmem:[#allocation9 + $0x3c8] ss:$16 sps:$4 sm:$0xff]  }
 0x19f   : > { %2531 = vmatprep.subr.bf16.mxu0 %v6779_v42  ;;  %2572 = vmatprep.subr.bf16.mxu1 %v6782_v43  ;;  %v6863_v42 = vld [vmem:[#allocation9 + $0x3e4] ss:$16 sps:$4 sm:$0xff]   ;;  %v6866_v43 = vld [vmem:[#allocation9 + $0x3ec] ss:$16 sps:$4 sm:$0xff]  }
 0x1a2   : > { %2532 = vmatpush1.bf16.msra.mxu0 %v6777_v44  ;;  %2573 = vmatpush1.bf16.msra.mxu1 %v6780_v45  ;;  %v6861_v44 = vld [vmem:[#allocation9 + $0x3e0] ss:$16 sps:$4 sm:$0xff]   ;;  %v6864_v45 = vld [vmem:[#allocation9 + $0x3e8] ss:$16 sps:$4 sm:$0xff]  }
 0x1a3   : > { %2533 = vmatprep.subr.bf16.mxu0 %v6785_v46  ;;  %2574 = vmatprep.subr.bf16.mxu1 %v6788_v47  ;;  %v6869_v46 = vld [vmem:[#allocation9 + $0x4] ss:$16 sps:$4 sm:$0xff]   ;;  %v6872_v47 = vld [vmem:[#allocation9 + $0xc] ss:$16 sps:$4 sm:$0xff]  }
 0x1a6   : > { %2534 = vmatpush1.bf16.msra.mxu0 %v6783_v48  ;;  %2575 = vmatpush1.bf16.msra.mxu1 %v6786_v49  ;;  %v491_v48 = vlaneseq }
 0x1a7   : > { %2535 = vmatprep.subr.bf16.mxu0 %v6791_v50  ;;  %2576 = vmatprep.subr.bf16.mxu1 %v6794_v51 }
 0x1a8   : > { %v7747_v49 = vshrl.u32 %v491_v48, 7  ;;  %v6917_v48 = vld [vmem:[#allocation9 + $0x104] ss:$16 sps:$4 sm:$0xff]  }
 0x1aa   : > { %2536 = vmatpush1.bf16.msra.mxu0 %v6789_v52  ;;  %2577 = vmatpush1.bf16.msra.mxu1 %v6792_v54  ;;  %v7750_v50 = vsub.s32 0, %v7747_v49  ;;  %v7753_v51 = vsub.s32 1, %v7747_v49  ;;  %v7755_v52 = vld [vmem:[#allocation8] sm:$0x3]  ;;  %v1405_v54 = vld [vmem:[#allocation8 + $0x2] sm:$0x3] }
 0x1ab   : > { %2537 = vmatprep.subr.bf16.mxu0 %v6797_v55  ;;  %2578 = vmatprep.subr.bf16.mxu1 %v6800_v56 }
 0x1ac   : > { %v1410_v55 = vrot.slane %v1405_v54, %v7750_v50  ;;  %v498_v56 = vrot.slane %v7755_v52, %v7753_v51 }
 0x1ae   : > { %2538 = vmatpush1.bf16.msra.mxu0 %v6795_v58  ;;  %2579 = vmatpush1.bf16.msra.mxu1 %v6798_v59  ;;  %v1414_v58 = vrot.slane %v1405_v54, %v7753_v51  ;;  %v6920_v54 = vld [vmem:[#allocation9 + $0x10c] ss:$16 sps:$4 sm:$0xff]  }
 0x1af   : > { %2539 = vmatprep.subr.bf16.mxu0 %v6803_v60  ;;  %2580 = vmatprep.subr.bf16.mxu1 %v6806_v61 }
 0x1b2   : > { %2540 = vmatpush1.bf16.msra.mxu0 %v6801_v62  ;;  %2581 = vmatpush1.bf16.msra.mxu1 %v6804_v63 }
 0x1b3   : > { %2541 = vmatprep.subr.bf16.mxu0 %v6809_v0  ;;  %2582 = vmatprep.subr.bf16.mxu1 %v6812_v1 }
 0x1b6   : > { %2542 = vmatpush1.bf16.msra.mxu0 %v6807_v2  ;;  %2583 = vmatpush1.bf16.msra.mxu1 %v6810_v3 }
 0x1b7   : > { %2543 = vmatprep.subr.bf16.mxu0 %v6815_v4  ;;  %2584 = vmatprep.subr.bf16.mxu1 %v6818_v5 }
 0x1ba   : > { %2544 = vmatpush1.bf16.msra.mxu0 %v6813_v6  ;;  %2585 = vmatpush1.bf16.msra.mxu1 %v6816_v7 }
 0x1bb   : > { %2545 = vmatprep.subr.bf16.mxu0 %v6821_v8  ;;  %2586 = vmatprep.subr.bf16.mxu1 %v6824_v9 }
 0x1be   : > { %2546 = vmatpush1.bf16.msra.mxu0 %v6819_v10  ;;  %2587 = vmatpush1.bf16.msra.mxu1 %v6822_v11  ;;  %v6867_v10 = vld [vmem:[#allocation9] ss:$16 sps:$4 sm:$0xff]   ;;  %v6870_v11 = vld [vmem:[#allocation9 + $0x8] ss:$16 sps:$4 sm:$0xff]  }
 0x1bf   : > { %2547 = vmatprep.subr.bf16.mxu0 %v6827_v13  ;;  %2588 = vmatprep.subr.bf16.mxu1 %v6830_v14  ;;  %v6875_v14 = vld [vmem:[#allocation9 + $0x24] ss:$16 sps:$4 sm:$0xff]  }
 0x1c2   : > { %2548 = vmatpush1.bf16.msra.mxu0 %v6825_v15  ;;  %2589 = vmatpush1.bf16.msra.mxu1 %v6828_v16  ;;  %v6878_v15 = vld [vmem:[#allocation9 + $0x2c] ss:$16 sps:$4 sm:$0xff]  }
 0x1c3   : > { %2549 = vmatprep.subr.bf16.mxu0 %v6833_v17  ;;  %2590 = vmatprep.subr.bf16.mxu1 %v6836_v18  ;;  %v6873_v17 = vld [vmem:[#allocation9 + $0x20] ss:$16 sps:$4 sm:$0xff]   ;;  %v6876_v18 = vld [vmem:[#allocation9 + $0x28] ss:$16 sps:$4 sm:$0xff]  }
 0x1c6   : > { %2550 = vmatpush1.bf16.msra.mxu0 %v6831_v19  ;;  %2591 = vmatpush1.bf16.msra.mxu1 %v6834_v20  ;;  %v6881_v19 = vld [vmem:[#allocation9 + $0x44] ss:$16 sps:$4 sm:$0xff]   ;;  %v6884_v20 = vld [vmem:[#allocation9 + $0x4c] ss:$16 sps:$4 sm:$0xff]  }
 0x1c7   : > { %2551 = vmatprep.subr.bf16.mxu0 %v6839_v21  ;;  %2592 = vmatprep.subr.bf16.mxu1 %v6842_v22  ;;  %v6879_v21 = vld [vmem:[#allocation9 + $0x40] ss:$16 sps:$4 sm:$0xff]   ;;  %v6882_v22 = vld [vmem:[#allocation9 + $0x48] ss:$16 sps:$4 sm:$0xff]  }
 0x1ca   : > { %2552 = vmatpush1.bf16.msra.mxu0 %v6837_v24  ;;  %2593 = vmatpush1.bf16.msra.mxu1 %v6840_v26  ;;  %v6887_v24 = vld [vmem:[#allocation9 + $0x64] ss:$16 sps:$4 sm:$0xff]   ;;  %v6890_v26 = vld [vmem:[#allocation9 + $0x6c] ss:$16 sps:$4 sm:$0xff]  }
 0x1cb   : > { %2553 = vmatprep.subr.bf16.mxu0 %v6845_v27  ;;  %2594 = vmatprep.subr.bf16.mxu1 %v6848_v28  ;;  %v6885_v27 = vld [vmem:[#allocation9 + $0x60] ss:$16 sps:$4 sm:$0xff]   ;;  %v6888_v28 = vld [vmem:[#allocation9 + $0x68] ss:$16 sps:$4 sm:$0xff]  }
 0x1ce   : > { %2554 = vmatpush1.bf16.msra.mxu0 %v6843_v29  ;;  %2595 = vmatpush1.bf16.msra.mxu1 %v6846_v30  ;;  %v6893_v29 = vld [vmem:[#allocation9 + $0x84] ss:$16 sps:$4 sm:$0xff]   ;;  %v6896_v30 = vld [vmem:[#allocation9 + $0x8c] ss:$16 sps:$4 sm:$0xff]  }
 0x1cf   : > { %2555 = vmatprep.subr.bf16.mxu0 %v6851_v31  ;;  %2596 = vmatprep.subr.bf16.mxu1 %v6854_v32  ;;  %v6891_v31 = vld [vmem:[#allocation9 + $0x80] ss:$16 sps:$4 sm:$0xff]   ;;  %v6894_v32 = vld [vmem:[#allocation9 + $0x88] ss:$16 sps:$4 sm:$0xff]  }
 0x1d2   : > { %2556 = vmatpush1.bf16.msra.mxu0 %v6849_v33  ;;  %2597 = vmatpush1.bf16.msra.mxu1 %v6852_v35  ;;  %v6899_v33 = vld [vmem:[#allocation9 + $0xa4] ss:$16 sps:$4 sm:$0xff]   ;;  %v6902_v35 = vld [vmem:[#allocation9 + $0xac] ss:$16 sps:$4 sm:$0xff]  }
 0x1d3   : > { %2557 = vmatprep.subr.bf16.mxu0 %v6857_v37  ;;  %2598 = vmatprep.subr.bf16.mxu1 %v6860_v38  ;;  %v6897_v37 = vld [vmem:[#allocation9 + $0xa0] ss:$16 sps:$4 sm:$0xff]   ;;  %v6900_v38 = vld [vmem:[#allocation9 + $0xa8] ss:$16 sps:$4 sm:$0xff]  }
 0x1d6   : > { %2558 = vmatpush1.bf16.msra.mxu0 %v6855_v40  ;;  %2599 = vmatpush1.bf16.msra.mxu1 %v6858_v41  ;;  %v6905_v40 = vld [vmem:[#allocation9 + $0xc4] ss:$16 sps:$4 sm:$0xff]   ;;  %v6908_v41 = vld [vmem:[#allocation9 + $0xcc] ss:$16 sps:$4 sm:$0xff]  }
 0x1d7   : > { %2559 = vmatprep.subr.bf16.mxu0 %v6863_v42  ;;  %2600 = vmatprep.subr.bf16.mxu1 %v6866_v43  ;;  %v6903_v42 = vld [vmem:[#allocation9 + $0xc0] ss:$16 sps:$4 sm:$0xff]   ;;  %v6906_v43 = vld [vmem:[#allocation9 + $0xc8] ss:$16 sps:$4 sm:$0xff]  }
 0x1da   : > { %2560 = vmatpush1.bf16.msra.mxu0 %v6861_v44  ;;  %2601 = vmatpush1.bf16.msra.mxu1 %v6864_v45  ;;  %v6911_v44 = vld [vmem:[#allocation9 + $0xe4] ss:$16 sps:$4 sm:$0xff]   ;;  %v6914_v45 = vld [vmem:[#allocation9 + $0xec] ss:$16 sps:$4 sm:$0xff]  }
 0x1db   : > { %2931 = vmatprep.subr.bf16.mxu0 %v6869_v46  ;;  %2972 = vmatprep.subr.bf16.mxu1 %v6872_v47  ;;  %v6909_v46 = vld [vmem:[#allocation9 + $0xe0] ss:$16 sps:$4 sm:$0xff]   ;;  %v6912_v47 = vld [vmem:[#allocation9 + $0xe8] ss:$16 sps:$4 sm:$0xff]  }
 0x270   : > { %v7761_v59 = vpop.f32.mrb[0].mxu0  ;;  %v2134_v60 = vpop.f32.mrb[0].mxu1 }
 0x271   : > { %v1220_v61 = vpop.f32.mrb[1].mxu0  ;;  %v6611_v62 = vadd.f32 %v2134_v60, %v1410_v55  ;;  %v2136_v0 = vpop.f32.mrb[1].mxu1  ;;  %v6915_v55 = vld [vmem:[#allocation9 + $0x100] ss:$16 sps:$4 sm:$0xff]   ;;  %v6926_v60 = vld [vmem:[#allocation9 + $0x12c] ss:$16 sps:$4 sm:$0xff]  }
 0x272   : > { %v6610_v63 = vadd.f32 %v1220_v61, %v498_v56  ;;  %v1222_v1 = vpop.f32.mrb[2].mxu0  ;;  %v6612_v2 = vadd.f32 %v2136_v0, %v1414_v58  ;;  %v2138_v3 = vpop.f32.mrb[2].mxu1  ;;  %v6918_v56 = vld [vmem:[#allocation9 + $0x108] ss:$16 sps:$4 sm:$0xff]   ;;  %v6923_v58 = vld [vmem:[#allocation9 + $0x124] ss:$16 sps:$4 sm:$0xff]  }
 0x273   : > { %v1223_v4 = vpop.f32.mrb[3].mxu0  ;;  %v2141_v5 = vmax.f32 %v6611_v62, 0.0  ;;  %v2139_v6 = vpop.f32.mrb[3].mxu1  ;;  %v6921_v61 = vld [vmem:[#allocation9 + $0x120] ss:$16 sps:$4 sm:$0xff]  }
 0x274   : > { %v2142_v7 = vmax.f32 %v6612_v2, 0.0  ;;  %v1226_v8 = vmax.f32 %v6610_v63, 0.0  ;;  %v6924_v62 = vld [vmem:[#allocation9 + $0x128] ss:$16 sps:$4 sm:$0xff]   ;;  %v6929_v63 = vld [vmem:[#allocation9 + $0x144] ss:$16 sps:$4 sm:$0xff]  }
 0x275   : > { %v2143_v13 = vpack.c.bf16 %v2141_v5, %v2141_v5  ;;  %v6932_v0 = vld [vmem:[#allocation9 + $0x14c] ss:$16 sps:$4 sm:$0xff]   ;;  %v6927_v1 = vld [vmem:[#allocation9 + $0x140] ss:$16 sps:$4 sm:$0xff]   ;;  %v6930_v2 = vld [vmem:[#allocation9 + $0x148] ss:$16 sps:$4 sm:$0xff]  }
 0x276   : > { %v2144_v9 = vpack.c.bf16 %v2142_v7, %v2142_v7  ;;  %v1228_v16 = vpack.c.bf16 %v1226_v8, %v1226_v8  ;;  %v6935_v3 = vld [vmem:[#allocation9 + $0x164] ss:$16 sps:$4 sm:$0xff]   ;;  %v6938_v4 = vld [vmem:[#allocation9 + $0x16c] ss:$16 sps:$4 sm:$0xff]   ;;  %v6933_v5 = vld [vmem:[#allocation9 + $0x160] ss:$16 sps:$4 sm:$0xff]  }
 0x277   : > { %v6936_v6 = vld [vmem:[#allocation9 + $0x168] ss:$16 sps:$4 sm:$0xff]   ;;  %v6941_v7 = vld [vmem:[#allocation9 + $0x184] ss:$16 sps:$4 sm:$0xff]   ;;  %v6944_v8 = vld [vmem:[#allocation9 + $0x18c] ss:$16 sps:$4 sm:$0xff]  }
 0x278   : > { %2561 = vmatprep.mubr.bf16.mxu0 %v2144_v9  ;;  %2602 = vmatprep.mubr.bf16.mxu1 %v2144_v9  ;;  %v6939_v9 = vld [vmem:[#allocation9 + $0x180] ss:$16 sps:$4 sm:$0xff]  }
 0x279   : > { %2562 = vmatmul.mubr.bf16.vlgmr.msra.gmra.mrb[4].mxu0 %v2143_v13  ;;  %2603 = vmatmul.mubr.bf16.vlgmr.msra.gmra.mrb[4].mxu1 %v2143_v13  ;;  %v6950_v13 = vld [vmem:[#allocation9 + $0x1ac] ss:$16 sps:$4 sm:$0xff]  }
 0x27a   : > { %2932 = vmatpush1.bf16.msra.mxu0 %v6867_v10  ;;  %2973 = vmatpush1.bf16.msra.mxu1 %v6870_v11  ;;  %v6942_v10 = vld [vmem:[#allocation9 + $0x188] ss:$16 sps:$4 sm:$0xff]   ;;  %v6947_v11 = vld [vmem:[#allocation9 + $0x1a4] ss:$16 sps:$4 sm:$0xff]  }
 0x27b   : > { %2963 = vmatprep.mubr.bf16.mxu0 %v1228_v16  ;;  %3004 = vmatprep.mubr.bf16.mxu1 %v1228_v16  ;;  %v494_v16 = vrot.slane %v7755_v52, %v7750_v50  ;;  %v6960_v52 = vld [vmem:[#allocation9 + $0x1e8] ss:$16 sps:$4 sm:$0xff]  }
 0x27c   : > { %2933 = vmatprep.subr.bf16.mxu0 %v6875_v14  ;;  %2974 = vmatprep.subr.bf16.mxu1 %v6878_v15  ;;  %v6945_v14 = vld [vmem:[#allocation9 + $0x1a0] ss:$16 sps:$4 sm:$0xff]   ;;  %v6948_v15 = vld [vmem:[#allocation9 + $0x1a8] ss:$16 sps:$4 sm:$0xff]  }
 0x27e   : > { %2934 = vmatpush1.bf16.msra.mxu0 %v6873_v17  ;;  %2975 = vmatpush1.bf16.msra.mxu1 %v6876_v18  ;;  %v6953_v17 = vld [vmem:[#allocation9 + $0x1c4] ss:$16 sps:$4 sm:$0xff]   ;;  %v6956_v18 = vld [vmem:[#allocation9 + $0x1cc] ss:$16 sps:$4 sm:$0xff]  }
 0x27f   : > { %2935 = vmatprep.subr.bf16.mxu0 %v6881_v19  ;;  %2976 = vmatprep.subr.bf16.mxu1 %v6884_v20  ;;  %v6951_v19 = vld [vmem:[#allocation9 + $0x1c0] ss:$16 sps:$4 sm:$0xff]   ;;  %v6954_v20 = vld [vmem:[#allocation9 + $0x1c8] ss:$16 sps:$4 sm:$0xff]  }
 0x282   : > { %2936 = vmatpush1.bf16.msra.mxu0 %v6879_v21  ;;  %2977 = vmatpush1.bf16.msra.mxu1 %v6882_v22  ;;  %v6609_v21 = vadd.f32 %v7761_v59, %v494_v16  ;;  %v6959_v22 = vld [vmem:[#allocation9 + $0x1e4] ss:$16 sps:$4 sm:$0xff]  }
 0x283   : > { %2937 = vmatprep.subr.bf16.mxu0 %v6887_v24  ;;  %2978 = vmatprep.subr.bf16.mxu1 %v6890_v26  ;;  %v6962_v24 = vld [vmem:[#allocation9 + $0x1ec] ss:$16 sps:$4 sm:$0xff]  }
 0x284   : > { %v3013_v26 = vld [vmem:[#allocation6 + $0x10] sm:$0xff] }
 0x286   : > { %2938 = vmatpush1.bf16.msra.mxu0 %v6885_v27  ;;  %2979 = vmatpush1.bf16.msra.mxu1 %v6888_v28  ;;  %v3014_v27 = vld [vmem:[#allocation6 + $0x30] sm:$0xff]  ;;  %v6957_v28 = vld [vmem:[#allocation9 + $0x1e0] ss:$16 sps:$4 sm:$0xff]  }
 0x287   : > { %2939 = vmatprep.subr.bf16.mxu0 %v6893_v29  ;;  %2980 = vmatprep.subr.bf16.mxu1 %v6896_v30  ;;  %v1225_v29 = vmax.f32 %v6609_v21, 0.0  ;;  %v6255_v30 = vcombine.high %v3013_v26, %v3014_v27 }
 0x289   : > { %v1227_v59 = vpack.c.bf16 %v1225_v29, %v1225_v29 }
 0x28a   : > { %2940 = vmatpush1.bf16.msra.mxu0 %v6891_v31  ;;  %2981 = vmatpush1.bf16.msra.mxu1 %v6894_v32  ;;  %v3015_v31 = vld [vmem:[#allocation6 + $0x50] sm:$0xff] }
 0x28b   : > { %2941 = vmatprep.subr.bf16.mxu0 %v6899_v33  ;;  %2982 = vmatprep.subr.bf16.mxu1 %v6902_v35  ;;  %v3016_v32 = vld [vmem:[#allocation6 + $0x70] sm:$0xff]  ;;  %v6254_v33 = vcombine.low %v3013_v26, %v3014_v27 }
 0x28c   : > { %v6257_v35 = vcombine.high %v3015_v31, %v3016_v32 }
 0x28e   : > { %2942 = vmatpush1.bf16.msra.mxu0 %v6897_v37  ;;  %2983 = vmatpush1.bf16.msra.mxu1 %v6900_v38  ;;  %v3017_v37 = vld [vmem:[#allocation6 + $0x90] sm:$0xff] }
 0x28f   : > { %2943 = vmatprep.subr.bf16.mxu0 %v6905_v40  ;;  %2984 = vmatprep.subr.bf16.mxu1 %v6908_v41  ;;  %v3018_v38 = vld [vmem:[#allocation6 + $0xb0] sm:$0xff]  ;;  %v6256_v40 = vcombine.low %v3015_v31, %v3016_v32 }
 0x290   : > { %v6259_v41 = vcombine.high %v3017_v37, %v3018_v38  ;;  %v3041_v31 = vld [vmem:[#allocation6 + $0x390] sm:$0xff] }
 0x291   : > { %v3042_v32 = vld [vmem:[#allocation6 + $0x3b0] sm:$0xff] }
 0x292   : > { %2944 = vmatpush1.bf16.msra.mxu0 %v6903_v42  ;;  %2985 = vmatpush1.bf16.msra.mxu1 %v6906_v43  ;;  %v3019_v42 = vld [vmem:[#allocation6 + $0xd0] sm:$0xff] }
 0x293   : > { %2945 = vmatprep.subr.bf16.mxu0 %v6911_v44  ;;  %2986 = vmatprep.subr.bf16.mxu1 %v6914_v45  ;;  %v3020_v43 = vld [vmem:[#allocation6 + $0xf0] sm:$0xff]  ;;  %v6258_v44 = vcombine.low %v3017_v37, %v3018_v38  ;;  %v6282_v38 = vcombine.low %v3041_v31, %v3042_v32 }
 0x294   : > { %v6261_v45 = vcombine.high %v3019_v42, %v3020_v43  ;;  %v3044_v37 = vld [vmem:[#allocation6 + $0x3f0] sm:$0xff] }
 0x296   : > { %2946 = vmatpush1.bf16.msra.mxu0 %v6909_v46  ;;  %2987 = vmatpush1.bf16.msra.mxu1 %v6912_v47  ;;  %v3021_v46 = vld [vmem:[#allocation6 + $0x110] sm:$0xff] }
 0x297   : > { %2947 = vmatprep.subr.bf16.mxu0 %v6917_v48  ;;  %2988 = vmatprep.subr.bf16.mxu1 %v6920_v54  ;;  %v3022_v47 = vld [vmem:[#allocation6 + $0x130] sm:$0xff]  ;;  %v6260_v48 = vcombine.low %v3019_v42, %v3020_v43 }
 0x298   : > { %v6263_v54 = vcombine.high %v3021_v46, %v3022_v47  ;;  %v3046_v42 = vld [vmem:[#allocation6 + $0x430] sm:$0xff] }
 0x29a   : > { %2948 = vmatpush1.bf16.msra.mxu0 %v6915_v55  ;;  %2989 = vmatpush1.bf16.msra.mxu1 %v6918_v56  ;;  %v3023_v55 = vld [vmem:[#allocation6 + $0x150] sm:$0xff] }
 0x29b   : > { %2949 = vmatprep.subr.bf16.mxu0 %v6923_v58  ;;  %2990 = vmatprep.subr.bf16.mxu1 %v6926_v60  ;;  %v3024_v56 = vld [vmem:[#allocation6 + $0x170] sm:$0xff]  ;;  %v6262_v58 = vcombine.low %v3021_v46, %v3022_v47 }
 0x29c   : > { %v6265_v60 = vcombine.high %v3023_v55, %v3024_v56  ;;  %v3048_v46 = vld [vmem:[#allocation6 + $0x470] sm:$0xff] }
 0x29e   : > { %2950 = vmatpush1.bf16.msra.mxu0 %v6921_v61  ;;  %2991 = vmatpush1.bf16.msra.mxu1 %v6924_v62  ;;  %v3025_v61 = vld [vmem:[#allocation6 + $0x190] sm:$0xff] }
 0x29f   : > { %2951 = vmatprep.subr.bf16.mxu0 %v6929_v63  ;;  %2992 = vmatprep.subr.bf16.mxu1 %v6932_v0  ;;  %v3026_v62 = vld [vmem:[#allocation6 + $0x1b0] sm:$0xff]  ;;  %v6264_v63 = vcombine.low %v3023_v55, %v3024_v56 }
 0x2a0   : > { %v6267_v0 = vcombine.high %v3025_v61, %v3026_v62  ;;  %v3050_v55 = vld [vmem:[#allocation6 + $0x4b0] sm:$0xff] }
 0x2a2   : > { %2952 = vmatpush1.bf16.msra.mxu0 %v6927_v1  ;;  %2993 = vmatpush1.bf16.msra.mxu1 %v6930_v2  ;;  %v3027_v1 = vld [vmem:[#allocation6 + $0x1d0] sm:$0xff] }
 0x2a3   : > { %2953 = vmatprep.subr.bf16.mxu0 %v6935_v3  ;;  %2994 = vmatprep.subr.bf16.mxu1 %v6938_v4  ;;  %v3028_v2 = vld [vmem:[#allocation6 + $0x1f0] sm:$0xff]  ;;  %v6266_v3 = vcombine.low %v3025_v61, %v3026_v62 }
 0x2a4   : > { %v6269_v4 = vcombine.high %v3027_v1, %v3028_v2  ;;  %v3052_v61 = vld [vmem:[#allocation6 + $0x4f0] sm:$0xff] }
 0x2a6   : > { %2954 = vmatpush1.bf16.msra.mxu0 %v6933_v5  ;;  %2995 = vmatpush1.bf16.msra.mxu1 %v6936_v6  ;;  %v3029_v5 = vld [vmem:[#allocation6 + $0x210] sm:$0xff] }
 0x2a7   : > { %2955 = vmatprep.subr.bf16.mxu0 %v6941_v7  ;;  %2996 = vmatprep.subr.bf16.mxu1 %v6944_v8  ;;  %v3030_v6 = vld [vmem:[#allocation6 + $0x230] sm:$0xff]  ;;  %v6268_v7 = vcombine.low %v3027_v1, %v3028_v2 }
 0x2a8   : > { %v6271_v8 = vcombine.high %v3029_v5, %v3030_v6  ;;  %v3054_v1 = vld [vmem:[#allocation6 + $0x530] sm:$0xff] }
 0x2aa   : > { %2956 = vmatpush1.bf16.msra.mxu0 %v6939_v9  ;;  %2997 = vmatpush1.bf16.msra.mxu1 %v6942_v10  ;;  %v3031_v9 = vld [vmem:[#allocation6 + $0x250] sm:$0xff] }
 0x2ab   : > { %2957 = vmatprep.subr.bf16.mxu0 %v6947_v11  ;;  %2998 = vmatprep.subr.bf16.mxu1 %v6950_v13  ;;  %v3032_v10 = vld [vmem:[#allocation6 + $0x270] sm:$0xff]  ;;  %v6270_v11 = vcombine.low %v3029_v5, %v3030_v6 }
 0x2ac   : > { %v6273_v13 = vcombine.high %v3031_v9, %v3032_v10  ;;  %v6272_v16 = vcombine.low %v3031_v9, %v3032_v10  ;;  %v3056_v5 = vld [vmem:[#allocation6 + $0x570] sm:$0xff] }
 0x2ad   : > { %v3058_v9 = vld [vmem:[#allocation6 + $0x5b0] sm:$0xff] }
 0x2ae   : > { %2958 = vmatpush1.bf16.msra.mxu0 %v6945_v14  ;;  %2999 = vmatpush1.bf16.msra.mxu1 %v6948_v15  ;;  %v3033_v14 = vld [vmem:[#allocation6 + $0x290] sm:$0xff] }
 0x2af   : > { %2959 = vmatprep.subr.bf16.mxu0 %v6953_v17  ;;  %3000 = vmatprep.subr.bf16.mxu1 %v6956_v18  ;;  %v3034_v15 = vld [vmem:[#allocation6 + $0x2b0] sm:$0xff] }
 0x2b0   : > { %v6275_v17 = vcombine.high %v3033_v14, %v3034_v15  ;;  %v3035_v18 = vld [vmem:[#allocation6 + $0x2d0] sm:$0xff] }
 0x2b2   : > { %2960 = vmatpush1.bf16.msra.mxu0 %v6951_v19  ;;  %3001 = vmatpush1.bf16.msra.mxu1 %v6954_v20  ;;  %v3036_v19 = vld [vmem:[#allocation6 + $0x2f0] sm:$0xff]  ;;  %v6274_v20 = vcombine.low %v3033_v14, %v3034_v15 }
 0x2b3   : > { %2961 = vmatprep.subr.bf16.mxu0 %v6959_v22  ;;  %3002 = vmatprep.subr.bf16.mxu1 %v6962_v24  ;;  %v6277_v21 = vcombine.high %v3035_v18, %v3036_v19  ;;  %v3037_v22 = vld [vmem:[#allocation6 + $0x310] sm:$0xff]  ;;  %v6276_v26 = vcombine.low %v3035_v18, %v3036_v19 }
 0x2b4   : > { %v3038_v24 = vld [vmem:[#allocation6 + $0x330] sm:$0xff] }
 0x2b5   : > { %v6279_v27 = vcombine.high %v3037_v22, %v3038_v24  ;;  %v6278_v29 = vcombine.low %v3037_v22, %v3038_v24  ;;  %v3060_v14 = vld [vmem:[#allocation6 + $0x5f0] sm:$0xff] }
 0x2b6   : > { %2962 = vmatpush1.bf16.msra.mxu0 %v6957_v28  ;;  %3003 = vmatpush1.bf16.msra.mxu1 %v6960_v52  ;;  %v3039_v28 = vld [vmem:[#allocation6 + $0x350] sm:$0xff] }
 0x2b7   : > { %3697 = vmatprep.subr.bf16.mxu0 %v6255_v30  ;;  %v3040_v52 = vld [vmem:[#allocation6 + $0x370] sm:$0xff] }
 0x2b8   : > { %v6281_v30 = vcombine.high %v3039_v28, %v3040_v52  ;;  %v3062_v18 = vld [vmem:[#allocation6 + $0x630] sm:$0xff] }
 0x2b9   : > { %2964 = vmatmul.mubr.bf16.vlgmr.msra.gmra.mrb[8].mxu0 %v1227_v59  ;;  %3005 = vmatmul.mubr.bf16.vlgmr.msra.gmra.mrb[8].mxu1 %v1227_v59  ;;  %v6283_v59 = vcombine.high %v3041_v31, %v3042_v32  ;;  %v3064_v22 = vld [vmem:[#allocation6 + $0x670] sm:$0xff]  ;;  %v6968_v31 = vld [vmem:[#allocation9 + $0x424] ss:$16 sps:$4 sm:$0xff]  }
 0x2ba   : > { %3698 = vmatpush1.bf16.msra.mxu0 %v6254_v33  ;;  %3729 = vmatprep.mubr.bf16.mxu0 %v7711_v57  ;;  %v6280_v33 = vcombine.low %v3039_v28, %v3040_v52  ;;  %v3066_v28 = vld [vmem:[#allocation6 + $0x6b0] sm:$0xff]  ;;  %v6963_v52 = vld [vmem:[#allocation9 + $0x400] ss:$16 sps:$4 sm:$0xff]  }
 0x2bb   : > { %3699 = vmatprep.subr.bf16.mxu0 %v6257_v35  ;;  %v3043_v35 = vld [vmem:[#allocation6 + $0x3d0] sm:$0xff] }
 0x2bc   : > { %v6284_v43 = vcombine.low %v3043_v35, %v3044_v37 }
 0x2be   : > { %3700 = vmatpush1.bf16.msra.mxu0 %v6256_v40  ;;  %v6285_v40 = vcombine.high %v3043_v35, %v3044_v37  ;;  %v6966_v35 = vld [vmem:[#allocation9 + $0x420] ss:$16 sps:$4 sm:$0xff]   ;;  %v6971_v37 = vld [vmem:[#allocation9 + $0x444] ss:$16 sps:$4 sm:$0xff]  }
 0x2bf   : > { %3701 = vmatprep.subr.bf16.mxu0 %v6259_v41  ;;  %v3045_v41 = vld [vmem:[#allocation6 + $0x410] sm:$0xff] }
 0x2c0   : > { %v6286_v47 = vcombine.low %v3045_v41, %v3046_v42 }
 0x2c2   : > { %3702 = vmatpush1.bf16.msra.mxu0 %v6258_v44  ;;  %v6287_v44 = vcombine.high %v3045_v41, %v3046_v42  ;;  %v3069_v41 = vld [vmem:[#allocation6 + $0x710] sm:$0xff] }
 0x2c3   : > { %3703 = vmatprep.subr.bf16.mxu0 %v6261_v45  ;;  %v3047_v45 = vld [vmem:[#allocation6 + $0x450] sm:$0xff] }
 0x2c4   : > { %v6288_v56 = vcombine.low %v3047_v45, %v3048_v46  ;;  %v3070_v42 = vld [vmem:[#allocation6 + $0x730] sm:$0xff] }
 0x2c6   : > { %3704 = vmatpush1.bf16.msra.mxu0 %v6260_v48  ;;  %v6289_v48 = vcombine.high %v3047_v45, %v3048_v46  ;;  %v6311_v46 = vcombine.high %v3069_v41, %v3070_v42 }
 0x2c7   : > { %3705 = vmatprep.subr.bf16.mxu0 %v6263_v54  ;;  %v3049_v54 = vld [vmem:[#allocation6 + $0x490] sm:$0xff] }
 0x2c8   : > { %v6290_v62 = vcombine.low %v3049_v54, %v3050_v55 }
 0x2ca   : > { %3706 = vmatpush1.bf16.msra.mxu0 %v6262_v58  ;;  %v6291_v58 = vcombine.high %v3049_v54, %v3050_v55  ;;  %v6972_v54 = vld [vmem:[#allocation9 + $0x460] ss:$16 sps:$4 sm:$0xff]   ;;  %v6977_v55 = vld [vmem:[#allocation9 + $0x484] ss:$16 sps:$4 sm:$0xff]  }
 0x2cb   : > { %3707 = vmatprep.subr.bf16.mxu0 %v6265_v60  ;;  %v3051_v60 = vld [vmem:[#allocation6 + $0x4d0] sm:$0xff] }
 0x2cc   : > { %v6292_v2 = vcombine.low %v3051_v60, %v3052_v61 }
 0x2ce   : > { %3708 = vmatpush1.bf16.msra.mxu0 %v6264_v63  ;;  %v6293_v63 = vcombine.high %v3051_v60, %v3052_v61  ;;  %v3073_v60 = vld [vmem:[#allocation6 + $0x790] sm:$0xff] }
 0x2cf   : > { %3709 = vmatprep.subr.bf16.mxu0 %v6267_v0  ;;  %v3053_v0 = vld [vmem:[#allocation6 + $0x510] sm:$0xff] }
 0x2d0   : > { %v6294_v6 = vcombine.low %v3053_v0, %v3054_v1  ;;  %v3074_v61 = vld [vmem:[#allocation6 + $0x7b0] sm:$0xff] }
 0x2d2   : > { %3710 = vmatpush1.bf16.msra.mxu0 %v6266_v3  ;;  %v6295_v3 = vcombine.high %v3053_v0, %v3054_v1  ;;  %v6315_v1 = vcombine.high %v3073_v60, %v3074_v61 }
 0x2d3   : > { %3711 = vmatprep.subr.bf16.mxu0 %v6269_v4  ;;  %v3055_v4 = vld [vmem:[#allocation6 + $0x550] sm:$0xff] }
 0x2d4   : > { %v6296_v10 = vcombine.low %v3055_v4, %v3056_v5 }
 0x2d6   : > { %3712 = vmatpush1.bf16.msra.mxu0 %v6268_v7  ;;  %v6297_v7 = vcombine.high %v3055_v4, %v3056_v5  ;;  %v6978_v4 = vld [vmem:[#allocation9 + $0x4a0] ss:$16 sps:$4 sm:$0xff]   ;;  %v6983_v5 = vld [vmem:[#allocation9 + $0x4c4] ss:$16 sps:$4 sm:$0xff]  }
 0x2d7   : > { %3713 = vmatprep.subr.bf16.mxu0 %v6271_v8  ;;  %v3057_v8 = vld [vmem:[#allocation6 + $0x590] sm:$0xff] }
 0x2d8   : > { %v6298_v15 = vcombine.low %v3057_v8, %v3058_v9 }
 0x2da   : > { %3714 = vmatpush1.bf16.msra.mxu0 %v6270_v11  ;;  %v6299_v11 = vcombine.high %v3057_v8, %v3058_v9  ;;  %v3077_v8 = vld [vmem:[#allocation6 + $0x810] sm:$0xff] }
 0x2db   : > { %3715 = vmatprep.subr.bf16.mxu0 %v6273_v13  ;;  %v3059_v13 = vld [vmem:[#allocation6 + $0x5d0] sm:$0xff] }
 0x2dc   : > { %v6300_v19 = vcombine.low %v3059_v13, %v3060_v14  ;;  %v3078_v9 = vld [vmem:[#allocation6 + $0x830] sm:$0xff] }
 0x2de   : > { %3716 = vmatpush1.bf16.msra.mxu0 %v6272_v16  ;;  %v6301_v16 = vcombine.high %v3059_v13, %v3060_v14  ;;  %v6319_v14 = vcombine.high %v3077_v8, %v3078_v9 }
 0x2df   : > { %3717 = vmatprep.subr.bf16.mxu0 %v6275_v17  ;;  %v3061_v17 = vld [vmem:[#allocation6 + $0x610] sm:$0xff] }
 0x2e0   : > { %v6302_v24 = vcombine.low %v3061_v17, %v3062_v18 }
 0x2e2   : > { %3718 = vmatpush1.bf16.msra.mxu0 %v6274_v20  ;;  %v6303_v20 = vcombine.high %v3061_v17, %v3062_v18  ;;  %v6984_v17 = vld [vmem:[#allocation9 + $0x4e0] ss:$16 sps:$4 sm:$0xff]   ;;  %v6989_v18 = vld [vmem:[#allocation9 + $0x504] ss:$16 sps:$4 sm:$0xff]  }
 0x2e3   : > { %3719 = vmatprep.subr.bf16.mxu0 %v6277_v21  ;;  %v3063_v21 = vld [vmem:[#allocation6 + $0x650] sm:$0xff] }
 0x2e6   : > { %3720 = vmatpush1.bf16.msra.mxu0 %v6276_v26  ;;  %v6305_v26 = vcombine.high %v3063_v21, %v3064_v22 }
 0x2e7   : > { %3721 = vmatprep.subr.bf16.mxu0 %v6279_v27  ;;  %v3065_v27 = vld [vmem:[#allocation6 + $0x690] sm:$0xff] }
 0x2e8   : > { %v6307_v32 = vcombine.high %v3065_v27, %v3066_v28 }
 0x2ea   : > { %3722 = vmatpush1.bf16.msra.mxu0 %v6278_v29  ;;  %v6965_v29 = vld [vmem:[#allocation9 + $0x404] ss:$16 sps:$4 sm:$0xff]  }
 0x2eb   : > { %3723 = vmatprep.subr.bf16.mxu0 %v6281_v30  ;;  %v6304_v30 = vcombine.low %v3063_v21, %v3064_v22  ;;  %4249 = vmatprep.subr.bf16.mxu1 %v6965_v29  ;;  %v3081_v21 = vld [vmem:[#allocation6 + $0x890] sm:$0xff] }
 0x2ec   : > { %4250 = vmatpush1.bf16.msra.mxu1 %v6963_v52  ;;  %v3082_v22 = vld [vmem:[#allocation6 + $0x8b0] sm:$0xff] }
 0x2ed   : > { %4251 = vmatprep.subr.bf16.mxu1 %v6968_v31  ;;  %v3083_v52 = vld [vmem:[#allocation6 + $0x8d0] sm:$0xff]  ;;  %v6995_v31 = vld [vmem:[#allocation9 + $0x544] ss:$16 sps:$4 sm:$0xff]  }
 0x2ee   : > { %3724 = vmatpush1.bf16.msra.mxu0 %v6280_v33  ;;  %v3067_v33 = vld [vmem:[#allocation6 + $0x6d0] sm:$0xff] }
 0x2ef   : > { %3725 = vmatprep.subr.bf16.mxu0 %v6283_v59  ;;  %v3068_v59 = vld [vmem:[#allocation6 + $0x6f0] sm:$0xff] }
 0x2f0   : > { %4252 = vmatpush1.bf16.msra.mxu1 %v6966_v35  ;;  %v6308_v45 = vcombine.low %v3067_v33, %v3068_v59  ;;  %v3084_v29 = vld [vmem:[#allocation6 + $0x8f0] sm:$0xff] }
 0x2f1   : > { %4253 = vmatprep.subr.bf16.mxu1 %v6971_v37  ;;  %v3086_v35 = vld [vmem:[#allocation6 + $0x930] sm:$0xff]  ;;  %v6993_v37 = vld [vmem:[#allocation9 + $0x540] ss:$16 sps:$4 sm:$0xff]  }
 0x2f2   : > { %3726 = vmatpush1.bf16.msra.mxu0 %v6282_v38  ;;  %v6306_v38 = vcombine.low %v3065_v27, %v3066_v28  ;;  %v6323_v28 = vcombine.high %v3081_v21, %v3082_v22 }
 0x2f3   : > { %3727 = vmatprep.subr.bf16.mxu0 %v6285_v40  ;;  %v6309_v40 = vcombine.high %v3067_v33, %v3068_v59  ;;  %v6325_v33 = vcombine.high %v3083_v52, %v3084_v29  ;;  %v3085_v59 = vld [vmem:[#allocation6 + $0x910] sm:$0xff] }
 0x2f6   : > { %3728 = vmatpush1.bf16.msra.mxu0 %v6284_v43  ;;  %v6969_v43 = vld [vmem:[#allocation9 + $0x440] ss:$16 sps:$4 sm:$0xff]  }
 0x2f7   : > { %3738 = vmatprep.subr.bf16.mxu0 %v6287_v44  ;;  %v6974_v44 = vld [vmem:[#allocation9 + $0x464] ss:$16 sps:$4 sm:$0xff]   ;;  %4254 = vmatpush1.bf16.msra.mxu1 %v6969_v43  ;;  %v3088_v43 = vld [vmem:[#allocation6 + $0x970] sm:$0xff] }
 0x2f8   : > { %4255 = vmatprep.subr.bf16.mxu1 %v6974_v44  ;;  %v6996_v44 = vld [vmem:[#allocation9 + $0x560] ss:$16 sps:$4 sm:$0xff]  }
 0x2f9   : > { %3730 = vmatmul.mubr.bf16.vlgmr.msra.gmra.mrb[12].mxu0 %v7716_v12 }
 0x2fa   : > { %3739 = vmatpush1.bf16.msra.mxu0 %v6286_v47  ;;  %3770 = vmatprep.mubr.bf16.mxu0 %v7719_v23  ;;  %v3071_v47 = vld [vmem:[#allocation6 + $0x750] sm:$0xff] }
 0x2fb   : > { %3740 = vmatprep.subr.bf16.mxu0 %v6289_v48  ;;  %v3072_v48 = vld [vmem:[#allocation6 + $0x770] sm:$0xff]  ;;  %4256 = vmatpush1.bf16.msra.mxu1 %v6972_v54 }
 0x2fc   : > { %4257 = vmatprep.subr.bf16.mxu1 %v6977_v55  ;;  %v6312_v0 = vcombine.low %v3071_v47, %v3072_v48  ;;  %v3090_v54 = vld [vmem:[#allocation6 + $0x9b0] sm:$0xff]  ;;  %v6999_v55 = vld [vmem:[#allocation9 + $0x580] ss:$16 sps:$4 sm:$0xff]  }
 0x2fe   : > { %3741 = vmatpush1.bf16.msra.mxu0 %v6288_v56  ;;  %v6310_v56 = vcombine.low %v3069_v41, %v3070_v42  ;;  %v6327_v41 = vcombine.high %v3085_v59, %v3086_v35  ;;  %v3087_v42 = vld [vmem:[#allocation6 + $0x950] sm:$0xff] }
 0x2ff   : > { %3742 = vmatprep.subr.bf16.mxu0 %v6291_v58  ;;  %v6313_v58 = vcombine.high %v3071_v47, %v3072_v48  ;;  %v6329_v47 = vcombine.high %v3087_v42, %v3088_v43  ;;  %v3089_v48 = vld [vmem:[#allocation6 + $0x990] sm:$0xff] }
 0x302   : > { %3743 = vmatpush1.bf16.msra.mxu0 %v6290_v62  ;;  %v6975_v62 = vld [vmem:[#allocation9 + $0x480] ss:$16 sps:$4 sm:$0xff]  }
 0x303   : > { %3744 = vmatprep.subr.bf16.mxu0 %v6293_v63  ;;  %v6980_v63 = vld [vmem:[#allocation9 + $0x4a4] ss:$16 sps:$4 sm:$0xff]   ;;  %4258 = vmatpush1.bf16.msra.mxu1 %v6975_v62 }
 0x304   : > { %4259 = vmatprep.subr.bf16.mxu1 %v6980_v63  ;;  %v3091_v63 = vld [vmem:[#allocation6 + $0x9d0] sm:$0xff] }
 0x306   : > { %3745 = vmatpush1.bf16.msra.mxu0 %v6292_v2  ;;  %v3075_v2 = vld [vmem:[#allocation6 + $0x7d0] sm:$0xff] }
 0x307   : > { %3746 = vmatprep.subr.bf16.mxu0 %v6295_v3  ;;  %v3076_v3 = vld [vmem:[#allocation6 + $0x7f0] sm:$0xff]  ;;  %4260 = vmatpush1.bf16.msra.mxu1 %v6978_v4 }
 0x308   : > { %4261 = vmatprep.subr.bf16.mxu1 %v6983_v5  ;;  %v6316_v13 = vcombine.low %v3075_v2, %v3076_v3 }
 0x30a   : > { %3747 = vmatpush1.bf16.msra.mxu0 %v6294_v6  ;;  %v6314_v6 = vcombine.low %v3073_v60, %v3074_v61  ;;  %v6331_v60 = vcombine.high %v3089_v48, %v3090_v54 }
 0x30b   : > { %3748 = vmatprep.subr.bf16.mxu0 %v6297_v7  ;;  %v6317_v7 = vcombine.high %v3075_v2, %v3076_v3 }
 0x30e   : > { %3749 = vmatpush1.bf16.msra.mxu0 %v6296_v10  ;;  %v6981_v10 = vld [vmem:[#allocation9 + $0x4c0] ss:$16 sps:$4 sm:$0xff]  }
 0x30f   : > { %3750 = vmatprep.subr.bf16.mxu0 %v6299_v11  ;;  %v6986_v11 = vld [vmem:[#allocation9 + $0x4e4] ss:$16 sps:$4 sm:$0xff]   ;;  %4262 = vmatpush1.bf16.msra.mxu1 %v6981_v10  ;;  %v3093_v10 = vld [vmem:[#allocation6 + $0xa10] sm:$0xff] }
 0x310   : > { %4263 = vmatprep.subr.bf16.mxu1 %v6986_v11  ;;  %v3094_v11 = vld [vmem:[#allocation6 + $0xa30] sm:$0xff] }
 0x312   : > { %3751 = vmatpush1.bf16.msra.mxu0 %v6298_v15  ;;  %v3079_v15 = vld [vmem:[#allocation6 + $0x850] sm:$0xff] }
 0x313   : > { %3752 = vmatprep.subr.bf16.mxu0 %v6301_v16  ;;  %v3080_v16 = vld [vmem:[#allocation6 + $0x870] sm:$0xff]  ;;  %4264 = vmatpush1.bf16.msra.mxu1 %v6984_v17  ;;  %v6334_v17 = vcombine.low %v3093_v10, %v3094_v11 }
 0x314   : > { %4265 = vmatprep.subr.bf16.mxu1 %v6989_v18  ;;  %v6320_v27 = vcombine.low %v3079_v15, %v3080_v16 }
 0x316   : > { %3753 = vmatpush1.bf16.msra.mxu0 %v6300_v19  ;;  %v6318_v19 = vcombine.low %v3077_v8, %v3078_v9 }
 0x317   : > { %3754 = vmatprep.subr.bf16.mxu0 %v6303_v20  ;;  %v6321_v20 = vcombine.high %v3079_v15, %v3080_v16  ;;  %v3095_v15 = vld [vmem:[#allocation6 + $0xa50] sm:$0xff] }
 0x318   : > { %v3096_v16 = vld [vmem:[#allocation6 + $0xa70] sm:$0xff] }
 0x319   : > { %v6337_v18 = vcombine.high %v3095_v15, %v3096_v16 }
 0x31a   : > { %3755 = vmatpush1.bf16.msra.mxu0 %v6302_v24  ;;  %v6987_v24 = vld [vmem:[#allocation9 + $0x500] ss:$16 sps:$4 sm:$0xff]  }
 0x31b   : > { %3756 = vmatprep.subr.bf16.mxu0 %v6305_v26  ;;  %v6992_v26 = vld [vmem:[#allocation9 + $0x524] ss:$16 sps:$4 sm:$0xff]   ;;  %4266 = vmatpush1.bf16.msra.mxu1 %v6987_v24  ;;  %v3099_v24 = vld [vmem:[#allocation6 + $0xad0] sm:$0xff] }
 0x31c   : > { %4267 = vmatprep.subr.bf16.mxu1 %v6992_v26  ;;  %v3100_v26 = vld [vmem:[#allocation6 + $0xaf0] sm:$0xff] }
 0x31e   : > { %3757 = vmatpush1.bf16.msra.mxu0 %v6304_v30  ;;  %v6990_v30 = vld [vmem:[#allocation9 + $0x520] ss:$16 sps:$4 sm:$0xff]  }
 0x31f   : > { %3758 = vmatprep.subr.bf16.mxu0 %v6307_v32  ;;  %v6322_v32 = vcombine.low %v3081_v21, %v3082_v22  ;;  %4268 = vmatpush1.bf16.msra.mxu1 %v6990_v30  ;;  %v6336_v21 = vcombine.low %v3095_v15, %v3096_v16  ;;  %v6340_v30 = vcombine.low %v3099_v24, %v3100_v26  ;;  %v3120_v15 = vld [vmem:[#allocation6 + $0xd70] sm:$0xff] }
 0x320   : > { %4269 = vmatprep.subr.bf16.mxu1 %v6995_v31 }
 0x322   : > { %3759 = vmatpush1.bf16.msra.mxu0 %v6306_v38  ;;  %v6998_v38 = vld [vmem:[#allocation9 + $0x564] ss:$16 sps:$4 sm:$0xff]  }
 0x323   : > { %3760 = vmatprep.subr.bf16.mxu0 %v6309_v40  ;;  %v6324_v40 = vcombine.low %v3083_v52, %v3084_v29  ;;  %4270 = vmatpush1.bf16.msra.mxu1 %v6993_v37  ;;  %v3101_v52 = vld [vmem:[#allocation6 + $0xb10] sm:$0xff] }
 0x324   : > { %4271 = vmatprep.subr.bf16.mxu1 %v6998_v38  ;;  %v3102_v29 = vld [vmem:[#allocation6 + $0xb30] sm:$0xff] }
 0x325   : > { %v6343_v31 = vcombine.high %v3101_v52, %v3102_v29  ;;  %v3105_v37 = vld [vmem:[#allocation6 + $0xb90] sm:$0xff] }
 0x326   : > { %3761 = vmatpush1.bf16.msra.mxu0 %v6308_v45  ;;  %v7001_v45 = vld [vmem:[#allocation9 + $0x584] ss:$16 sps:$4 sm:$0xff]   ;;  %v3106_v38 = vld [vmem:[#allocation6 + $0xbb0] sm:$0xff] }
 0x327   : > { %3762 = vmatprep.subr.bf16.mxu0 %v6311_v46  ;;  %v6326_v46 = vcombine.low %v3085_v59, %v3086_v35  ;;  %4272 = vmatpush1.bf16.msra.mxu1 %v6996_v44  ;;  %v6342_v59 = vcombine.low %v3101_v52, %v3102_v29  ;;  %v6346_v44 = vcombine.low %v3105_v37, %v3106_v38 }
 0x328   : > { %4273 = vmatprep.subr.bf16.mxu1 %v7001_v45 }
 0x32a   : > { %3763 = vmatpush1.bf16.msra.mxu0 %v6310_v56  ;;  %v7004_v56 = vld [vmem:[#allocation9 + $0x5a4] ss:$16 sps:$4 sm:$0xff]  }
 0x32b   : > { %3764 = vmatprep.subr.bf16.mxu0 %v6313_v58  ;;  %v6328_v58 = vcombine.low %v3087_v42, %v3088_v43  ;;  %4274 = vmatpush1.bf16.msra.mxu1 %v6999_v55  ;;  %v3107_v42 = vld [vmem:[#allocation6 + $0xbd0] sm:$0xff] }
 0x32c   : > { %4275 = vmatprep.subr.bf16.mxu1 %v7004_v56  ;;  %v3108_v43 = vld [vmem:[#allocation6 + $0xbf0] sm:$0xff] }
 0x32d   : > { %v6349_v45 = vcombine.high %v3107_v42, %v3108_v43  ;;  %v3111_v55 = vld [vmem:[#allocation6 + $0xc50] sm:$0xff] }
 0x32e   : > { %3765 = vmatpush1.bf16.msra.mxu0 %v6312_v0  ;;  %v3092_v0 = vld [vmem:[#allocation6 + $0x9f0] sm:$0xff] }
 0x32f   : > { %3766 = vmatprep.subr.bf16.mxu0 %v6315_v1  ;;  %v7002_v1 = vld [vmem:[#allocation9 + $0x5a0] ss:$16 sps:$4 sm:$0xff]   ;;  %v6333_v9 = vcombine.high %v3091_v63, %v3092_v0  ;;  %v3112_v56 = vld [vmem:[#allocation6 + $0xc70] sm:$0xff] }
 0x330   : > { %4276 = vmatpush1.bf16.msra.mxu1 %v7002_v1  ;;  %v6352_v1 = vcombine.low %v3111_v55, %v3112_v56 }
 0x332   : > { %3767 = vmatpush1.bf16.msra.mxu0 %v6314_v6  ;;  %v6330_v6 = vcombine.low %v3089_v48, %v3090_v54  ;;  %v6348_v48 = vcombine.low %v3107_v42, %v3108_v43  ;;  %v7013_v42 = vld [vmem:[#allocation9 + $0x40c] ss:$16 sps:$4 sm:$0xff]  }
 0x333   : > { %3768 = vmatprep.subr.bf16.mxu0 %v6317_v7  ;;  %v3125_v43 = vld [vmem:[#allocation8 + $0x4] sm:$0x3] }
 0x336   : > { %3769 = vmatpush1.bf16.msra.mxu0 %v6316_v13  ;;  %v6332_v13 = vcombine.low %v3091_v63, %v3092_v0  ;;  %v3113_v63 = vld [vmem:[#allocation6 + $0xc90] sm:$0xff] }
 0x337   : > { %3779 = vmatprep.subr.bf16.mxu0 %v6319_v14  ;;  %v6335_v14 = vcombine.high %v3093_v10, %v3094_v11  ;;  %v3114_v0 = vld [vmem:[#allocation6 + $0xcb0] sm:$0xff] }
 0x338   : > { %v3118_v10 = vld [vmem:[#allocation6 + $0xd30] sm:$0xff] }
 0x339   : > { %3771 = vmatmul.mubr.bf16.vlgmr.msra.gmra.mrb[12].mxu0 %v7727_v25 }
 0x33a   : > { %3780 = vmatpush1.bf16.msra.mxu0 %v6318_v19  ;;  %3811 = vmatprep.mubr.bf16.mxu0 %v7729_v34  ;;  %v3097_v19 = vld [vmem:[#allocation6 + $0xa90] sm:$0xff] }
 0x33b   : > { %3781 = vmatprep.subr.bf16.mxu0 %v6321_v20  ;;  %v3098_v20 = vld [vmem:[#allocation6 + $0xab0] sm:$0xff] }
 0x33c   : > { %v6339_v22 = vcombine.high %v3097_v19, %v3098_v20 }
 0x33e   : > { %3782 = vmatpush1.bf16.msra.mxu0 %v6320_v27  ;;  %v6338_v27 = vcombine.low %v3097_v19, %v3098_v20  ;;  %v3122_v19 = vld [vmem:[#allocation6 + $0xdb0] sm:$0xff] }
 0x33f   : > { %3783 = vmatprep.subr.bf16.mxu0 %v6323_v28  ;;  %v6341_v28 = vcombine.high %v3099_v24, %v3100_v26  ;;  %v3123_v26 = vld [vmem:[#allocation6 + $0xdd0] sm:$0xff] }
 0x342   : > { %3784 = vmatpush1.bf16.msra.mxu0 %v6322_v32  ;;  %v3103_v32 = vld [vmem:[#allocation6 + $0xb50] sm:$0xff] }
 0x343   : > { %3785 = vmatprep.subr.bf16.mxu0 %v6325_v33  ;;  %v3104_v33 = vld [vmem:[#allocation6 + $0xb70] sm:$0xff] }
 0x344   : > { %v6345_v35 = vcombine.high %v3103_v32, %v3104_v33 }
 0x346   : > { %3786 = vmatpush1.bf16.msra.mxu0 %v6324_v40  ;;  %v6344_v40 = vcombine.low %v3103_v32, %v3104_v33 }
 0x347   : > { %3787 = vmatprep.subr.bf16.mxu0 %v6327_v41  ;;  %v6347_v41 = vcombine.high %v3105_v37, %v3106_v38 }
 0x34a   : > { %3788 = vmatpush1.bf16.msra.mxu0 %v6326_v46  ;;  %v3109_v46 = vld [vmem:[#allocation6 + $0xc10] sm:$0xff] }
 0x34b   : > { %3789 = vmatprep.subr.bf16.mxu0 %v6329_v47  ;;  %v3110_v47 = vld [vmem:[#allocation6 + $0xc30] sm:$0xff] }
 0x34c   : > { %v7771_v61 = vpop.f32.mrb[4].mxu0  ;;  %v7773_v62 = vpop.f32.mrb[4].mxu1  ;;  %v6351_v54 = vcombine.high %v3109_v46, %v3110_v47 }
 0x34d   : > { %v7775_v2 = vpop.f32.mrb[5].mxu0  ;;  %v7777_v3 = vpop.f32.mrb[5].mxu1 }
 0x34e   : > { %3790 = vmatpush1.bf16.msra.mxu0 %v6328_v58  ;;  %v2567_v4 = vpop.f32.mrb[6].mxu0  ;;  %v2608_v5 = vpop.f32.mrb[6].mxu1  ;;  %v6350_v58 = vcombine.low %v3109_v46, %v3110_v47 }
 0x34f   : > { %v2568_v7 = vpop.f32.mrb[7].mxu0  ;;  %v2609_v8 = vpop.f32.mrb[7].mxu1  ;;  %3791 = vmatprep.subr.bf16.mxu0 %v6331_v60  ;;  %v6353_v60 = vcombine.high %v3111_v55, %v3112_v56  ;;  %v6355_v4 = vcombine.high %v3113_v63, %v3114_v0  ;;  %v3115_v5 = vld [vmem:[#allocation6 + $0xcd0] sm:$0xff] }
 0x350   : > { %v6354_v7 = vcombine.low %v3113_v63, %v3114_v0  ;;  %v7011_v0 = vld [vmem:[#allocation9 + $0x408] ss:$16 sps:$4 sm:$0xff]  }
 0x352   : > { %3792 = vmatpush1.bf16.msra.mxu0 %v6330_v6  ;;  %v3116_v6 = vld [vmem:[#allocation6 + $0xcf0] sm:$0xff] }
 0x353   : > { %3793 = vmatprep.subr.bf16.mxu0 %v6333_v9  ;;  %v6357_v8 = vcombine.high %v3115_v5, %v3116_v6  ;;  %v3117_v9 = vld [vmem:[#allocation6 + $0xd10] sm:$0xff]  ;;  %v6356_v11 = vcombine.low %v3115_v5, %v3116_v6 }
 0x354   : > { %v6358_v16 = vcombine.low %v3117_v9, %v3118_v10  ;;  %v7014_v5 = vld [vmem:[#allocation9 + $0x428] ss:$16 sps:$4 sm:$0xff]   ;;  %v7019_v6 = vld [vmem:[#allocation9 + $0x44c] ss:$16 sps:$4 sm:$0xff]  }
 0x356   : > { %3794 = vmatpush1.bf16.msra.mxu0 %v6332_v13  ;;  %v6359_v13 = vcombine.high %v3117_v9, %v3118_v10  ;;  %v7020_v9 = vld [vmem:[#allocation9 + $0x468] ss:$16 sps:$4 sm:$0xff]   ;;  %v7025_v10 = vld [vmem:[#allocation9 + $0x48c] ss:$16 sps:$4 sm:$0xff]  }
 0x357   : > { %3795 = vmatprep.subr.bf16.mxu0 %v6335_v14  ;;  %v3119_v14 = vld [vmem:[#allocation6 + $0xd50] sm:$0xff] }
 0x358   : > { %v6360_v20 = vcombine.low %v3119_v14, %v3120_v15 }
 0x35a   : > { %3796 = vmatpush1.bf16.msra.mxu0 %v6334_v17  ;;  %v6361_v17 = vcombine.high %v3119_v14, %v3120_v15  ;;  %v7026_v14 = vld [vmem:[#allocation9 + $0x4a8] ss:$16 sps:$4 sm:$0xff]   ;;  %v7031_v15 = vld [vmem:[#allocation9 + $0x4cc] ss:$16 sps:$4 sm:$0xff]  }
 0x35b   : > { %3797 = vmatprep.subr.bf16.mxu0 %v6337_v18  ;;  %v3121_v18 = vld [vmem:[#allocation6 + $0xd90] sm:$0xff] }
 0x35e   : > { %3798 = vmatpush1.bf16.msra.mxu0 %v6336_v21  ;;  %v6363_v21 = vcombine.high %v3121_v18, %v3122_v19 }
 0x35f   : > { %3799 = vmatprep.subr.bf16.mxu0 %v6339_v22 }
 0x362   : > { %3800 = vmatpush1.bf16.msra.mxu0 %v6338_v27  ;;  %v3124_v27 = vld [vmem:[#allocation6 + $0xdf0] sm:$0xff] }
 0x363   : > { %3801 = vmatprep.subr.bf16.mxu0 %v6341_v28 }
 0x366   : > { %3802 = vmatpush1.bf16.msra.mxu0 %v6340_v30 }
 0x367   : > { %3803 = vmatprep.subr.bf16.mxu0 %v6343_v31 }
 0x36a   : > { %3804 = vmatpush1.bf16.msra.mxu0 %v6342_v59 }
 0x36b   : > { %3805 = vmatprep.subr.bf16.mxu0 %v6345_v35  ;;  %v6362_v35 = vcombine.low %v3121_v18, %v3122_v19  ;;  %v7032_v18 = vld [vmem:[#allocation9 + $0x4e8] ss:$16 sps:$4 sm:$0xff]   ;;  %v7037_v19 = vld [vmem:[#allocation9 + $0x50c] ss:$16 sps:$4 sm:$0xff]  }
 0x36e   : > { %3806 = vmatpush1.bf16.msra.mxu0 %v6344_v40  ;;  %v6364_v40 = vcombine.low %v3123_v26, %v3124_v27 }
 0x36f   : > { %3807 = vmatprep.subr.bf16.mxu0 %v6347_v41  ;;  %v7008_v41 = vld [vmem:[#allocation9 + $0x5e0] ss:$16 sps:$4 sm:$0xff]  }
 0x372   : > { %3808 = vmatpush1.bf16.msra.mxu0 %v6346_v44  ;;  %v3130_v44 = vrot.slane %v3125_v43, %v7750_v50 }
 0x373   : > { %3809 = vmatprep.subr.bf16.mxu0 %v6349_v45  ;;  %v3134_v45 = vrot.slane %v3125_v43, %v7753_v51 }
 0x376   : > { %3810 = vmatpush1.bf16.msra.mxu0 %v6348_v48 }
 0x377   : > { %3820 = vmatprep.subr.bf16.mxu0 %v6351_v54 }
 0x379   : > { %3812 = vmatmul.mubr.bf16.vlgmr.msra.gmra.mrb[12].mxu0 %v7736_v36 }
 0x37a   : > { %3821 = vmatpush1.bf16.msra.mxu0 %v6350_v58  ;;  %3852 = vmatprep.mubr.bf16.mxu0 %v7419_v53 }
 0x37b   : > { %3822 = vmatprep.subr.bf16.mxu0 %v6353_v60 }
 0x37e   : > { %3823 = vmatpush1.bf16.msra.mxu0 %v6352_v1 }
 0x37f   : > { %3824 = vmatprep.subr.bf16.mxu0 %v6355_v4  ;;  %v7016_v4 = vld [vmem:[#allocation9 + $0x42c] ss:$16 sps:$4 sm:$0xff]  }
 0x382   : > { %3825 = vmatpush1.bf16.msra.mxu0 %v6354_v7  ;;  %v7017_v7 = vld [vmem:[#allocation9 + $0x448] ss:$16 sps:$4 sm:$0xff]  }
 0x383   : > { %3826 = vmatprep.subr.bf16.mxu0 %v6357_v8  ;;  %v7022_v8 = vld [vmem:[#allocation9 + $0x46c] ss:$16 sps:$4 sm:$0xff]  }
 0x386   : > { %3827 = vmatpush1.bf16.msra.mxu0 %v6356_v11  ;;  %v7023_v11 = vld [vmem:[#allocation9 + $0x488] ss:$16 sps:$4 sm:$0xff]  }
 0x387   : > { %3828 = vmatprep.subr.bf16.mxu0 %v6359_v13  ;;  %v7028_v13 = vld [vmem:[#allocation9 + $0x4ac] ss:$16 sps:$4 sm:$0xff]  }
 0x38a   : > { %3829 = vmatpush1.bf16.msra.mxu0 %v6358_v16  ;;  %v7029_v16 = vld [vmem:[#allocation9 + $0x4c8] ss:$16 sps:$4 sm:$0xff]  }
 0x38b   : > { %3830 = vmatprep.subr.bf16.mxu0 %v6361_v17  ;;  %v7034_v17 = vld [vmem:[#allocation9 + $0x4ec] ss:$16 sps:$4 sm:$0xff]  }
 0x38c   : > { %v2965_v22 = vpop.f32.mrb[8].mxu0  ;;  %v3006_v24 = vpop.f32.mrb[8].mxu1 }
 0x38d   : > { %v7782_v28 = vadd.f32 %v2965_v22, %v7771_v61  ;;  %v7785_v52 = vadd.f32 %v3006_v24, %v7773_v62  ;;  %v2967_v29 = vpop.f32.mrb[9].mxu0  ;;  %v3008_v30 = vpop.f32.mrb[9].mxu1  ;;  %v6365_v61 = vcombine.high %v3123_v26, %v3124_v27  ;;  %v7007_v62 = vld [vmem:[#allocation9 + $0x5c4] ss:$16 sps:$4 sm:$0xff]   ;;  %v7038_v22 = vld [vmem:[#allocation9 + $0x528] ss:$16 sps:$4 sm:$0xff]  }
 0x38e   : > { %v7788_v31 = vadd.f32 %v2967_v29, %v7775_v2  ;;  %v7791_v32 = vadd.f32 %v3008_v30, %v7777_v3  ;;  %v2969_v33 = vpop.f32.mrb[10].mxu0  ;;  %v3010_v59 = vpop.f32.mrb[10].mxu1  ;;  %3831 = vmatpush1.bf16.msra.mxu0 %v6360_v20  ;;  %v7005_v2 = vld [vmem:[#allocation9 + $0x5c0] ss:$16 sps:$4 sm:$0xff]   ;;  %4277 = vmatprep.subr.bf16.mxu1 %v7007_v62  ;;  %v7010_v3 = vld [vmem:[#allocation9 + $0x5e4] ss:$16 sps:$4 sm:$0xff]  }
 0x38f   : > { %v2970_v37 = vpop.f32.mrb[11].mxu0  ;;  %v3011_v38 = vpop.f32.mrb[11].mxu1  ;;  %3832 = vmatprep.subr.bf16.mxu0 %v6363_v21  ;;  %4278 = vmatpush1.bf16.msra.mxu1 %v7005_v2  ;;  %v7035_v20 = vld [vmem:[#allocation9 + $0x508] ss:$16 sps:$4 sm:$0xff]   ;;  %v7040_v21 = vld [vmem:[#allocation9 + $0x52c] ss:$16 sps:$4 sm:$0xff]  }
 0x390   : > { %4279 = vmatprep.subr.bf16.mxu1 %v7010_v3  ;;  %v7043_v24 = vld [vmem:[#allocation9 + $0x54c] ss:$16 sps:$4 sm:$0xff]   ;;  %v7041_v26 = vld [vmem:[#allocation9 + $0x548] ss:$16 sps:$4 sm:$0xff]   ;;  %v4336_v62 = vld [vmem:[#allocation6 + $0x38] sm:$0xff] }
 0x391   : > { %v7046_v27 = vld [vmem:[#allocation9 + $0x56c] ss:$16 sps:$4 sm:$0xff]   ;;  %v7044_v29 = vld [vmem:[#allocation9 + $0x568] ss:$16 sps:$4 sm:$0xff]  }
 0x392   : > { %3833 = vmatpush1.bf16.msra.mxu0 %v6362_v35  ;;  %v7049_v30 = vld [vmem:[#allocation9 + $0x58c] ss:$16 sps:$4 sm:$0xff]   ;;  %v7047_v33 = vld [vmem:[#allocation9 + $0x588] ss:$16 sps:$4 sm:$0xff]  }
 0x393   : > { %3834 = vmatprep.subr.bf16.mxu0 %v6365_v61  ;;  %4280 = vmatpush1.bf16.msra.mxu1 %v7008_v41  ;;  %v7052_v59 = vld [vmem:[#allocation9 + $0x5ac] ss:$16 sps:$4 sm:$0xff]   ;;  %v7050_v35 = vld [vmem:[#allocation9 + $0x5a8] ss:$16 sps:$4 sm:$0xff]   ;;  %v4337_v41 = vld [vmem:[#allocation6 + $0x58] sm:$0xff] }
 0x394   : > { %4290 = vmatprep.subr.bf16.mxu1 %v7013_v42  ;;  %v7055_v37 = vld [vmem:[#allocation9 + $0x5cc] ss:$16 sps:$4 sm:$0xff]   ;;  %v7053_v38 = vld [vmem:[#allocation9 + $0x5c8] ss:$16 sps:$4 sm:$0xff]   ;;  %v4338_v42 = vld [vmem:[#allocation6 + $0x78] sm:$0xff] }
 0x395   : > { %v7058_v61 = vld [vmem:[#allocation9 + $0x5ec] ss:$16 sps:$4 sm:$0xff]   ;;  %v7056_v2 = vld [vmem:[#allocation9 + $0x5e8] ss:$16 sps:$4 sm:$0xff]  }
 0x396   : > { %3835 = vmatpush1.bf16.msra.mxu0 %v6364_v40  ;;  %v4335_v40 = vld [vmem:[#allocation6 + $0x18] sm:$0xff] }
 0x397   : > { %v6431_v3 = vcombine.high %v4335_v40, %v4336_v62  ;;  %v6430_v43 = vcombine.low %v4335_v40, %v4336_v62 }
 0x399   : > { %3853 = vmatmul.mubr.bf16.vlgmr.msra.gmra.mrb[12].mxu0 %v7743_v39 }
 0x46c   : > { %v3854_v46 = vpop.f32.mrb[12].mxu0 }
 0x46d   : > { %v6613_v47 = vadd.f32 %v3854_v46, %v3130_v44  ;;  %v3856_v48 = vpop.f32.mrb[13].mxu0  ;;  %v6433_v44 = vcombine.high %v4337_v41, %v4338_v42  ;;  %v4340_v46 = vld [vmem:[#allocation6 + $0xb8] sm:$0xff] }
 0x46e   : > { %v6614_v54 = vadd.f32 %v3856_v48, %v3134_v45  ;;  %v3858_v55 = vpop.f32.mrb[14].mxu0  ;;  %v4339_v45 = vld [vmem:[#allocation6 + $0x98] sm:$0xff] }
 0x46f   : > { %v3861_v56 = vmax.f32 %v6613_v47, 0.0  ;;  %v3859_v58 = vpop.f32.mrb[15].mxu0  ;;  %v6432_v47 = vcombine.low %v4337_v41, %v4338_v42  ;;  %v6435_v48 = vcombine.high %v4339_v45, %v4340_v46  ;;  %v4342_v55 = vld [vmem:[#allocation6 + $0xf8] sm:$0xff] }
 0x470   : > { %v3862_v60 = vmax.f32 %v6614_v54, 0.0  ;;  %v4341_v54 = vld [vmem:[#allocation6 + $0xd8] sm:$0xff] }
 0x471   : > { %v7796_v1 = vpack.c.bf16 %v3861_v56, %v3861_v56  ;;  %v6434_v56 = vcombine.low %v4339_v45, %v4340_v46  ;;  %v6437_v58 = vcombine.high %v4341_v54, %v4342_v55 }
 0x472   : > { %v3864_v63 = vpack.c.bf16 %v3862_v60, %v3862_v60  ;;  %v4343_v60 = vld [vmem:[#allocation6 + $0x118] sm:$0xff] }
 0x474   : > { %4281 = vmatprep.mubr.bf16.mxu1 %v3864_v63 }
 0x475   : > { %4282 = vmatmul.mubr.bf16.vlgmr.msra.gmra.mrb[12].mxu1 %v7796_v1 }
 0x476   : > { %4291 = vmatpush1.bf16.msra.mxu1 %v7011_v0  ;;  %4322 = vmatprep.mubr.bf16.mxu1 %v3864_v63  ;;  %v4344_v63 = vld [vmem:[#allocation6 + $0x138] sm:$0xff]  ;;  %v6436_v0 = vcombine.low %v4341_v54, %v4342_v55 }
 0x477   : > { %4292 = vmatprep.subr.bf16.mxu1 %v7016_v4  ;;  %v6439_v4 = vcombine.high %v4343_v60, %v4344_v63 }
 0x47a   : > { %4293 = vmatpush1.bf16.msra.mxu1 %v7014_v5  ;;  %v4345_v5 = vld [vmem:[#allocation6 + $0x158] sm:$0xff] }
 0x47b   : > { %4294 = vmatprep.subr.bf16.mxu1 %v7019_v6  ;;  %v6438_v6 = vcombine.low %v4343_v60, %v4344_v63 }
 0x47e   : > { %4295 = vmatpush1.bf16.msra.mxu1 %v7017_v7  ;;  %v4347_v7 = vld [vmem:[#allocation6 + $0x198] sm:$0xff] }
 0x47f   : > { %4296 = vmatprep.subr.bf16.mxu1 %v7022_v8  ;;  %v4348_v8 = vld [vmem:[#allocation6 + $0x1b8] sm:$0xff] }
 0x482   : > { %4297 = vmatpush1.bf16.msra.mxu1 %v7020_v9 }
 0x483   : > { %4298 = vmatprep.subr.bf16.mxu1 %v7025_v10  ;;  %v6443_v10 = vcombine.high %v4347_v7, %v4348_v8 }
 0x486   : > { %4299 = vmatpush1.bf16.msra.mxu1 %v7023_v11  ;;  %v4349_v11 = vld [vmem:[#allocation6 + $0x1d8] sm:$0xff] }
 0x487   : > { %4300 = vmatprep.subr.bf16.mxu1 %v7028_v13  ;;  %v4350_v13 = vld [vmem:[#allocation6 + $0x1f8] sm:$0xff] }
 0x48a   : > { %4301 = vmatpush1.bf16.msra.mxu1 %v7026_v14  ;;  %v6442_v14 = vcombine.low %v4347_v7, %v4348_v8 }
 0x48b   : > { %4302 = vmatprep.subr.bf16.mxu1 %v7031_v15  ;;  %v6445_v15 = vcombine.high %v4349_v11, %v4350_v13 }
 0x48e   : > { %4303 = vmatpush1.bf16.msra.mxu1 %v7029_v16  ;;  %v4351_v16 = vld [vmem:[#allocation6 + $0x218] sm:$0xff] }
 0x48f   : > { %4304 = vmatprep.subr.bf16.mxu1 %v7034_v17  ;;  %v4352_v17 = vld [vmem:[#allocation6 + $0x238] sm:$0xff] }
 0x492   : > { %4305 = vmatpush1.bf16.msra.mxu1 %v7032_v18  ;;  %v6444_v18 = vcombine.low %v4349_v11, %v4350_v13 }
 0x493   : > { %4306 = vmatprep.subr.bf16.mxu1 %v7037_v19  ;;  %v6447_v19 = vcombine.high %v4351_v16, %v4352_v17 }
 0x496   : > { %4307 = vmatpush1.bf16.msra.mxu1 %v7035_v20  ;;  %v4353_v20 = vld [vmem:[#allocation6 + $0x258] sm:$0xff] }
 0x497   : > { %4308 = vmatprep.subr.bf16.mxu1 %v7040_v21  ;;  %v4354_v21 = vld [vmem:[#allocation6 + $0x278] sm:$0xff] }
 0x49a   : > { %4309 = vmatpush1.bf16.msra.mxu1 %v7038_v22  ;;  %v6446_v22 = vcombine.low %v4351_v16, %v4352_v17 }
 0x49b   : > { %4310 = vmatprep.subr.bf16.mxu1 %v7043_v24  ;;  %v6449_v24 = vcombine.high %v4353_v20, %v4354_v21 }
 0x49e   : > { %4311 = vmatpush1.bf16.msra.mxu1 %v7041_v26  ;;  %v4355_v26 = vld [vmem:[#allocation6 + $0x298] sm:$0xff] }
 0x49f   : > { %4312 = vmatprep.subr.bf16.mxu1 %v7046_v27  ;;  %v4356_v27 = vld [vmem:[#allocation6 + $0x2b8] sm:$0xff] }
 0x4a2   : > { %4313 = vmatpush1.bf16.msra.mxu1 %v7044_v29  ;;  %v6448_v29 = vcombine.low %v4353_v20, %v4354_v21  ;;  %v4379_v20 = vld [vmem:[#allocation6 + $0x598] sm:$0xff] }
 0x4a3   : > { %4314 = vmatprep.subr.bf16.mxu1 %v7049_v30  ;;  %v6451_v30 = vcombine.high %v4355_v26, %v4356_v27  ;;  %v4380_v21 = vld [vmem:[#allocation6 + $0x5b8] sm:$0xff] }
 0x4a6   : > { %4315 = vmatpush1.bf16.msra.mxu1 %v7047_v33  ;;  %v4357_v33 = vld [vmem:[#allocation6 + $0x2d8] sm:$0xff] }
 0x4a7   : > { %4316 = vmatprep.subr.bf16.mxu1 %v7052_v59  ;;  %v4358_v59 = vld [vmem:[#allocation6 + $0x2f8] sm:$0xff] }
 0x4a8   : > { %v6452_v40 = vcombine.low %v4357_v33, %v4358_v59 }
 0x4aa   : > { %4317 = vmatpush1.bf16.msra.mxu1 %v7050_v35  ;;  %v6450_v35 = vcombine.low %v4355_v26, %v4356_v27  ;;  %v4381_v26 = vld [vmem:[#allocation6 + $0x5d8] sm:$0xff] }
 0x4ab   : > { %4318 = vmatprep.subr.bf16.mxu1 %v7055_v37  ;;  %v6453_v37 = vcombine.high %v4357_v33, %v4358_v59  ;;  %v4382_v27 = vld [vmem:[#allocation6 + $0x5f8] sm:$0xff] }
 0x4ac   : > { %v4383_v33 = vld [vmem:[#allocation6 + $0x618] sm:$0xff] }
 0x4ad   : > { %v4384_v59 = vld [vmem:[#allocation6 + $0x638] sm:$0xff] }
 0x4ae   : > { %4319 = vmatpush1.bf16.msra.mxu1 %v7053_v38  ;;  %v4359_v38 = vld [vmem:[#allocation6 + $0x318] sm:$0xff] }
 0x4af   : > { %4320 = vmatprep.subr.bf16.mxu1 %v7058_v61  ;;  %v4360_v61 = vld [vmem:[#allocation6 + $0x338] sm:$0xff] }
 0x4b0   : > { %v6455_v62 = vcombine.high %v4359_v38, %v4360_v61  ;;  %v6454_v41 = vcombine.low %v4359_v38, %v4360_v61  ;;  %v4385_v38 = vld [vmem:[#allocation6 + $0x658] sm:$0xff] }
 0x4b1   : > { %v4386_v61 = vld [vmem:[#allocation6 + $0x678] sm:$0xff] }
 0x4b2   : > { %4321 = vmatpush1.bf16.msra.mxu1 %v7056_v2  ;;  %v4361_v2 = vld [vmem:[#allocation6 + $0x358] sm:$0xff] }
 0x4b3   : > { %5019 = vmatprep.subr.bf16.mxu1 %v6431_v3  ;;  %v4362_v3 = vld [vmem:[#allocation6 + $0x378] sm:$0xff] }
 0x4b4   : > { %v6457_v42 = vcombine.high %v4361_v2, %v4362_v3  ;;  %v6456_v45 = vcombine.low %v4361_v2, %v4362_v3  ;;  %v4387_v2 = vld [vmem:[#allocation6 + $0x698] sm:$0xff] }
 0x4b5   : > { %4323 = vmatmul.mubr.bf16.vlgmr.msra.gmra.mrb[16].mxu1 %v7796_v1  ;;  %v4346_v1 = vld [vmem:[#allocation6 + $0x178] sm:$0xff] }
 0x4b6   : > { %5020 = vmatpush1.bf16.msra.mxu1 %v6430_v43  ;;  %5051 = vmatprep.mubr.bf16.mxu1 %v7711_v57  ;;  %v6441_v57 = vcombine.high %v4345_v5, %v4346_v1  ;;  %v6440_v9 = vcombine.low %v4345_v5, %v4346_v1  ;;  %v4363_v43 = vld [vmem:[#allocation6 + $0x398] sm:$0xff] }
 0x4b7   : > { %5021 = vmatprep.subr.bf16.mxu1 %v6433_v44  ;;  %v4364_v44 = vld [vmem:[#allocation6 + $0x3b8] sm:$0xff] }
 0x4b8   : > { %v6459_v46 = vcombine.high %v4363_v43, %v4364_v44  ;;  %v6458_v54 = vcombine.low %v4363_v43, %v4364_v44  ;;  %v4388_v3 = vld [vmem:[#allocation6 + $0x6b8] sm:$0xff]  ;;  %v6480_v43 = vcombine.low %v4385_v38, %v4386_v61 }
 0x4b9   : > { %v7064_v44 = vld [vmem:[#allocation9 + $0x624] ss:$16 sps:$4 sm:$0xff]  }
 0x4ba   : > { %5022 = vmatpush1.bf16.msra.mxu1 %v6432_v47  ;;  %v4365_v47 = vld [vmem:[#allocation6 + $0x3d8] sm:$0xff] }
 0x4bb   : > { %5023 = vmatprep.subr.bf16.mxu1 %v6435_v48  ;;  %v4366_v48 = vld [vmem:[#allocation6 + $0x3f8] sm:$0xff] }
 0x4bc   : > { %v6461_v55 = vcombine.high %v4365_v47, %v4366_v48  ;;  %v6460_v60 = vcombine.low %v4365_v47, %v4366_v48  ;;  %v4390_v47 = vld [vmem:[#allocation6 + $0x6f8] sm:$0xff] }
 0x4bd   : > { %v7062_v48 = vld [vmem:[#allocation9 + $0x620] ss:$16 sps:$4 sm:$0xff]  }
 0x4be   : > { %5024 = vmatpush1.bf16.msra.mxu1 %v6434_v56  ;;  %v4367_v56 = vld [vmem:[#allocation6 + $0x418] sm:$0xff] }
 0x4bf   : > { %5025 = vmatprep.subr.bf16.mxu1 %v6437_v58  ;;  %v4368_v58 = vld [vmem:[#allocation6 + $0x438] sm:$0xff] }
 0x4c0   : > { %v6463_v63 = vcombine.high %v4367_v56, %v4368_v58  ;;  %v6462_v5 = vcombine.low %v4367_v56, %v4368_v58  ;;  %v4391_v58 = vld [vmem:[#allocation6 + $0x718] sm:$0xff] }
 0x4c2   : > { %5026 = vmatpush1.bf16.msra.mxu1 %v6436_v0  ;;  %v4369_v0 = vld [vmem:[#allocation6 + $0x458] sm:$0xff] }
 0x4c3   : > { %5027 = vmatprep.subr.bf16.mxu1 %v6439_v4  ;;  %v4370_v4 = vld [vmem:[#allocation6 + $0x478] sm:$0xff] }
 0x4c4   : > { %v6465_v1 = vcombine.high %v4369_v0, %v4370_v4  ;;  %v6464_v7 = vcombine.low %v4369_v0, %v4370_v4  ;;  %v7070_v0 = vld [vmem:[#allocation9 + $0x664] ss:$16 sps:$4 sm:$0xff]  }
 0x4c6   : > { %5028 = vmatpush1.bf16.msra.mxu1 %v6438_v6  ;;  %v4371_v6 = vld [vmem:[#allocation6 + $0x498] sm:$0xff] }
 0x4c7   : > { %5029 = vmatprep.subr.bf16.mxu1 %v6441_v57  ;;  %v4372_v57 = vld [vmem:[#allocation6 + $0x4b8] sm:$0xff] }
 0x4c8   : > { %v6467_v8 = vcombine.high %v4371_v6, %v4372_v57  ;;  %v6466_v11 = vcombine.low %v4371_v6, %v4372_v57  ;;  %v4394_v6 = vld [vmem:[#allocation6 + $0x778] sm:$0xff] }
 0x4c9   : > { %v7068_v57 = vld [vmem:[#allocation9 + $0x660] ss:$16 sps:$4 sm:$0xff]  }
 0x4ca   : > { %5030 = vmatpush1.bf16.msra.mxu1 %v6440_v9  ;;  %v4373_v9 = vld [vmem:[#allocation6 + $0x4d8] sm:$0xff] }
 0x4cb   : > { %5031 = vmatprep.subr.bf16.mxu1 %v6443_v10  ;;  %v4374_v10 = vld [vmem:[#allocation6 + $0x4f8] sm:$0xff] }
 0x4cc   : > { %v6469_v13 = vcombine.high %v4373_v9, %v4374_v10  ;;  %v6468_v16 = vcombine.low %v4373_v9, %v4374_v10  ;;  %v4395_v10 = vld [vmem:[#allocation6 + $0x798] sm:$0xff] }
 0x4ce   : > { %5032 = vmatpush1.bf16.msra.mxu1 %v6442_v14  ;;  %v4375_v14 = vld [vmem:[#allocation6 + $0x518] sm:$0xff] }
 0x4cf   : > { %5033 = vmatprep.subr.bf16.mxu1 %v6445_v15  ;;  %v4376_v15 = vld [vmem:[#allocation6 + $0x538] sm:$0xff] }
 0x4d0   : > { %v6471_v17 = vcombine.high %v4375_v14, %v4376_v15 }
 0x4d2   : > { %5034 = vmatpush1.bf16.msra.mxu1 %v6444_v18  ;;  %v4377_v18 = vld [vmem:[#allocation6 + $0x558] sm:$0xff] }
 0x4d3   : > { %5035 = vmatprep.subr.bf16.mxu1 %v6447_v19  ;;  %v6470_v19 = vcombine.low %v4375_v14, %v4376_v15  ;;  %v7076_v14 = vld [vmem:[#allocation9 + $0x6a4] ss:$16 sps:$4 sm:$0xff]  }
 0x4d6   : > { %5036 = vmatpush1.bf16.msra.mxu1 %v6446_v22 }
 0x4d7   : > { %5037 = vmatprep.subr.bf16.mxu1 %v6449_v24  ;;  %v6475_v24 = vcombine.high %v4379_v20, %v4380_v21 }
 0x4da   : > { %5038 = vmatpush1.bf16.msra.mxu1 %v6448_v29  ;;  %v6474_v29 = vcombine.low %v4379_v20, %v4380_v21  ;;  %v4399_v21 = vld [vmem:[#allocation6 + $0x818] sm:$0xff] }
 0x4db   : > { %5039 = vmatprep.subr.bf16.mxu1 %v6451_v30  ;;  %v6477_v30 = vcombine.high %v4381_v26, %v4382_v27 }
 0x4de   : > { %5040 = vmatpush1.bf16.msra.mxu1 %v6450_v35  ;;  %v6476_v35 = vcombine.low %v4381_v26, %v4382_v27  ;;  %v7082_v26 = vld [vmem:[#allocation9 + $0x6e4] ss:$16 sps:$4 sm:$0xff]  }
 0x4df   : > { %5041 = vmatprep.subr.bf16.mxu1 %v6453_v37  ;;  %v6479_v37 = vcombine.high %v4383_v33, %v4384_v59 }
 0x4e2   : > { %5042 = vmatpush1.bf16.msra.mxu1 %v6452_v40  ;;  %v6478_v40 = vcombine.low %v4383_v33, %v4384_v59  ;;  %v4402_v33 = vld [vmem:[#allocation6 + $0x878] sm:$0xff] }
 0x4e3   : > { %5043 = vmatprep.subr.bf16.mxu1 %v6455_v62  ;;  %v6481_v62 = vcombine.high %v4385_v38, %v4386_v61  ;;  %v7080_v59 = vld [vmem:[#allocation9 + $0x6e0] ss:$16 sps:$4 sm:$0xff]  }
 0x4e4   : > { %v4403_v61 = vld [vmem:[#allocation6 + $0x898] sm:$0xff] }
 0x4e6   : > { %5044 = vmatpush1.bf16.msra.mxu1 %v6454_v41  ;;  %v7059_v41 = vld [vmem:[#allocation9 + $0x600] ss:$16 sps:$4 sm:$0xff]  }
 0x4e7   : > { %5045 = vmatprep.subr.bf16.mxu1 %v6457_v42  ;;  %v7061_v42 = vld [vmem:[#allocation9 + $0x604] ss:$16 sps:$4 sm:$0xff]  }
 0x4e8   : > { %5571 = vmatprep.subr.bf16.mxu0 %v7061_v42  ;;  %v4405_v42 = vld [vmem:[#allocation6 + $0x8d8] sm:$0xff] }
 0x4e9   : > { %5572 = vmatpush1.bf16.msra.mxu0 %v7059_v41 }
 0x4ea   : > { %5046 = vmatpush1.bf16.msra.mxu1 %v6456_v45  ;;  %v6483_v45 = vcombine.high %v4387_v2, %v4388_v3  ;;  %5573 = vmatprep.subr.bf16.mxu0 %v7064_v44  ;;  %v7086_v44 = vld [vmem:[#allocation9 + $0x720] ss:$16 sps:$4 sm:$0xff]  }
 0x4eb   : > { %5047 = vmatprep.subr.bf16.mxu1 %v6459_v46  ;;  %v4389_v46 = vld [vmem:[#allocation6 + $0x6d8] sm:$0xff] }
 0x4ec   : > { %v6485_v56 = vcombine.high %v4389_v46, %v4390_v47  ;;  %v6484_v4 = vcombine.low %v4389_v46, %v4390_v47 }
 0x4ed   : > { %5574 = vmatpush1.bf16.msra.mxu0 %v7062_v48  ;;  %v4407_v48 = vld [vmem:[#allocation6 + $0x918] sm:$0xff] }
 0x4ee   : > { %5048 = vmatpush1.bf16.msra.mxu1 %v6458_v54  ;;  %v7067_v54 = vld [vmem:[#allocation9 + $0x644] ss:$16 sps:$4 sm:$0xff]  }
 0x4ef   : > { %5049 = vmatprep.subr.bf16.mxu1 %v6461_v55  ;;  %v6482_v55 = vcombine.low %v4387_v2, %v4388_v3  ;;  %5575 = vmatprep.subr.bf16.mxu0 %v7067_v54  ;;  %v7088_v2 = vld [vmem:[#allocation9 + $0x724] ss:$16 sps:$4 sm:$0xff]   ;;  %v7089_v54 = vld [vmem:[#allocation9 + $0x740] ss:$16 sps:$4 sm:$0xff]  }
 0x4f2   : > { %5050 = vmatpush1.bf16.msra.mxu1 %v6460_v60  ;;  %v4392_v60 = vld [vmem:[#allocation6 + $0x738] sm:$0xff] }
 0x4f3   : > { %5060 = vmatprep.subr.bf16.mxu1 %v6463_v63  ;;  %v7065_v63 = vld [vmem:[#allocation9 + $0x640] ss:$16 sps:$4 sm:$0xff]  }
 0x4f4   : > { %5576 = vmatpush1.bf16.msra.mxu0 %v7065_v63  ;;  %v7092_v63 = vld [vmem:[#allocation9 + $0x760] ss:$16 sps:$4 sm:$0xff]  }
 0x4f5   : > { %5052 = vmatmul.mubr.bf16.vlgmr.msra.gmra.mrb[20].mxu1 %v7716_v12  ;;  %v4378_v12 = vld [vmem:[#allocation6 + $0x578] sm:$0xff]  ;;  %5577 = vmatprep.subr.bf16.mxu0 %v7070_v0 }
 0x4f6   : > { %5061 = vmatpush1.bf16.msra.mxu1 %v6462_v5  ;;  %5092 = vmatprep.mubr.bf16.mxu1 %v7719_v23  ;;  %v6473_v23 = vcombine.high %v4377_v18, %v4378_v12  ;;  %v6472_v22 = vcombine.low %v4377_v18, %v4378_v12  ;;  %v6487_v5 = vcombine.high %v4391_v58, %v4392_v60  ;;  %v4398_v18 = vld [vmem:[#allocation6 + $0x7f8] sm:$0xff] }
 0x4f7   : > { %5062 = vmatprep.subr.bf16.mxu1 %v6465_v1  ;;  %v4393_v1 = vld [vmem:[#allocation6 + $0x758] sm:$0xff] }
 0x4f8   : > { %v6489_v9 = vcombine.high %v4393_v1, %v4394_v6  ;;  %5578 = vmatpush1.bf16.msra.mxu0 %v7068_v57  ;;  %v6488_v15 = vcombine.low %v4393_v1, %v4394_v6  ;;  %v7074_v12 = vld [vmem:[#allocation9 + $0x6a0] ss:$16 sps:$4 sm:$0xff]   ;;  %v7097_v0 = vld [vmem:[#allocation9 + $0x784] ss:$16 sps:$4 sm:$0xff]  }
 0x4f9   : > { %v4411_v1 = vld [vmem:[#allocation6 + $0x998] sm:$0xff] }
 0x4fa   : > { %5063 = vmatpush1.bf16.msra.mxu1 %v6464_v7  ;;  %v7073_v7 = vld [vmem:[#allocation9 + $0x684] ss:$16 sps:$4 sm:$0xff]   ;;  %v7095_v57 = vld [vmem:[#allocation9 + $0x780] ss:$16 sps:$4 sm:$0xff]  }
 0x4fb   : > { %5064 = vmatprep.subr.bf16.mxu1 %v6467_v8  ;;  %v6486_v8 = vcombine.low %v4391_v58, %v4392_v60  ;;  %5579 = vmatprep.subr.bf16.mxu0 %v7073_v7  ;;  %v4409_v58 = vld [vmem:[#allocation6 + $0x958] sm:$0xff] }
 0x4fc   : > { %v4410_v60 = vld [vmem:[#allocation6 + $0x978] sm:$0xff] }
 0x4fd   : > { %v4412_v6 = vld [vmem:[#allocation6 + $0x9b8] sm:$0xff] }
 0x4fe   : > { %5065 = vmatpush1.bf16.msra.mxu1 %v6466_v11  ;;  %v4396_v11 = vld [vmem:[#allocation6 + $0x7b8] sm:$0xff] }
 0x4ff   : > { %5066 = vmatprep.subr.bf16.mxu1 %v6469_v13  ;;  %v7071_v13 = vld [vmem:[#allocation9 + $0x680] ss:$16 sps:$4 sm:$0xff]   ;;  %v7100_v7 = vld [vmem:[#allocation9 + $0x7a4] ss:$16 sps:$4 sm:$0xff]  }
 0x500   : > { %5580 = vmatpush1.bf16.msra.mxu0 %v7071_v13  ;;  %v4414_v13 = vld [vmem:[#allocation6 + $0x9f8] sm:$0xff] }
 0x501   : > { %5581 = vmatprep.subr.bf16.mxu0 %v7076_v14  ;;  %v7098_v14 = vld [vmem:[#allocation9 + $0x7a0] ss:$16 sps:$4 sm:$0xff]  }
 0x502   : > { %5067 = vmatpush1.bf16.msra.mxu1 %v6468_v16  ;;  %v6491_v16 = vcombine.high %v4395_v10, %v4396_v11 }
 0x503   : > { %5068 = vmatprep.subr.bf16.mxu1 %v6471_v17  ;;  %v4397_v17 = vld [vmem:[#allocation6 + $0x7d8] sm:$0xff] }
 0x504   : > { %v6493_v20 = vcombine.high %v4397_v17, %v4398_v18  ;;  %5582 = vmatpush1.bf16.msra.mxu0 %v7074_v12  ;;  %v6492_v27 = vcombine.low %v4397_v17, %v4398_v18  ;;  %v6506_v12 = vcombine.low %v4411_v1, %v4412_v6 }
 0x506   : > { %5069 = vmatpush1.bf16.msra.mxu1 %v6470_v19  ;;  %v7079_v19 = vld [vmem:[#allocation9 + $0x6c4] ss:$16 sps:$4 sm:$0xff]  }
 0x507   : > { %5070 = vmatprep.subr.bf16.mxu1 %v6473_v23  ;;  %v6490_v23 = vcombine.low %v4395_v10, %v4396_v11  ;;  %5583 = vmatprep.subr.bf16.mxu0 %v7079_v19  ;;  %v4413_v11 = vld [vmem:[#allocation6 + $0x9d8] sm:$0xff] }
 0x50a   : > { %5071 = vmatpush1.bf16.msra.mxu1 %v6472_v22  ;;  %v4400_v22 = vld [vmem:[#allocation6 + $0x838] sm:$0xff] }
 0x50b   : > { %5072 = vmatprep.subr.bf16.mxu1 %v6475_v24  ;;  %v7077_v24 = vld [vmem:[#allocation9 + $0x6c0] ss:$16 sps:$4 sm:$0xff]  }
 0x50c   : > { %5584 = vmatpush1.bf16.msra.mxu0 %v7077_v24 }
 0x50d   : > { %5585 = vmatprep.subr.bf16.mxu0 %v7082_v26  ;;  %v4418_v26 = vld [vmem:[#allocation6 + $0xa78] sm:$0xff] }
 0x50e   : > { %5073 = vmatpush1.bf16.msra.mxu1 %v6474_v29  ;;  %v6495_v29 = vcombine.high %v4399_v21, %v4400_v22 }
 0x50f   : > { %5074 = vmatprep.subr.bf16.mxu1 %v6477_v30  ;;  %v4401_v30 = vld [vmem:[#allocation6 + $0x858] sm:$0xff] }
 0x510   : > { %v6497_v38 = vcombine.high %v4401_v30, %v4402_v33  ;;  %5586 = vmatpush1.bf16.msra.mxu0 %v7080_v59  ;;  %v6496_v3 = vcombine.low %v4401_v30, %v4402_v33  ;;  %v4420_v30 = vld [vmem:[#allocation6 + $0xab8] sm:$0xff] }
 0x512   : > { %5075 = vmatpush1.bf16.msra.mxu1 %v6476_v35  ;;  %v7085_v35 = vld [vmem:[#allocation9 + $0x704] ss:$16 sps:$4 sm:$0xff]  }
 0x513   : > { %5076 = vmatprep.subr.bf16.mxu1 %v6479_v37  ;;  %v6494_v37 = vcombine.low %v4399_v21, %v4400_v22  ;;  %5587 = vmatprep.subr.bf16.mxu0 %v7085_v35  ;;  %v4416_v21 = vld [vmem:[#allocation6 + $0xa38] sm:$0xff]  ;;  %v6508_v22 = vcombine.low %v4413_v11, %v4414_v13 }
 0x514   : > { %v4421_v35 = vld [vmem:[#allocation6 + $0xad8] sm:$0xff] }
 0x516   : > { %5077 = vmatpush1.bf16.msra.mxu1 %v6478_v40  ;;  %v4404_v40 = vld [vmem:[#allocation6 + $0x8b8] sm:$0xff] }
 0x517   : > { %5078 = vmatprep.subr.bf16.mxu1 %v6481_v62  ;;  %v7083_v62 = vld [vmem:[#allocation9 + $0x700] ss:$16 sps:$4 sm:$0xff]   ;;  %v6499_v41 = vcombine.high %v4403_v61, %v4404_v40  ;;  %v6498_v46 = vcombine.low %v4403_v61, %v4404_v40 }
 0x518   : > { %5588 = vmatpush1.bf16.msra.mxu0 %v7083_v62  ;;  %v4423_v40 = vld [vmem:[#allocation6 + $0xb18] sm:$0xff] }
 0x519   : > { %5589 = vmatprep.subr.bf16.mxu0 %v7088_v2  ;;  %v4424_v62 = vld [vmem:[#allocation6 + $0xb38] sm:$0xff] }
 0x51a   : > { %5079 = vmatpush1.bf16.msra.mxu1 %v6480_v43  ;;  %v4406_v43 = vld [vmem:[#allocation6 + $0x8f8] sm:$0xff] }
 0x51b   : > { %5080 = vmatprep.subr.bf16.mxu1 %v6483_v45  ;;  %v7091_v45 = vld [vmem:[#allocation9 + $0x744] ss:$16 sps:$4 sm:$0xff]   ;;  %v6501_v47 = vcombine.high %v4405_v42, %v4406_v43 }
 0x51c   : > { %5590 = vmatpush1.bf16.msra.mxu0 %v7086_v44 }
 0x51d   : > { %5591 = vmatprep.subr.bf16.mxu0 %v7091_v45  ;;  %v4427_v45 = vld [vmem:[#allocation6 + $0xb98] sm:$0xff] }
 0x51e   : > { %5081 = vmatpush1.bf16.msra.mxu1 %v6482_v55  ;;  %v7094_v55 = vld [vmem:[#allocation9 + $0x764] ss:$16 sps:$4 sm:$0xff]  }
 0x51f   : > { %5082 = vmatprep.subr.bf16.mxu1 %v6485_v56 }
 0x520   : > { %5592 = vmatpush1.bf16.msra.mxu0 %v7089_v54  ;;  %v4430_v54 = vld [vmem:[#allocation6 + $0xbf8] sm:$0xff] }
 0x521   : > { %5593 = vmatprep.subr.bf16.mxu0 %v7094_v55 }
 0x522   : > { %5083 = vmatpush1.bf16.msra.mxu1 %v6484_v4 }
 0x523   : > { %5084 = vmatprep.subr.bf16.mxu1 %v6487_v5  ;;  %v6505_v5 = vcombine.high %v4409_v58, %v4410_v60 }
 0x524   : > { %5594 = vmatpush1.bf16.msra.mxu0 %v7092_v63 }
 0x525   : > { %5595 = vmatprep.subr.bf16.mxu0 %v7097_v0  ;;  %v4433_v0 = vld [vmem:[#allocation6 + $0xc58] sm:$0xff] }
 0x526   : > { %5085 = vmatpush1.bf16.msra.mxu1 %v6486_v8  ;;  %v6504_v8 = vcombine.low %v4409_v58, %v4410_v60  ;;  %v4432_v58 = vld [vmem:[#allocation6 + $0xc38] sm:$0xff] }
 0x527   : > { %5086 = vmatprep.subr.bf16.mxu1 %v6489_v9  ;;  %v6507_v9 = vcombine.high %v4411_v1, %v4412_v6  ;;  %v4435_v6 = vld [vmem:[#allocation6 + $0xc98] sm:$0xff] }
 0x528   : > { %5596 = vmatpush1.bf16.msra.mxu0 %v7095_v57  ;;  %v4436_v57 = vld [vmem:[#allocation6 + $0xcb8] sm:$0xff] }
 0x529   : > { %5597 = vmatprep.subr.bf16.mxu0 %v7100_v7 }
 0x52a   : > { %5087 = vmatpush1.bf16.msra.mxu1 %v6488_v15 }
 0x52b   : > { %5088 = vmatprep.subr.bf16.mxu1 %v6491_v16 }
 0x52c   : > { %5598 = vmatpush1.bf16.msra.mxu0 %v7098_v14  ;;  %v4439_v14 = vld [vmem:[#allocation6 + $0xd18] sm:$0xff] }
 0x52e   : > { %5089 = vmatpush1.bf16.msra.mxu1 %v6490_v23  ;;  %v6509_v23 = vcombine.high %v4413_v11, %v4414_v13  ;;  %v6530_v11 = vcombine.low %v4435_v6, %v4436_v57 }
 0x52f   : > { %5090 = vmatprep.subr.bf16.mxu1 %v6493_v20  ;;  %v4415_v20 = vld [vmem:[#allocation6 + $0xa18] sm:$0xff] }
 0x530   : > { %v6511_v24 = vcombine.high %v4415_v20, %v4416_v21 }
 0x532   : > { %5091 = vmatpush1.bf16.msra.mxu1 %v6492_v27  ;;  %v6510_v27 = vcombine.low %v4415_v20, %v4416_v21  ;;  %v4443_v20 = vld [vmem:[#allocation6 + $0xd98] sm:$0xff] }
 0x533   : > { %5101 = vmatprep.subr.bf16.mxu1 %v6495_v29  ;;  %v4419_v29 = vld [vmem:[#allocation6 + $0xa98] sm:$0xff] }
 0x534   : > { %v6515_v59 = vcombine.high %v4419_v29, %v4420_v30  ;;  %v4444_v21 = vld [vmem:[#allocation6 + $0xdb8] sm:$0xff] }
 0x535   : > { %5093 = vmatmul.mubr.bf16.vlgmr.msra.gmra.mrb[20].mxu1 %v7727_v25  ;;  %v4408_v25 = vld [vmem:[#allocation6 + $0x938] sm:$0xff] }
 0x536   : > { %5102 = vmatpush1.bf16.msra.mxu1 %v6494_v37  ;;  %5133 = vmatprep.mubr.bf16.mxu1 %v7729_v34  ;;  %v6500_v34 = vcombine.low %v4405_v42, %v4406_v43  ;;  %v6503_v56 = vcombine.high %v4407_v48, %v4408_v25  ;;  %v6502_v4 = vcombine.low %v4407_v48, %v4408_v25  ;;  %v4422_v37 = vld [vmem:[#allocation6 + $0xaf8] sm:$0xff] }
 0x537   : > { %5103 = vmatprep.subr.bf16.mxu1 %v6497_v38  ;;  %v6514_v38 = vcombine.low %v4419_v29, %v4420_v30  ;;  %v6517_v61 = vcombine.high %v4421_v35, %v4422_v37  ;;  %v6516_v2 = vcombine.low %v4421_v35, %v4422_v37  ;;  %v4426_v42 = vld [vmem:[#allocation6 + $0xb78] sm:$0xff]  ;;  %v6518_v43 = vcombine.low %v4423_v40, %v4424_v62 }
 0x538   : > { %v4429_v25 = vld [vmem:[#allocation6 + $0xbd8] sm:$0xff] }
 0x539   : > { %v6524_v60 = vcombine.low %v4429_v25, %v4430_v54 }
 0x53a   : > { %5104 = vmatpush1.bf16.msra.mxu1 %v6496_v3  ;;  %v6519_v3 = vcombine.high %v4423_v40, %v4424_v62  ;;  %v7101_v40 = vld [vmem:[#allocation9 + $0x7c0] ss:$16 sps:$4 sm:$0xff]  }
 0x53b   : > { %5105 = vmatprep.subr.bf16.mxu1 %v6499_v41  ;;  %v4425_v41 = vld [vmem:[#allocation6 + $0xb58] sm:$0xff] }
 0x53c   : > { %v6521_v44 = vcombine.high %v4425_v41, %v4426_v42  ;;  %v7104_v62 = vld [vmem:[#allocation9 + $0x7e0] ss:$16 sps:$4 sm:$0xff]  }
 0x53e   : > { %5106 = vmatpush1.bf16.msra.mxu1 %v6498_v46  ;;  %v4428_v46 = vld [vmem:[#allocation6 + $0xbb8] sm:$0xff] }
 0x53f   : > { %5107 = vmatprep.subr.bf16.mxu1 %v6501_v47  ;;  %v6520_v47 = vcombine.low %v4425_v41, %v4426_v42  ;;  %v6523_v48 = vcombine.high %v4427_v45, %v4428_v46  ;;  %v6522_v55 = vcombine.low %v4427_v45, %v4428_v46 }
 0x542   : > { %5108 = vmatpush1.bf16.msra.mxu1 %v6500_v34  ;;  %v6525_v34 = vcombine.high %v4429_v25, %v4430_v54  ;;  %v7107_v54 = vld [vmem:[#allocation9 + $0x608] ss:$16 sps:$4 sm:$0xff]  }
 0x543   : > { %5109 = vmatprep.subr.bf16.mxu1 %v6503_v56  ;;  %v4431_v56 = vld [vmem:[#allocation6 + $0xc18] sm:$0xff] }
 0x544   : > { %v6527_v63 = vcombine.high %v4431_v56, %v4432_v58 }
 0x546   : > { %5110 = vmatpush1.bf16.msra.mxu1 %v6502_v4  ;;  %v4434_v4 = vld [vmem:[#allocation6 + $0xc78] sm:$0xff] }
 0x547   : > { %5111 = vmatprep.subr.bf16.mxu1 %v6505_v5  ;;  %v6526_v5 = vcombine.low %v4431_v56, %v4432_v58  ;;  %v6529_v1 = vcombine.high %v4433_v0, %v4434_v4  ;;  %v6528_v7 = vcombine.low %v4433_v0, %v4434_v4  ;;  %v7110_v56 = vld [vmem:[#allocation9 + $0x628] ss:$16 sps:$4 sm:$0xff]   ;;  %v7115_v58 = vld [vmem:[#allocation9 + $0x64c] ss:$16 sps:$4 sm:$0xff]  }
 0x548   : > { %v4283_v10 = vpop.f32.mrb[12].mxu1  ;;  %v7116_v0 = vld [vmem:[#allocation9 + $0x668] ss:$16 sps:$4 sm:$0xff]   ;;  %v7121_v4 = vld [vmem:[#allocation9 + $0x68c] ss:$16 sps:$4 sm:$0xff]  }
 0x549   : > { %v7806_v15 = vadd.f32 %v4283_v10, %v7782_v28  ;;  %v4285_v16 = vpop.f32.mrb[13].mxu1  ;;  %v4417_v28 = vld [vmem:[#allocation6 + $0xa58] sm:$0xff] }
 0x54a   : > { %v7809_v17 = vadd.f32 %v4285_v16, %v7788_v31  ;;  %5112 = vmatpush1.bf16.msra.mxu1 %v6504_v8  ;;  %v4287_v18 = vpop.f32.mrb[14].mxu1  ;;  %v6513_v31 = vcombine.high %v4417_v28, %v4418_v26  ;;  %v6512_v33 = vcombine.low %v4417_v28, %v4418_v26  ;;  %v6531_v8 = vcombine.high %v4435_v6, %v4436_v57  ;;  %v4438_v10 = vld [vmem:[#allocation6 + $0xcf8] sm:$0xff]  ;;  %v7122_v6 = vld [vmem:[#allocation9 + $0x6a8] ss:$16 sps:$4 sm:$0xff]   ;;  %v7127_v57 = vld [vmem:[#allocation9 + $0x6cc] ss:$16 sps:$4 sm:$0xff]  }
 0x54b   : > { %v4288_v19 = vpop.f32.mrb[15].mxu1  ;;  %5113 = vmatprep.subr.bf16.mxu1 %v6507_v9  ;;  %v4437_v9 = vld [vmem:[#allocation6 + $0xcd8] sm:$0xff] }
 0x54c   : > { %v6533_v13 = vcombine.high %v4437_v9, %v4438_v10  ;;  %v4440_v16 = vld [vmem:[#allocation6 + $0xd38] sm:$0xff]  ;;  %v6532_v18 = vcombine.low %v4437_v9, %v4438_v10  ;;  %v7128_v9 = vld [vmem:[#allocation9 + $0x6e8] ss:$16 sps:$4 sm:$0xff]   ;;  %v7133_v10 = vld [vmem:[#allocation9 + $0x70c] ss:$16 sps:$4 sm:$0xff]  }
 0x54d   : > { %v4441_v19 = vld [vmem:[#allocation6 + $0xd58] sm:$0xff] }
 0x54e   : > { %5114 = vmatpush1.bf16.msra.mxu1 %v6506_v12  ;;  %v6535_v12 = vcombine.high %v4439_v14, %v4440_v16  ;;  %v4445_v26 = vld [vmem:[#allocation6 + $0xdd8] sm:$0xff] }
 0x54f   : > { %5115 = vmatprep.subr.bf16.mxu1 %v6509_v23  ;;  %v6534_v23 = vcombine.low %v4439_v14, %v4440_v16  ;;  %v7134_v14 = vld [vmem:[#allocation9 + $0x728] ss:$16 sps:$4 sm:$0xff]   ;;  %v7139_v16 = vld [vmem:[#allocation9 + $0x74c] ss:$16 sps:$4 sm:$0xff]  }
 0x552   : > { %5116 = vmatpush1.bf16.msra.mxu1 %v6508_v22 }
 0x553   : > { %5117 = vmatprep.subr.bf16.mxu1 %v6511_v24  ;;  %v6539_v24 = vcombine.high %v4443_v20, %v4444_v21 }
 0x556   : > { %5118 = vmatpush1.bf16.msra.mxu1 %v6510_v27  ;;  %v4446_v27 = vld [vmem:[#allocation6 + $0xdf8] sm:$0xff] }
 0x557   : > { %5119 = vmatprep.subr.bf16.mxu1 %v6513_v31  ;;  %v6541_v37 = vcombine.high %v4445_v26, %v4446_v27 }
 0x55a   : > { %5120 = vmatpush1.bf16.msra.mxu1 %v6512_v33 }
 0x55b   : > { %5121 = vmatprep.subr.bf16.mxu1 %v6515_v59  ;;  %v6538_v59 = vcombine.low %v4443_v20, %v4444_v21  ;;  %v7146_v20 = vld [vmem:[#allocation9 + $0x7a8] ss:$16 sps:$4 sm:$0xff]   ;;  %v7151_v21 = vld [vmem:[#allocation9 + $0x7cc] ss:$16 sps:$4 sm:$0xff]  }
 0x55e   : > { %5122 = vmatpush1.bf16.msra.mxu1 %v6514_v38  ;;  %v6540_v38 = vcombine.low %v4445_v26, %v4446_v27  ;;  %v5657_v26 = vld [vmem:[#allocation11] sm:$0xf] }
 0x55f   : > { %5123 = vmatprep.subr.bf16.mxu1 %v6517_v61  ;;  %v7103_v61 = vld [vmem:[#allocation9 + $0x7c4] ss:$16 sps:$4 sm:$0xff]   ;;  %v5662_v27 = vrot.slane %v5657_v26, %v7750_v50 }
 0x560   : > { %5599 = vmatprep.subr.bf16.mxu0 %v7103_v61 }
 0x561   : > { %5600 = vmatpush1.bf16.msra.mxu0 %v7101_v40 }
 0x562   : > { %5124 = vmatpush1.bf16.msra.mxu1 %v6516_v2  ;;  %v4447_v2 = vld [vmem:[#allocation8 + $0x6] sm:$0x3] }
 0x563   : > { %5125 = vmatprep.subr.bf16.mxu1 %v6519_v3  ;;  %v4452_v3 = vrot.slane %v4447_v2, %v7750_v50  ;;  %v4456_v41 = vrot.slane %v4447_v2, %v7753_v51 }
 0x566   : > { %5126 = vmatpush1.bf16.msra.mxu1 %v6518_v43 }
 0x567   : > { %5127 = vmatprep.subr.bf16.mxu1 %v6521_v44 }
 0x56a   : > { %5128 = vmatpush1.bf16.msra.mxu1 %v6520_v47 }
 0x56b   : > { %5129 = vmatprep.subr.bf16.mxu1 %v6523_v48 }
 0x56e   : > { %5130 = vmatpush1.bf16.msra.mxu1 %v6522_v55 }
 0x56f   : > { %5131 = vmatprep.subr.bf16.mxu1 %v6525_v34  ;;  %v7112_v34 = vld [vmem:[#allocation9 + $0x62c] ss:$16 sps:$4 sm:$0xff]  }
 0x572   : > { %5132 = vmatpush1.bf16.msra.mxu1 %v6524_v60  ;;  %v7113_v60 = vld [vmem:[#allocation9 + $0x648] ss:$16 sps:$4 sm:$0xff]  }
 0x573   : > { %5142 = vmatprep.subr.bf16.mxu1 %v6527_v63  ;;  %v7118_v63 = vld [vmem:[#allocation9 + $0x66c] ss:$16 sps:$4 sm:$0xff]  }
 0x575   : > { %5134 = vmatmul.mubr.bf16.vlgmr.msra.gmra.mrb[20].mxu1 %v7736_v36  ;;  %v4442_v36 = vld [vmem:[#allocation6 + $0xd78] sm:$0xff] }
 0x576   : > { %5143 = vmatpush1.bf16.msra.mxu1 %v6526_v5  ;;  %5174 = vmatprep.mubr.bf16.mxu1 %v7419_v53  ;;  %v6537_v53 = vcombine.high %v4441_v19, %v4442_v36  ;;  %v6536_v22 = vcombine.low %v4441_v19, %v4442_v36  ;;  %v7119_v5 = vld [vmem:[#allocation9 + $0x688] ss:$16 sps:$4 sm:$0xff]   ;;  %v7145_v36 = vld [vmem:[#allocation9 + $0x78c] ss:$16 sps:$4 sm:$0xff]  }
 0x577   : > { %5144 = vmatprep.subr.bf16.mxu1 %v6529_v1  ;;  %v7124_v1 = vld [vmem:[#allocation9 + $0x6ac] ss:$16 sps:$4 sm:$0xff]   ;;  %v7140_v19 = vld [vmem:[#allocation9 + $0x768] ss:$16 sps:$4 sm:$0xff]  }
 0x57a   : > { %5145 = vmatpush1.bf16.msra.mxu1 %v6528_v7  ;;  %v7125_v7 = vld [vmem:[#allocation9 + $0x6c8] ss:$16 sps:$4 sm:$0xff]  }
 0x57b   : > { %5146 = vmatprep.subr.bf16.mxu1 %v6531_v8  ;;  %v7130_v8 = vld [vmem:[#allocation9 + $0x6ec] ss:$16 sps:$4 sm:$0xff]  }
 0x57e   : > { %5147 = vmatpush1.bf16.msra.mxu1 %v6530_v11  ;;  %v7131_v11 = vld [vmem:[#allocation9 + $0x708] ss:$16 sps:$4 sm:$0xff]  }
 0x57f   : > { %5148 = vmatprep.subr.bf16.mxu1 %v6533_v13  ;;  %v7136_v13 = vld [vmem:[#allocation9 + $0x72c] ss:$16 sps:$4 sm:$0xff]  }
 0x582   : > { %5149 = vmatpush1.bf16.msra.mxu1 %v6532_v18  ;;  %v7137_v18 = vld [vmem:[#allocation9 + $0x748] ss:$16 sps:$4 sm:$0xff]  }
 0x583   : > { %5150 = vmatprep.subr.bf16.mxu1 %v6535_v12  ;;  %v7142_v12 = vld [vmem:[#allocation9 + $0x76c] ss:$16 sps:$4 sm:$0xff]  }
 0x586   : > { %5151 = vmatpush1.bf16.msra.mxu1 %v6534_v23  ;;  %v7143_v23 = vld [vmem:[#allocation9 + $0x788] ss:$16 sps:$4 sm:$0xff]  }
 0x587   : > { %5152 = vmatprep.subr.bf16.mxu1 %v6537_v53  ;;  %v7148_v53 = vld [vmem:[#allocation9 + $0x7ac] ss:$16 sps:$4 sm:$0xff]  }
 0x588   : > { %v4324_v28 = vpop.f32.mrb[16].mxu1 }
 0x589   : > { %v7814_v31 = vadd.f32 %v4324_v28, %v7785_v52  ;;  %v4326_v29 = vpop.f32.mrb[17].mxu1  ;;  %v7106_v52 = vld [vmem:[#allocation9 + $0x7e4] ss:$16 sps:$4 sm:$0xff]   ;;  %v7152_v28 = vld [vmem:[#allocation9 + $0x7e8] ss:$16 sps:$4 sm:$0xff]  }
 0x58a   : > { %v7817_v30 = vadd.f32 %v4326_v29, %v7791_v32  ;;  %v4328_v33 = vpop.f32.mrb[18].mxu1  ;;  %5153 = vmatpush1.bf16.msra.mxu1 %v6536_v22  ;;  %5601 = vmatprep.subr.bf16.mxu0 %v7106_v52  ;;  %v7109_v32 = vld [vmem:[#allocation9 + $0x60c] ss:$16 sps:$4 sm:$0xff]   ;;  %v7149_v22 = vld [vmem:[#allocation9 + $0x7c8] ss:$16 sps:$4 sm:$0xff]  }
 0x58b   : > { %v4329_v35 = vpop.f32.mrb[19].mxu1  ;;  %5154 = vmatprep.subr.bf16.mxu1 %v6539_v24  ;;  %5602 = vmatpush1.bf16.msra.mxu0 %v7104_v62  ;;  %v7154_v24 = vld [vmem:[#allocation9 + $0x7ec] ss:$16 sps:$4 sm:$0xff]   ;;  %v5687_v33 = vld [vmem:[#allocation12] sm:$0xf] }
 0x58c   : > { %5612 = vmatprep.subr.bf16.mxu0 %v7109_v32  ;;  %v5692_v52 = vrot.slane %v5687_v33, %v7750_v50  ;;  %v5696_v2 = vrot.slane %v5687_v33, %v7753_v51 }
 0x58e   : > { %5155 = vmatpush1.bf16.msra.mxu1 %v6538_v59  ;;  %v5666_v59 = vrot.slane %v5657_v26, %v7753_v51 }
 0x58f   : > { %5156 = vmatprep.subr.bf16.mxu1 %v6541_v37 }
 0x592   : > { %5157 = vmatpush1.bf16.msra.mxu1 %v6540_v38 }
 0x595   : > { %5175 = vmatmul.mubr.bf16.vlgmr.msra.gmra.mrb[20].mxu1 %v7743_v39 }
 0x668   : > { %v5176_v42 = vpop.f32.mrb[20].mxu1 }
 0x669   : > { %v6615_v43 = vadd.f32 %v5176_v42, %v4452_v3  ;;  %v5178_v44 = vpop.f32.mrb[21].mxu1 }
 0x66a   : > { %v6616_v45 = vadd.f32 %v5178_v44, %v4456_v41  ;;  %v5180_v39 = vpop.f32.mrb[22].mxu1 }
 0x66b   : > { %v5183_v46 = vmax.f32 %v6615_v43, 0.0  ;;  %v5181_v47 = vpop.f32.mrb[23].mxu1 }
 0x66c   : > { %v5184_v48 = vmax.f32 %v6616_v45, 0.0  ;;  %v5669_v45 = vsub.s32 2, %v7747_v49 }
 0x66d   : > { %v7822_v55 = vpack.c.bf16 %v5183_v46, %v5183_v46 }
 0x66e   : > { %v5186_v25 = vpack.c.bf16 %v5184_v48, %v5184_v48  ;;  %v5670_v39 = vrot.slane %v5657_v26, %v5669_v45 }
 0x670   : > { %5603 = vmatprep.mubr.bf16.mxu0 %v5186_v25 }
 0x671   : > { %5604 = vmatmul.mubr.bf16.vlgmr.msra.gmra.mrb[16].mxu0 %v7822_v55 }
 0x672   : > { %5613 = vmatpush1.bf16.msra.mxu0 %v7107_v54  ;;  %5644 = vmatprep.mubr.bf16.mxu0 %v5186_v25 }
 0x673   : > { %5614 = vmatprep.subr.bf16.mxu0 %v7112_v34 }
 0x676   : > { %5615 = vmatpush1.bf16.msra.mxu0 %v7110_v56 }
 0x677   : > { %5616 = vmatprep.subr.bf16.mxu0 %v7115_v58 }
 0x67a   : > { %5617 = vmatpush1.bf16.msra.mxu0 %v7113_v60 }
 0x67b   : > { %5618 = vmatprep.subr.bf16.mxu0 %v7118_v63 }
 0x67e   : > { %5619 = vmatpush1.bf16.msra.mxu0 %v7116_v0 }
 0x67f   : > { %5620 = vmatprep.subr.bf16.mxu0 %v7121_v4 }
 0x682   : > { %5621 = vmatpush1.bf16.msra.mxu0 %v7119_v5 }
 0x683   : > { %5622 = vmatprep.subr.bf16.mxu0 %v7124_v1 }
 0x686   : > { %5623 = vmatpush1.bf16.msra.mxu0 %v7122_v6 }
 0x687   : > { %5624 = vmatprep.subr.bf16.mxu0 %v7127_v57 }
 0x68a   : > { %5625 = vmatpush1.bf16.msra.mxu0 %v7125_v7 }
 0x68b   : > { %5626 = vmatprep.subr.bf16.mxu0 %v7130_v8 }
 0x68e   : > { %5627 = vmatpush1.bf16.msra.mxu0 %v7128_v9 }
 0x68f   : > { %5628 = vmatprep.subr.bf16.mxu0 %v7133_v10 }
 0x692   : > { %5629 = vmatpush1.bf16.msra.mxu0 %v7131_v11 }
 0x693   : > { %5630 = vmatprep.subr.bf16.mxu0 %v7136_v13 }
 0x696   : > { %5631 = vmatpush1.bf16.msra.mxu0 %v7134_v14 }
 0x697   : > { %5632 = vmatprep.subr.bf16.mxu0 %v7139_v16 }
 0x69a   : > { %5633 = vmatpush1.bf16.msra.mxu0 %v7137_v18 }
 0x69b   : > { %5634 = vmatprep.subr.bf16.mxu0 %v7142_v12 }
 0x69e   : > { %5635 = vmatpush1.bf16.msra.mxu0 %v7140_v19 }
 0x69f   : > { %5636 = vmatprep.subr.bf16.mxu0 %v7145_v36 }
 0x6a2   : > { %5637 = vmatpush1.bf16.msra.mxu0 %v7143_v23 }
 0x6a3   : > { %5638 = vmatprep.subr.bf16.mxu0 %v7148_v53 }
 0x6a6   : > { %5639 = vmatpush1.bf16.msra.mxu0 %v7146_v20 }
 0x6a7   : > { %5640 = vmatprep.subr.bf16.mxu0 %v7151_v21 }
 0x6aa   : > { %5641 = vmatpush1.bf16.msra.mxu0 %v7149_v22 }
 0x6ab   : > { %5642 = vmatprep.subr.bf16.mxu0 %v7154_v24 }
 0x6ae   : > { %5643 = vmatpush1.bf16.msra.mxu0 %v7152_v28 }
 0x6b1   : > { %5645 = vmatmul.mubr.bf16.vlgmr.msra.gmra.mrb[20].mxu0 %v7822_v55  ;;  %v5700_v55 = vrot.slane %v5687_v33, %v5669_v45 }
 0x744   : > { %v5605_v29 = vpop.f32.mrb[16].mxu0 }
 0x745   : > { %v5653_v35 = vadd.f32 %v5605_v29, %v7806_v15  ;;  %v5607_v37 = vpop.f32.mrb[17].mxu0  ;;  %v5673_v15 = vsub.s32 3, %v7747_v49 }
 0x746   : > { %v5654_v38 = vadd.f32 %v5607_v37, %v7809_v17  ;;  %v5609_v61 = vpop.f32.mrb[18].mxu0 }
 0x747   : > { %v5679_v40 = vadd.f32 %v5662_v27, %v5653_v35  ;;  %v5610_v62 = vpop.f32.mrb[19].mxu0  ;;  %v5674_v17 = vrot.slane %v5657_v26, %v5673_v15  ;;  %v5704_v56 = vrot.slane %v5687_v33, %v5673_v15 }
 0x748   : > { %v5680_v32 = vadd.f32 %v5666_v59, %v5654_v38 }
 0x749   : > { %v5683_v3 = vmax.f32 %v5679_v40, 0.0 }
 0x74a   : > { %v5684_v41 = vmax.f32 %v5680_v32, 0.0 }
 0x74b   : > { %v5709_v42 = vmul.f32 %v5692_v52, %v5683_v3 }
 0x74c   : > { %v5710_v43 = vmul.f32 %v5696_v2, %v5684_v41 }
 0x74e   : > { %v5713_v44 = vadd.f32 %v5710_v43, %v5709_v42 }
 0x784   : > { %v5646_v46 = vpop.f32.mrb[20].mxu0 }
 0x785   : > { %v5655_v47 = vadd.f32 %v5646_v46, %v7814_v31  ;;  %v5648_v48 = vpop.f32.mrb[21].mxu0  ;;  %v5719_v31 = vstv %s5718_s9 }
 0x786   : > { %v5656_v50 = vadd.f32 %v5648_v48, %v7817_v30  ;;  %v5650_v25 = vpop.f32.mrb[22].mxu0 }
 0x787   : > { %v5681_v54 = vadd.f32 %v5670_v39, %v5655_v47  ;;  %v5651_v51 = vpop.f32.mrb[23].mxu0 }
 0x788   : > { %v5682_v34 = vadd.f32 %v5674_v17, %v5656_v50 }
 0x789   : > { %v5685_v58 = vmax.f32 %v5681_v54, 0.0 }
 0x78a   : > { %v5686_v60 = vmax.f32 %v5682_v34, 0.0 }
 0x78b   : > { %v5711_v63 = vmul.f32 %v5700_v55, %v5685_v58 }
 0x78c   : > { %v5712_v0 = vmul.f32 %v5704_v56, %v5686_v60 }
 0x78d   : > { %v5714_v49 = vadd.f32 %v5713_v44, %v5711_v63 }
 0x78f   : > { %v5715_v4 = vadd.f32 %v5714_v49, %v5712_v0 }
 0x791   : > { %5716 = vadd.xlane.f32.xlu0 %v5715_v4 }
 0x81e   : > { %v5717_v5 = vpop.xlane.xlu0 %5716 }
 0x81f   : > { %v5720_v1 = vadd.f32 %v5719_v31, %v5717_v5 }
 0x821   : > { %v5721_v30 = vsub.f32 0.0, %v5720_v1 }
 0x823   : > { %v5722_v6 = vmul.f32 1.442695, %v5721_v30 }
 0x825   : > { %7155 = vpow2.f32 %v5722_v6 }
 0x82f   : > { %v7156_v57 = vpop.eup %7155 }
 0x830   : > { %v5724_v7 = vadd.f32 1.0, %v7156_v57 }
 0x832   : > { %7157 = vrcp.f32 %v5724_v7 }
 0x83c   : > { %v7158_v8 = vpop.eup %7157 }
 0x83d   : > { %5726 = vxpose.xlu0.b32.start.end [1/1] (short) (narrow) %v7158_v8, 8 }
 0x8bd   : > { %v5742_v9 = vpop.trf.xlu0 }
 0x8be   : > { %5759 = vst.msk [vmem:[%s361_s30] sm:$0x1] %vm5758_vm0, %v5742_v9 }
 0x8bf   : > { %7342 = shalt.err (!%p7339_p3)
}
 0x8c0   : > { %s7343_s20 = scalar_lea.hbm %s7841_s6, 16  ;;  %s7347_s25 = scalar_lea.hbm %s7892_s7, 32 }
 0x8c1   : > { %p7344_p6 = scmp.ne.s32.totalorder %s7841_s6, %s7343_s20  ;;  %p7348_p8 = scmp.lt.u32.totalorder %s7841_s6, %s7892_s7 }
 0x8c2   : > { %p7349_p0 = scmp.lt.u32.totalorder %s7347_s25, %s7343_s20  ;;  %p7351_p2 = scmp.lt.u32.totalorder %s7343_s20, %s7841_s6 }
 0x8c3   : > { %p7345_p9 = pnand %p7344_p6, %p7911_p7 }
 0x8c4   : > { %p7350_p5 = por %p7349_p0, %p7348_p8 }
 0x8c5   : > { %p7346_p4 = pneg %p7345_p9 }
 0x8c6   : > { %p7352_p10 = por %p7351_p2, %p7350_p5 }
 0x8c8   : > { %p7353_p1 = pnand %p7352_p10, %p7346_p4 }
 0x8ca   : > { %7356 = shalt.err (!%p7353_p1)
}
 0x8cb   : > { %6690 = dma.vmem_to_hbm [thread:$0]  (%p7911_p7), %s7843_s10, 16, %s7841_s6, %s5761_s19  }
 0x8cc PF: > { %s5785_s30 = sand.u32 1, %s7395_s26   ;;  %p7912_p11 = scmp.ne.s32.totalorder %s7902_s11, 0 }
 0x8cd   : > { %p7913_p12 = scmp.ge.s32.totalorder %s7407_s29, 2  ;;  %s5786_s22 = scalar_lea.sflag [#allocation5], %s5785_s30 }
 0x8cf   : > { %p6713_p13 = pnand %p7913_p12, %p7912_p11 }
 0x8d1   : > { %7390 = dma.done.wait (!%p6713_p13), %s5786_s22, 16  }
 0x8d2   : > { %7392 = vsyncadd (!%p6713_p13), %s5786_s22, 4294967280  ;;  %p24_p3 = scmp.ge.s32.totalorder %s7618_s12, 4   ;;  %s7914_s26 = smov %s7399_s27 }
 0x8d3   : > { %s7915_s27 = smov %s7403_s28  ;;  %s7916_s28 = smov %s7630_s14 }
 0x8d4   : > { %s7917_s29 = smov %s7618_s12  ;;  %26 = sbr.rel (!%p24_p3) target bundleno = 10 (0xa), region = 113 }
 0x8db   :  { %5790 = vsyncpa [#allocation4], 1 }
 0x8dc   :  { %5792 = vsyncpa [#allocation4 + $0x1], 1 }
 0x8dd   :  { %5793 = vsyncpa [#allocation7], 1 }
 0x8de   :  { %5794 = vsyncpa [#allocation10], 1 }
 0x8df   :  { %5795 = vsyncpa [#allocation13], 1 }
 0x8e0   :  { %5796 = vsyncpa [#allocation5], 1 }
 0x8e1   :  { %5798 = vsyncpa [#allocation5 + $0x1], 1 }

</bundles_post_ra>
